<compile_context>
chip_gen: v5e
topology: v5e:2x2
jax: 0.10.0
libtpu: 0.0.40
codegen_flags: <defaults>
</compile_context>

<pallas_src>
import functools
import numpy as np
import jax
import jax.numpy as jnp
from jax.experimental import pallas as pl
from jax.experimental.pallas import tpu as pltpu

# bf16 MXU inputs + f32 accumulation (native on v5e/v6e/v7x MXUs).
_MXU_DTYPE = jnp.bfloat16

ATOM_FEATURE_DIMS = [10, 6]   # deterministic stand-in for get_feature_dims(atom_names)
BOND_FEATURE_DIMS = [5, 3]    # deterministic stand-in for get_feature_dims(bond_names)

_ROW_ALIGN = 8
_VMEM_LIMIT = 64 * 1024 * 1024   # <= physical VMEM on every target chip (v7x: 64 MiB)


# --------------------------------------------------------------------------- utilities
def _round_up(x, m):
    return ((x + m - 1) // m) * m


def _pick_tiles(m):
    """(padded_rows, row_tile).
      m <= 256      : one full tile (no pipeline overhead on tiny inputs)
      256 < m <=4096: exactly 2 tiles -> both v7x TensorCores get work on the
                      "parallel" row axis, still only one pipeline step per core
      m > 4096      : 2048-row tiles (a 2048x128 f32 in+out pair double-buffered is
                      ~4 MiB of VMEM -- comfortable on every chip, and the ~0.35us
                      per-step cost is amortized over >=1 MiB of DMA)."""
    if m <= 256:
        mp = _round_up(max(m, _ROW_ALIGN), _ROW_ALIGN)
        return mp, mp
    if m <= 4096:
        tm = _round_up(pl.cdiv(m, 2), _ROW_ALIGN)
        return 2 * tm, tm
    tm = 2048
    return _round_up(m, tm), tm


def _pad_rows_to(x, mp):
    return x if x.shape[0] == mp else jnp.pad(x, ((0, mp - x.shape[0]), (0, 0)))


# --------------------------------------------------------------------------- Pallas kernel
def _layer_norm(z):
    mu = jnp.mean(z, axis=-1, keepdims=True)
    zc = z - mu
    var = jnp.mean(zc * zc, axis=-1, keepdims=True)
    return zc * jax.lax.rsqrt(var + 1e-5)


def _fused_mlp_kernel(*refs, problems, n_out):
    """Several independent fused-MLP "problems" in a single kernel invocation.

    refs = inputs..., outputs...   (n_out outputs, one per problem).
    problem = (branch_cfgs, has_residual); output = sum_b MLP_b(...) [+ residual].
    branch  = (n_xs, n_layers, layer_norm, rbf_gamma).  Per-branch input order:
              x_1..x_n, [rbf centers], W1_1..W1_n, b1, (W, b) * (n_layers - 1).
    The first-layer weight is row-split per input, so concat([x1,x2,...]) @ W1 is
    computed as sum_k x_k @ W1_k without materializing the concatenation in HBM.
    """
    out_refs = refs[len(refs) - n_out:]
    in_refs = refs[:len(refs) - n_out]
    i = 0
    for p_idx, (branch_cfgs, has_residual) in enumerate(problems):
        acc = None
        for (n_xs, n_layers, layer_norm, rbf_gamma) in branch_cfgs:
            xs = [in_refs[i + k][...] for k in range(n_xs)]
            i += n_xs
            if rbf_gamma is not None:
                c = in_refs[i][...]
                i += 1
                d = xs[0] - c
                xs = [jnp.exp(-rbf_gamma * d * d)]      # RBF expansion (EUP exp)
            # ---- layer 0: split-weight sum (== concat(xs) @ W1 + b1)
            w1s = [in_refs[i + k] for k in range(len(xs))]
            i += len(xs)
            b1 = in_refs[i]
            i += 1
            z = b1[...]
            for xk, wk in zip(xs, w1s):
                z = z + jnp.dot(xk.astype(_MXU_DTYPE), wk[...],
                                preferred_element_type=jnp.float32)
            # ---- remaining layers: (LayerNorm) -> ReLU -> Linear
            for _ in range(1, n_layers):
                if layer_norm:                           # gamma=1, beta=0 (untrained)
                    z = _layer_norm(z)
                z = jnp.maximum(z, 0.0)
                w_ref = in_refs[i]
                b_ref = in_refs[i + 1]
                i += 2
                z = jnp.dot(z.astype(_MXU_DTYPE), w_ref[...],
                            preferred_element_type=jnp.float32) + b_ref[...]
            acc = z if acc is None else acc + z
        if has_residual:                                 # fused residual add
            acc = acc + in_refs[i][...]
            i += 1
        out_refs[p_idx][...] = acc


# --------------------------------------------------------------------------- wrappers
def _build_branch(br, mp, tm, inputs, in_specs, row_map, const_map):
    """Append one branch's tensors / BlockSpecs (in kernel read order); return its
    static config tuple (n_xs, n_layers, layer_norm, rbf_gamma)."""
    params = list(br["params"])
    w1, b1 = params[0]
    w1 = jnp.asarray(w1, jnp.float32)
    rbf = br.get("rbf")
    gamma = None
    if rbf is not None:
        centers, gamma = rbf
        x = jnp.asarray(br["xs"][0], jnp.float32)
        if x.ndim == 1:
            x = x[:, None]
        inputs.append(_pad_rows_to(x, mp))
        in_specs.append(pl.BlockSpec((tm, x.shape[1]), row_map))
        c = jnp.asarray(centers, jnp.float32).reshape(1, -1)
        inputs.append(c)
        in_specs.append(pl.BlockSpec((1, c.shape[1]), const_map))
        n_xs = 1
        inputs.append(w1.astype(_MXU_DTYPE))             # weights pre-cast to bf16
        in_specs.append(pl.BlockSpec(w1.shape, const_map))
    else:
        xs = [jnp.asarray(x, jnp.float32) for x in br["xs"]]
        xs = [x[:, None] if x.ndim == 1 else x for x in xs]
        n_xs = len(xs)
        widths = [x.shape[1] for x in xs]
        assert sum(widths) == w1.shape[0]
        off = 0
        wchunks = []
        for x, wdt in zip(xs, widths):
            wk = w1[off:off + wdt]
            off += wdt
            kp = _round_up(wdt, 8)
            if kp != wdt:       # tiny K (pos=3, dis=1): zero-pad -> one clean MXU pass
                x = jnp.pad(x, ((0, 0), (0, kp - wdt)))
                wk = jnp.pad(wk, ((0, kp - wdt), (0, 0)))
            inputs.append(_pad_rows_to(x, mp))
            in_specs.append(pl.BlockSpec((tm, x.shape[1]), row_map))
            wchunks.append(wk)
        for wk in wchunks:
            inputs.append(wk.astype(_MXU_DTYPE))         # weights pre-cast to bf16
            in_specs.append(pl.BlockSpec(wk.shape, const_map))
    b1 = jnp.asarray(b1, jnp.float32).reshape(1, -1)
    inputs.append(b1)
    in_specs.append(pl.BlockSpec(b1.shape, const_map))
    for (w, b) in params[1:]:
        w = jnp.asarray(w, jnp.float32).astype(_MXU_DTYPE)
        b = jnp.asarray(b, jnp.float32).reshape(1, -1)
        inputs.append(w)
        in_specs.append(pl.BlockSpec(w.shape, const_map))
        inputs.append(b)
        in_specs.append(pl.BlockSpec(b.shape, const_map))
    return (n_xs, len(params), bool(br.get("layer_norm", False)),
            None if gamma is None else float(gamma))


def fused_mlp_call(problems):
    """ONE pallas_call evaluating several independent fused-MLP problems over a shared
    row-tiled "parallel" grid.  Weights stay VMEM-resident (constant index maps).
    problem = dict(branches=[...], residual=None)
    branch  = dict(xs=[...], params=[(w,b),...], layer_norm=bool, rbf=(centers,gamma))"""
    rows = [int(pr["branches"][0]["xs"][0].shape[0]) for pr in problems]
    mp, tm = _pick_tiles(max(rows))
    row_map = lambda i: (i, 0)
    const_map = lambda i: (0, 0)

    inputs, in_specs, probs_cfg = [], [], []
    out_shapes, out_specs = [], []
    flops = 0
    transc = 0
    for pr in problems:
        cfgs = tuple(_build_branch(br, mp, tm, inputs, in_specs, row_map, const_map)
                     for br in pr["branches"])
        residual = pr.get("residual")
        has_res = residual is not None
        if has_res:
            r = _pad_rows_to(jnp.asarray(residual, jnp.float32), mp)
            inputs.append(r)
            in_specs.append(pl.BlockSpec((tm, r.shape[1]), row_map))
        probs_cfg.append((cfgs, has_res))
        n = pr["branches"][0]["params"][-1][0].shape[1]
        out_shapes.append(jax.ShapeDtypeStruct((mp, n), jnp.float32))
        out_specs.append(pl.BlockSpec((tm, n), row_map))
        for br in pr["branches"]:
            for (w, _) in br["params"]:
                flops += 2 * mp * int(np.prod(np.shape(w)))
            if br.get("rbf") is not None:
                transc += mp * int(np.shape(br["rbf"][0])[0])
    bytes_acc = sum(int(a.size) * int(a.dtype.itemsize) for a in inputs)
    bytes_acc += sum(int(np.prod(s.shape)) * 4 for s in out_shapes)

    kern = functools.partial(_fused_mlp_kernel, problems=tuple(probs_cfg),
                             n_out=len(problems))
    outs = pl.pallas_call(
        kern,
        out_shape=tuple(out_shapes),
        grid=(mp // tm,),
        in_specs=in_specs,
        out_specs=tuple(out_specs),
        compiler_params=pltpu.CompilerParams(
            dimension_semantics=("parallel",),
            vmem_limit_bytes=_VMEM_LIMIT),
        cost_estimate=pl.CostEstimate(flops=int(flops), transcendentals=int(transc),
                                      bytes_accessed=int(bytes_acc)),
    )(*inputs)
    return [o[:m] if o.shape[0] != m else o for o, m in zip(outs, rows)]


def fused_mlp(xs, params, *, layer_norm=True, residual=None):
    """out = MLP(concat(xs)) [+ residual], with the concat done in-kernel via split
    first-layer weights and the residual fused into the output store."""
    outs = fused_mlp_call([dict(branches=[dict(xs=list(xs), params=params,
                                               layer_norm=layer_norm)],
                                residual=residual)])
    return outs[0]


def _lane_pad_last(params, width=128):
    """Zero-pad the last Linear to `width` output lanes so the final store is lane-dense;
    the extra (all-zero) columns are sliced off outside."""
    w, b = params[-1]
    n = w.shape[1]
    if n >= width:
        return list(params)
    wp = jnp.pad(w, ((0, 0), (0, width - n)))
    bp = jnp.pad(b, (0, width - n))
    return list(params[:-1]) + [(wp, bp)]


# --------------------------------------------------------------------------- model glue
def one_hot_cat(feats, vocab_sizes, masked_indices=None):
    f = feats
    if masked_indices is not None:
        for i, v in enumerate(vocab_sizes):
            f = f.at[masked_indices, i].set(v - 1)   # mask token = last vocab entry
    cols = [jax.nn.one_hot(f[:, i], vocab_sizes[i], dtype=jnp.float32)
            for i in range(f.shape[1])]
    return jnp.concatenate(cols, axis=1)


def smooth_l1_loss(pred, target):
    d = jnp.abs(pred - target)
    return jnp.mean(jnp.where(d < 1.0, 0.5 * d * d, d - 0.5))


def egeognn_block(p, AB_edges, BA_edges, AD_edges, atom_attr, bond_attr, angle_attr,
                  dihedral_attr, u, atom_batch, bond_batch, angle_batch, num_graphs):
    # TODO(synk): EGeoGNNBlock source was not provided; this is a MetaLayer-style
    # edge/node/global update matching the block's call signature & data flow.  The
    # encoder-level residual adds (eval-mode dropout == identity) are fused into the
    # update-MLP kernels; message MLPs take the gathered operands as separate inputs
    # with split first-layer weights (no HBM concat).  Data-dependent gathers and
    # segment_sum scatters stay in JAX.
    A, B, T = atom_attr.shape[0], bond_attr.shape[0], angle_attr.shape[0]

    ai, aj = AD_edges[0], AD_edges[1]
    dih_msg = fused_mlp([angle_attr[ai], angle_attr[aj], dihedral_attr], p["dih_msg"])
    angle_agg = jax.ops.segment_sum(dih_msg, aj, num_segments=T)
    angle_new = fused_mlp([angle_attr, angle_agg, u[angle_batch]], p["angle_upd"],
                          residual=angle_attr)

    bi, bj = BA_edges[0], BA_edges[1]
    ang_msg = fused_mlp([bond_attr[bi], bond_attr[bj], angle_new], p["ang_msg"])
    bond_agg = jax.ops.segment_sum(ang_msg, bj, num_segments=B)
    bond_new = fused_mlp([bond_attr, bond_agg, u[bond_batch]], p["bond_upd"],
                         residual=bond_attr)

    xi, xj = AB_edges[0], AB_edges[1]
    bnd_msg = fused_mlp([atom_attr[xi], atom_attr[xj], bond_new], p["bnd_msg"])
    atom_agg = jax.ops.segment_sum(bnd_msg, xj, num_segments=A)
    atom_new = fused_mlp([atom_attr, atom_agg, u[atom_batch]], p["atom_upd"],
                         residual=atom_attr)

    atom_pool = jax.ops.segment_sum(atom_new, atom_batch, num_segments=num_graphs)
    bond_pool = jax.ops.segment_sum(bond_new, bond_batch, num_segments=num_graphs)
    u_new = fused_mlp([u, atom_pool, bond_pool], p["glob_upd"], residual=u)
    return atom_new, bond_new, angle_new, u_new


def encoder_forward(P, AB_edges, BA_edges, AD_edges, pos, x, bond_feats, bond_lengths,
                    bond_angles, dihedral_angles, num_atoms, num_bonds, num_angles,
                    num_graphs, atom_batch, masked_atom_indices=None,
                    masked_bond_indices=None, masked_angle_indices=None,
                    masked_dihedral_indices=None):
    onehot_x = one_hot_cat(x, ATOM_FEATURE_DIMS, masked_atom_indices)
    onehot_bond = one_hot_cat(bond_feats, BOND_FEATURE_DIMS, masked_bond_indices)
    if masked_angle_indices is not None:
        bond_angles = bond_angles.at[masked_angle_indices].set(1e-5)
    if masked_dihedral_indices is not None:
        dihedral_angles = dihedral_angles.at[masked_dihedral_indices].set(1e-5)

    graph_idx = np.arange(num_graphs)
    bond_batch = jnp.asarray(np.repeat(graph_idx, num_bonds), jnp.int32)
    angle_batch = jnp.asarray(np.repeat(graph_idx, num_angles), jnp.int32)

    # All init embeddings in ONE pallas_call with a shared row-tiled grid.  The atom /
    # bond problems fuse the extend_x_edge additions (atom_init(x)+pos_emb(pos),
    # bond_init(b)+dis_emb(len)) as summed branches; angle/dihedral problems fuse the
    # RBF expansion + projection.
    atom_attr, bond_attr, angle_attr, dihedral_attr = fused_mlp_call([
        dict(branches=[dict(xs=[onehot_x], params=P["atom_init"], layer_norm=True),
                       dict(xs=[pos], params=P["pos_emb"], layer_norm=False)]),
        dict(branches=[dict(xs=[onehot_bond], params=P["bond_init"], layer_norm=True),
                       dict(xs=[bond_lengths], params=P["dis_emb"], layer_norm=False)]),
        dict(branches=[dict(xs=[bond_angles], params=[P["angle_emb"]],
                            layer_norm=False, rbf=(P["angle_centers"], 10.0))]),
        dict(branches=[dict(xs=[dihedral_angles], params=[P["dihedral_emb"]],
                            layer_norm=False, rbf=(P["dihedral_centers"], 10.0))]),
    ])
    u = jnp.broadcast_to(P["global_init"], (num_graphs, P["global_init"].shape[1]))

    for layer_p in P["layers"]:
        # residual adds fused into each block's update-MLP kernels (dropout = identity)
        atom_attr, bond_attr, angle_attr, u = egeognn_block(
            layer_p, AB_edges, BA_edges, AD_edges, atom_attr, bond_attr, angle_attr,
            dihedral_attr, u, atom_batch, bond_batch, angle_batch, num_graphs)
    return atom_attr, bond_attr, angle_attr, dihedral_attr, u


def egem_forward(P, AB_edges, BA_edges, AD_edges, pos, x, bond_feats, bond_lengths,
                 bond_angles, dihedral_angles, num_atoms, num_bonds, num_angles,
                 num_graphs, atom_batch, masked_bond_indices, masked_angle_indices,
                 masked_dihedral_indices):
    atom_attr, _, _, _, _ = encoder_forward(
        P["encoder"], AB_edges, BA_edges, AD_edges, pos, x, bond_feats, bond_lengths,
        bond_angles, dihedral_angles, num_atoms, num_bonds, num_angles, num_graphs,
        atom_batch, masked_bond_indices=masked_bond_indices,
        masked_angle_indices=masked_angle_indices,
        masked_dihedral_indices=masked_dihedral_indices)

    # ----- data-dependent index_select gathers for the heads (plain JAX) -----
    mi, mj = AB_edges[:, masked_bond_indices]

    mbi, mbj = BA_edges[:, masked_angle_indices]
    ai, aj = AB_edges[:, mbi]
    _, ak = AB_edges[:, mbj]

    mai, maj = AD_edges[:, masked_dihedral_indices]
    dbi, _ = BA_edges[:, mai]
    _, dbk = BA_edges[:, maj]
    di, dj = AB_edges[:, dbi]
    dk, dl = AB_edges[:, dbk]

    # all three regression heads in ONE pallas_call, concat done in-kernel via split
    # first-layer weights, lane-dense (128-wide zero-padded) output stores.
    pred_blr, pred_bar, pred_dar = fused_mlp_call([
        dict(branches=[dict(xs=[atom_attr[mi], atom_attr[mj]],
                            params=_lane_pad_last(P["Blr_mlp"]), layer_norm=True)]),
        dict(branches=[dict(xs=[atom_attr[ai], atom_attr[aj], atom_attr[ak]],
                            params=_lane_pad_last(P["Bar_mlp"]), layer_norm=True)]),
        dict(branches=[dict(xs=[atom_attr[di], atom_attr[dj],
                                atom_attr[dk], atom_attr[dl]],
                            params=_lane_pad_last(P["Dar_mlp"]), layer_norm=True)]),
    ])

    blr = smooth_l1_loss(pred_blr[:, :1], bond_lengths[masked_bond_indices][:, None])
    bar = smooth_l1_loss(pred_bar[:, :1], bond_angles[masked_angle_indices][:, None])
    dar = smooth_l1_loss(pred_dar[:, :1], dihedral_angles[masked_dihedral_indices][:, None])
    loss = blr + bar + dar
    loss_dict = {"bond_length_loss": blr, "bond_angle_loss": bar,
                 "dihedral_angle_loss": dar, "loss": loss}   # device scalars (jit-safe)
    return loss, loss_dict


# --------------------------------------------------------------------------- parameters
def init_mlp(key, in_size, sizes, scale=0.08):
    params = []
    prev = in_size
    for s in sizes:
        key, k1 = jax.random.split(key)
        w = jax.random.normal(k1, (prev, s), jnp.float32) * scale
        b = jnp.zeros((s,), jnp.float32)
        params.append((w, b))
        prev = s
    return params


def init_params(key, latent=32, hidden=32, n_layers=2, num_mp_steps=2):
    def nxt():
        nonlocal key
        key, k = jax.random.split(key)
        return k

    latent_sizes = [hidden] * n_layers + [latent]

    def block_params():
        return {name: init_mlp(nxt(), 3 * latent, [hidden, latent])
                for name in ("dih_msg", "angle_upd", "ang_msg", "bond_upd",
                             "bnd_msg", "atom_upd", "glob_upd")}

    def rbf_params(centers):
        # pad the center count to a sublane multiple (63 -> 64); padded weight rows are
        # zero, so the extra RBF channels contribute nothing.
        n_c = centers.shape[0]
        n_p = _round_up(n_c, 8)
        w = jax.random.normal(nxt(), (n_c, latent), jnp.float32) * 0.08
        w = jnp.pad(w, ((0, n_p - n_c), (0, 0)))
        b = jnp.zeros((latent,), jnp.float32)
        c = jnp.pad(jnp.asarray(centers, jnp.float32), (0, n_p - n_c))
        return c, (w, b)

    angle_centers, angle_emb = rbf_params(np.arange(0.0, np.pi, 0.1))           # 32
    dihedral_centers, dihedral_emb = rbf_params(np.arange(-np.pi, np.pi, 0.1))  # 63 -> 64

    encoder = {
        "atom_init": init_mlp(nxt(), sum(ATOM_FEATURE_DIMS), latent_sizes),
        "bond_init": init_mlp(nxt(), sum(BOND_FEATURE_DIMS), latent_sizes),
        "global_init": jax.random.normal(nxt(), (1, latent), jnp.float32),
        "pos_emb": init_mlp(nxt(), 3, [latent, latent]),
        "dis_emb": init_mlp(nxt(), 1, [latent, latent]),
        "angle_centers": angle_centers,
        "angle_emb": angle_emb,
        "dihedral_centers": dihedral_centers,
        "dihedral_emb": dihedral_emb,
        "layers": [block_params() for _ in range(num_mp_steps)],
    }
    return {
        "encoder": encoder,
        "Blr_mlp": init_mlp(nxt(), 2 * latent, [hidden] * n_layers + [1]),
        "Bar_mlp": init_mlp(nxt(), 3 * latent, [hidden] * n_layers + [1]),
        "Dar_mlp": init_mlp(nxt(), 4 * latent, [hidden] * n_layers + [1]),
    }


# --------------------------------------------------------------------------- main
if __name__ == "__main__":
    key = jax.random.PRNGKey(0)

    latent, hidden, n_layers, steps = 32, 32, 2, 2
    num_graphs = 2
    num_atoms = (10, 6)     # A = 16
    num_bonds = (12, 8)     # B = 20
    num_angles = (10, 6)    # T = 16
    A, B, T, D = sum(num_atoms), sum(num_bonds), sum(num_angles), 12

    ks = jax.random.split(key, 16)
    params = init_params(ks[0], latent, hidden, n_layers, steps)

    x = jnp.stack([jax.random.randint(ks[1], (A,), 0, ATOM_FEATURE_DIMS[0]),
                   jax.random.randint(ks[2], (A,), 0, ATOM_FEATURE_DIMS[1])], axis=1)
    bond_feats = jnp.stack([jax.random.randint(ks[3], (B,), 0, BOND_FEATURE_DIMS[0]),
                            jax.random.randint(ks[4], (B,), 0, BOND_FEATURE_DIMS[1])],
                           axis=1)
    pos = jax.random.normal(ks[5], (A, 3), jnp.float32)
    bond_lengths = jax.random.uniform(ks[6], (B,), jnp.float32, 1.0, 2.0)
    bond_angles = jax.random.uniform(ks[7], (T,), jnp.float32, 0.0, float(np.pi))
    dihedral_angles = jax.random.uniform(ks[8], (D,), jnp.float32,
                                         -float(np.pi), float(np.pi))

    AB_edges = jax.random.randint(ks[9], (2, B), 0, A)    # atom indices per bond
    BA_edges = jax.random.randint(ks[10], (2, T), 0, B)   # bond indices per angle
    AD_edges = jax.random.randint(ks[11], (2, D), 0, T)   # angle indices per dihedral

    atom_batch = jnp.asarray(np.repeat(np.arange(num_graphs), num_atoms), jnp.int32)
    masked_bond_indices = jnp.asarray([1, 3, 5, 7], jnp.int32)
    masked_angle_indices = jnp.asarray([0, 2, 4], jnp.int32)
    masked_dihedral_indices = jnp.asarray([1, 4, 6], jnp.int32)

    fwd = jax.jit(egem_forward,
                  static_argnames=("num_atoms", "num_bonds", "num_angles", "num_graphs"))
    loss, loss_dict = fwd(
        params, AB_edges, BA_edges, AD_edges, pos, x, bond_feats, bond_lengths,
        bond_angles, dihedral_angles,
        num_atoms=num_atoms, num_bonds=num_bonds, num_angles=num_angles,
        num_graphs=num_graphs, atom_batch=atom_batch,
        masked_bond_indices=masked_bond_indices,
        masked_angle_indices=masked_angle_indices,
        masked_dihedral_indices=masked_dihedral_indices)

    jax.block_until_ready(loss)
    loss_dict = {k: float(v) for k, v in loss_dict.items()}
    assert np.isfinite(loss_dict["loss"]), loss_dict
    print("KERNEL_OK")
</pallas_src>

<mosaic_0001>
module attributes {stable_mosaic.version = 11 : i64} {
  func.func @_fused_mlp_kernel(%arg0: i32, %arg1: memref<24x16xf32, #tpu.memory_space<vmem>>, %arg2: memref<16x32xbf16, #tpu.memory_space<vmem>>, %arg3: memref<1x32xf32, #tpu.memory_space<vmem>>, %arg4: memref<32x32xbf16, #tpu.memory_space<vmem>>, %arg5: memref<1x32xf32, #tpu.memory_space<vmem>>, %arg6: memref<32x32xbf16, #tpu.memory_space<vmem>>, %arg7: memref<1x32xf32, #tpu.memory_space<vmem>>, %arg8: memref<24x8xf32, #tpu.memory_space<vmem>>, %arg9: memref<8x32xbf16, #tpu.memory_space<vmem>>, %arg10: memref<1x32xf32, #tpu.memory_space<vmem>>, %arg11: memref<32x32xbf16, #tpu.memory_space<vmem>>, %arg12: memref<1x32xf32, #tpu.memory_space<vmem>>, %arg13: memref<24x8xf32, #tpu.memory_space<vmem>>, %arg14: memref<8x32xbf16, #tpu.memory_space<vmem>>, %arg15: memref<1x32xf32, #tpu.memory_space<vmem>>, %arg16: memref<32x32xbf16, #tpu.memory_space<vmem>>, %arg17: memref<1x32xf32, #tpu.memory_space<vmem>>, %arg18: memref<32x32xbf16, #tpu.memory_space<vmem>>, %arg19: memref<1x32xf32, #tpu.memory_space<vmem>>, %arg20: memref<24x8xf32, #tpu.memory_space<vmem>>, %arg21: memref<8x32xbf16, #tpu.memory_space<vmem>>, %arg22: memref<1x32xf32, #tpu.memory_space<vmem>>, %arg23: memref<32x32xbf16, #tpu.memory_space<vmem>>, %arg24: memref<1x32xf32, #tpu.memory_space<vmem>>, %arg25: memref<24x1xf32, #tpu.memory_space<vmem>>, %arg26: memref<1x32xf32, #tpu.memory_space<vmem>>, %arg27: memref<32x32xbf16, #tpu.memory_space<vmem>>, %arg28: memref<1x32xf32, #tpu.memory_space<vmem>>, %arg29: memref<24x1xf32, #tpu.memory_space<vmem>>, %arg30: memref<1x64xf32, #tpu.memory_space<vmem>>, %arg31: memref<64x32xbf16, #tpu.memory_space<vmem>>, %arg32: memref<1x32xf32, #tpu.memory_space<vmem>>, %arg33: memref<24x32xf32, #tpu.memory_space<vmem>>, %arg34: memref<24x32xf32, #tpu.memory_space<vmem>>, %arg35: memref<24x32xf32, #tpu.memory_space<vmem>>, %arg36: memref<24x32xf32, #tpu.memory_space<vmem>>) attributes {dimension_semantics = [#tpu.dimension_semantics<parallel>], iteration_bounds = array<i64: 1>, scalar_prefetch = 0 : i64, scratch_operands = 0 : i64, tpu.core_type = #tpu.core_type<tc>, window_params = [{transform_indices = @transform_0, window_bounds = array<i64: 24, 16>}, {pipeline_mode = #tpu.pipeline_mode<synchronous>, transform_indices = @transform_1, window_bounds = array<i64: 16, 32>}, {pipeline_mode = #tpu.pipeline_mode<synchronous>, transform_indices = @transform_2, window_bounds = array<i64: 1, 32>}, {pipeline_mode = #tpu.pipeline_mode<synchronous>, transform_indices = @transform_3, window_bounds = array<i64: 32, 32>}, {pipeline_mode = #tpu.pipeline_mode<synchronous>, transform_indices = @transform_4, window_bounds = array<i64: 1, 32>}, {pipeline_mode = #tpu.pipeline_mode<synchronous>, transform_indices = @transform_5, window_bounds = array<i64: 32, 32>}, {pipeline_mode = #tpu.pipeline_mode<synchronous>, transform_indices = @transform_6, window_bounds = array<i64: 1, 32>}, {transform_indices = @transform_7, window_bounds = array<i64: 24, 8>}, {pipeline_mode = #tpu.pipeline_mode<synchronous>, transform_indices = @transform_8, window_bounds = array<i64: 8, 32>}, {pipeline_mode = #tpu.pipeline_mode<synchronous>, transform_indices = @transform_9, window_bounds = array<i64: 1, 32>}, {pipeline_mode = #tpu.pipeline_mode<synchronous>, transform_indices = @transform_10, window_bounds = array<i64: 32, 32>}, {pipeline_mode = #tpu.pipeline_mode<synchronous>, transform_indices = @transform_11, window_bounds = array<i64: 1, 32>}, {transform_indices = @transform_12, window_bounds = array<i64: 24, 8>}, {pipeline_mode = #tpu.pipeline_mode<synchronous>, transform_indices = @transform_13, window_bounds = array<i64: 8, 32>}, {pipeline_mode = #tpu.pipeline_mode<synchronous>, transform_indices = @transform_14, window_bounds = array<i64: 1, 32>}, {pipeline_mode = #tpu.pipeline_mode<synchronous>, transform_indices = @transform_15, window_bounds = array<i64: 32, 32>}, {pipeline_mode = #tpu.pipeline_mode<synchronous>, transform_indices = @transform_16, window_bounds = array<i64: 1, 32>}, {pipeline_mode = #tpu.pipeline_mode<synchronous>, transform_indices = @transform_17, window_bounds = array<i64: 32, 32>}, {pipeline_mode = #tpu.pipeline_mode<synchronous>, transform_indices = @transform_18, window_bounds = array<i64: 1, 32>}, {transform_indices = @transform_19, window_bounds = array<i64: 24, 8>}, {pipeline_mode = #tpu.pipeline_mode<synchronous>, transform_indices = @transform_20, window_bounds = array<i64: 8, 32>}, {pipeline_mode = #tpu.pipeline_mode<synchronous>, transform_indices = @transform_21, window_bounds = array<i64: 1, 32>}, {pipeline_mode = #tpu.pipeline_mode<synchronous>, transform_indices = @transform_22, window_bounds = array<i64: 32, 32>}, {pipeline_mode = #tpu.pipeline_mode<synchronous>, transform_indices = @transform_23, window_bounds = array<i64: 1, 32>}, {transform_indices = @transform_24, window_bounds = array<i64: 24, 1>}, {pipeline_mode = #tpu.pipeline_mode<synchronous>, transform_indices = @transform_25, window_bounds = array<i64: 1, 32>}, {pipeline_mode = #tpu.pipeline_mode<synchronous>, transform_indices = @transform_26, window_bounds = array<i64: 32, 32>}, {pipeline_mode = #tpu.pipeline_mode<synchronous>, transform_indices = @transform_27, window_bounds = array<i64: 1, 32>}, {transform_indices = @transform_28, window_bounds = array<i64: 24, 1>}, {pipeline_mode = #tpu.pipeline_mode<synchronous>, transform_indices = @transform_29, window_bounds = array<i64: 1, 64>}, {pipeline_mode = #tpu.pipeline_mode<synchronous>, transform_indices = @transform_30, window_bounds = array<i64: 64, 32>}, {pipeline_mode = #tpu.pipeline_mode<synchronous>, transform_indices = @transform_31, window_bounds = array<i64: 1, 32>}, {transform_indices = @transform_32, window_bounds = array<i64: 24, 32>}, {transform_indices = @transform_33, window_bounds = array<i64: 24, 32>}, {transform_indices = @transform_34, window_bounds = array<i64: 24, 32>}, {transform_indices = @transform_35, window_bounds = array<i64: 24, 32>}]} {
    %c0 = arith.constant 0 : index
    %c0_0 = arith.constant 0 : index
    %0 = vector.load %arg1[%c0, %c0_0] : memref<24x16xf32, #tpu.memory_space<vmem>>, vector<24x16xf32>
    %c0_1 = arith.constant 0 : index
    %c0_2 = arith.constant 0 : index
    %1 = vector.load %arg3[%c0_1, %c0_2] : memref<1x32xf32, #tpu.memory_space<vmem>>, vector<1x32xf32>
    %2 = arith.truncf %0 : vector<24x16xf32> to vector<24x16xbf16>
    %c0_3 = arith.constant 0 : index
    %c0_4 = arith.constant 0 : index
    %3 = vector.load %arg2[%c0_3, %c0_4] : memref<16x32xbf16, #tpu.memory_space<vmem>>, vector<16x32xbf16>
    %cst = arith.constant dense<0.000000e+00> : vector<24x32xf32>
    %4 = tpu.matmul %2, %3, %cst {dimension_numbers = #tpu.dot_dimension_numbers<[1], [0], [0], [1], [0, 0, 1, 1], [], []>} : vector<24x16xbf16>, vector<16x32xbf16>, vector<24x32xf32> -> vector<24x32xf32>
    %5 = vector.broadcast %1 : vector<1x32xf32> to vector<24x32xf32>
    %6 = arith.addf %5, %4 : vector<24x32xf32>
    %cst_5 = arith.constant dense<0.000000e+00> : vector<24xf32>
    %7 = vector.multi_reduction <add>, %6, %cst_5 [1] : vector<24x32xf32> to vector<24xf32>
    %8 = vector.shape_cast %7 : vector<24xf32> to vector<24x1xf32>
    %cst_6 = arith.constant 3.200000e+01 : f32
    %9 = vector.broadcast %cst_6 : f32 to vector<24x1xf32>
    %10 = arith.divf %8, %9 : vector<24x1xf32>
    %11 = vector.broadcast %10 : vector<24x1xf32> to vector<24x32xf32>
    %12 = arith.subf %6, %11 : vector<24x32xf32>
    %13 = arith.mulf %12, %12 : vector<24x32xf32>
    %cst_7 = arith.constant dense<0.000000e+00> : vector<24xf32>
    %14 = vector.multi_reduction <add>, %13, %cst_7 [1] : vector<24x32xf32> to vector<24xf32>
    %15 = vector.shape_cast %14 : vector<24xf32> to vector<24x1xf32>
    %cst_8 = arith.constant 3.200000e+01 : f32
    %16 = vector.broadcast %cst_8 : f32 to vector<24x1xf32>
    %17 = arith.divf %15, %16 : vector<24x1xf32>
    %cst_9 = arith.constant 9.99999974E-6 : f32
    %18 = vector.broadcast %cst_9 : f32 to vector<24x1xf32>
    %19 = arith.addf %17, %18 : vector<24x1xf32>
    %20 = math.rsqrt %19 : vector<24x1xf32>
    %21 = vector.broadcast %20 : vector<24x1xf32> to vector<24x32xf32>
    %22 = arith.mulf %12, %21 : vector<24x32xf32>
    %cst_10 = arith.constant 0.000000e+00 : f32
    %23 = vector.broadcast %cst_10 : f32 to vector<24x32xf32>
    %24 = arith.maximumf %22, %23 : vector<24x32xf32>
    %25 = arith.truncf %24 : vector<24x32xf32> to vector<24x32xbf16>
    %c0_11 = arith.constant 0 : index
    %c0_12 = arith.constant 0 : index
    %26 = vector.load %arg4[%c0_11, %c0_12] : memref<32x32xbf16, #tpu.memory_space<vmem>>, vector<32x32xbf16>
    %cst_13 = arith.constant dense<0.000000e+00> : vector<24x32xf32>
    %27 = tpu.matmul %25, %26, %cst_13 {dimension_numbers = #tpu.dot_dimension_numbers<[1], [0], [0], [1], [0, 0, 1, 1], [], []>} : vector<24x32xbf16>, vector<32x32xbf16>, vector<24x32xf32> -> vector<24x32xf32>
    %c0_14 = arith.constant 0 : index
    %c0_15 = arith.constant 0 : index
    %28 = vector.load %arg5[%c0_14, %c0_15] : memref<1x32xf32, #tpu.memory_space<vmem>>, vector<1x32xf32>
    %29 = vector.broadcast %28 : vector<1x32xf32> to vector<24x32xf32>
    %30 = arith.addf %27, %29 : vector<24x32xf32>
    %cst_16 = arith.constant dense<0.000000e+00> : vector<24xf32>
    %31 = vector.multi_reduction <add>, %30, %cst_16 [1] : vector<24x32xf32> to vector<24xf32>
    %32 = vector.shape_cast %31 : vector<24xf32> to vector<24x1xf32>
    %cst_17 = arith.constant 3.200000e+01 : f32
    %33 = vector.broadcast %cst_17 : f32 to vector<24x1xf32>
    %34 = arith.divf %32, %33 : vector<24x1xf32>
    %35 = vector.broadcast %34 : vector<24x1xf32> to vector<24x32xf32>
    %36 = arith.subf %30, %35 : vector<24x32xf32>
    %37 = arith.mulf %36, %36 : vector<24x32xf32>
    %cst_18 = arith.constant dense<0.000000e+00> : vector<24xf32>
    %38 = vector.multi_reduction <add>, %37, %cst_18 [1] : vector<24x32xf32> to vector<24xf32>
    %39 = vector.shape_cast %38 : vector<24xf32> to vector<24x1xf32>
    %cst_19 = arith.constant 3.200000e+01 : f32
    %40 = vector.broadcast %cst_19 : f32 to vector<24x1xf32>
    %41 = arith.divf %39, %40 : vector<24x1xf32>
    %cst_20 = arith.constant 9.99999974E-6 : f32
    %42 = vector.broadcast %cst_20 : f32 to vector<24x1xf32>
    %43 = arith.addf %41, %42 : vector<24x1xf32>
    %44 = math.rsqrt %43 : vector<24x1xf32>
    %45 = vector.broadcast %44 : vector<24x1xf32> to vector<24x32xf32>
    %46 = arith.mulf %36, %45 : vector<24x32xf32>
    %cst_21 = arith.constant 0.000000e+00 : f32
    %47 = vector.broadcast %cst_21 : f32 to vector<24x32xf32>
    %48 = arith.maximumf %46, %47 : vector<24x32xf32>
    %49 = arith.truncf %48 : vector<24x32xf32> to vector<24x32xbf16>
    %c0_22 = arith.constant 0 : index
    %c0_23 = arith.constant 0 : index
    %50 = vector.load %arg6[%c0_22, %c0_23] : memref<32x32xbf16, #tpu.memory_space<vmem>>, vector<32x32xbf16>
    %cst_24 = arith.constant dense<0.000000e+00> : vector<24x32xf32>
    %51 = tpu.matmul %49, %50, %cst_24 {dimension_numbers = #tpu.dot_dimension_numbers<[1], [0], [0], [1], [0, 0, 1, 1], [], []>} : vector<24x32xbf16>, vector<32x32xbf16>, vector<24x32xf32> -> vector<24x32xf32>
    %c0_25 = arith.constant 0 : index
    %c0_26 = arith.constant 0 : index
    %52 = vector.load %arg7[%c0_25, %c0_26] : memref<1x32xf32, #tpu.memory_space<vmem>>, vector<1x32xf32>
    %53 = vector.broadcast %52 : vector<1x32xf32> to vector<24x32xf32>
    %54 = arith.addf %51, %53 : vector<24x32xf32>
    %c0_27 = arith.constant 0 : index
    %c0_28 = arith.constant 0 : index
    %55 = vector.load %arg8[%c0_27, %c0_28] : memref<24x8xf32, #tpu.memory_space<vmem>>, vector<24x8xf32>
    %c0_29 = arith.constant 0 : index
    %c0_30 = arith.constant 0 : index
    %56 = vector.load %arg10[%c0_29, %c0_30] : memref<1x32xf32, #tpu.memory_space<vmem>>, vector<1x32xf32>
    %57 = arith.truncf %55 : vector<24x8xf32> to vector<24x8xbf16>
    %c0_31 = arith.constant 0 : index
    %c0_32 = arith.constant 0 : index
    %58 = vector.load %arg9[%c0_31, %c0_32] : memref<8x32xbf16, #tpu.memory_space<vmem>>, vector<8x32xbf16>
    %cst_33 = arith.constant dense<0.000000e+00> : vector<24x32xf32>
    %59 = tpu.matmul %57, %58, %cst_33 {dimension_numbers = #tpu.dot_dimension_numbers<[1], [0], [0], [1], [0, 0, 1, 1], [], []>} : vector<24x8xbf16>, vector<8x32xbf16>, vector<24x32xf32> -> vector<24x32xf32>
    %60 = vector.broadcast %56 : vector<1x32xf32> to vector<24x32xf32>
    %61 = arith.addf %60, %59 : vector<24x32xf32>
    %cst_34 = arith.constant 0.000000e+00 : f32
    %62 = vector.broadcast %cst_34 : f32 to vector<24x32xf32>
    %63 = arith.maximumf %61, %62 : vector<24x32xf32>
    %64 = arith.truncf %63 : vector<24x32xf32> to vector<24x32xbf16>
    %c0_35 = arith.constant 0 : index
    %c0_36 = arith.constant 0 : index
    %65 = vector.load %arg11[%c0_35, %c0_36] : memref<32x32xbf16, #tpu.memory_space<vmem>>, vector<32x32xbf16>
    %cst_37 = arith.constant dense<0.000000e+00> : vector<24x32xf32>
    %66 = tpu.matmul %64, %65, %cst_37 {dimension_numbers = #tpu.dot_dimension_numbers<[1], [0], [0], [1], [0, 0, 1, 1], [], []>} : vector<24x32xbf16>, vector<32x32xbf16>, vector<24x32xf32> -> vector<24x32xf32>
    %c0_38 = arith.constant 0 : index
    %c0_39 = arith.constant 0 : index
    %67 = vector.load %arg12[%c0_38, %c0_39] : memref<1x32xf32, #tpu.memory_space<vmem>>, vector<1x32xf32>
    %68 = vector.broadcast %67 : vector<1x32xf32> to vector<24x32xf32>
    %69 = arith.addf %66, %68 : vector<24x32xf32>
    %70 = arith.addf %54, %69 : vector<24x32xf32>
    %c0_40 = arith.constant 0 : index
    %c0_41 = arith.constant 0 : index
    %71 = vector.load %arg33[%c0_40, %c0_41] : memref<24x32xf32, #tpu.memory_space<vmem>>, vector<24x32xf32>
    tpu.vector_store %arg33[%c0_40, %c0_41], %70 {strides = array<i32>} : memref<24x32xf32, #tpu.memory_space<vmem>>, vector<24x32xf32>,
    %c0_42 = arith.constant 0 : index
    %c0_43 = arith.constant 0 : index
    %72 = vector.load %arg13[%c0_42, %c0_43] : memref<24x8xf32, #tpu.memory_space<vmem>>, vector<24x8xf32>
    %c0_44 = arith.constant 0 : index
    %c0_45 = arith.constant 0 : index
    %73 = vector.load %arg15[%c0_44, %c0_45] : memref<1x32xf32, #tpu.memory_space<vmem>>, vector<1x32xf32>
    %74 = arith.truncf %72 : vector<24x8xf32> to vector<24x8xbf16>
    %c0_46 = arith.constant 0 : index
    %c0_47 = arith.constant 0 : index
    %75 = vector.load %arg14[%c0_46, %c0_47] : memref<8x32xbf16, #tpu.memory_space<vmem>>, vector<8x32xbf16>
    %cst_48 = arith.constant dense<0.000000e+00> : vector<24x32xf32>
    %76 = tpu.matmul %74, %75, %cst_48 {dimension_numbers = #tpu.dot_dimension_numbers<[1], [0], [0], [1], [0, 0, 1, 1], [], []>} : vector<24x8xbf16>, vector<8x32xbf16>, vector<24x32xf32> -> vector<24x32xf32>
    %77 = vector.broadcast %73 : vector<1x32xf32> to vector<24x32xf32>
    %78 = arith.addf %77, %76 : vector<24x32xf32>
    %cst_49 = arith.constant dense<0.000000e+00> : vector<24xf32>
    %79 = vector.multi_reduction <add>, %78, %cst_49 [1] : vector<24x32xf32> to vector<24xf32>
    %80 = vector.shape_cast %79 : vector<24xf32> to vector<24x1xf32>
    %cst_50 = arith.constant 3.200000e+01 : f32
    %81 = vector.broadcast %cst_50 : f32 to vector<24x1xf32>
    %82 = arith.divf %80, %81 : vector<24x1xf32>
    %83 = vector.broadcast %82 : vector<24x1xf32> to vector<24x32xf32>
    %84 = arith.subf %78, %83 : vector<24x32xf32>
    %85 = arith.mulf %84, %84 : vector<24x32xf32>
    %cst_51 = arith.constant dense<0.000000e+00> : vector<24xf32>
    %86 = vector.multi_reduction <add>, %85, %cst_51 [1] : vector<24x32xf32> to vector<24xf32>
    %87 = vector.shape_cast %86 : vector<24xf32> to vector<24x1xf32>
    %cst_52 = arith.constant 3.200000e+01 : f32
    %88 = vector.broadcast %cst_52 : f32 to vector<24x1xf32>
    %89 = arith.divf %87, %88 : vector<24x1xf32>
    %cst_53 = arith.constant 9.99999974E-6 : f32
    %90 = vector.broadcast %cst_53 : f32 to vector<24x1xf32>
    %91 = arith.addf %89, %90 : vector<24x1xf32>
    %92 = math.rsqrt %91 : vector<24x1xf32>
    %93 = vector.broadcast %92 : vector<24x1xf32> to vector<24x32xf32>
    %94 = arith.mulf %84, %93 : vector<24x32xf32>
    %cst_54 = arith.constant 0.000000e+00 : f32
    %95 = vector.broadcast %cst_54 : f32 to vector<24x32xf32>
    %96 = arith.maximumf %94, %95 : vector<24x32xf32>
    %97 = arith.truncf %96 : vector<24x32xf32> to vector<24x32xbf16>
    %c0_55 = arith.constant 0 : index
    %c0_56 = arith.constant 0 : index
    %98 = vector.load %arg16[%c0_55, %c0_56] : memref<32x32xbf16, #tpu.memory_space<vmem>>, vector<32x32xbf16>
    %cst_57 = arith.constant dense<0.000000e+00> : vector<24x32xf32>
    %99 = tpu.matmul %97, %98, %cst_57 {dimension_numbers = #tpu.dot_dimension_numbers<[1], [0], [0], [1], [0, 0, 1, 1], [], []>} : vector<24x32xbf16>, vector<32x32xbf16>, vector<24x32xf32> -> vector<24x32xf32>
    %c0_58 = arith.constant 0 : index
    %c0_59 = arith.constant 0 : index
    %100 = vector.load %arg17[%c0_58, %c0_59] : memref<1x32xf32, #tpu.memory_space<vmem>>, vector<1x32xf32>
    %101 = vector.broadcast %100 : vector<1x32xf32> to vector<24x32xf32>
    %102 = arith.addf %99, %101 : vector<24x32xf32>
    %cst_60 = arith.constant dense<0.000000e+00> : vector<24xf32>
    %103 = vector.multi_reduction <add>, %102, %cst_60 [1] : vector<24x32xf32> to vector<24xf32>
    %104 = vector.shape_cast %103 : vector<24xf32> to vector<24x1xf32>
    %cst_61 = arith.constant 3.200000e+01 : f32
    %105 = vector.broadcast %cst_61 : f32 to vector<24x1xf32>
    %106 = arith.divf %104, %105 : vector<24x1xf32>
    %107 = vector.broadcast %106 : vector<24x1xf32> to vector<24x32xf32>
    %108 = arith.subf %102, %107 : vector<24x32xf32>
    %109 = arith.mulf %108, %108 : vector<24x32xf32>
    %cst_62 = arith.constant dense<0.000000e+00> : vector<24xf32>
    %110 = vector.multi_reduction <add>, %109, %cst_62 [1] : vector<24x32xf32> to vector<24xf32>
    %111 = vector.shape_cast %110 : vector<24xf32> to vector<24x1xf32>
    %cst_63 = arith.constant 3.200000e+01 : f32
    %112 = vector.broadcast %cst_63 : f32 to vector<24x1xf32>
    %113 = arith.divf %111, %112 : vector<24x1xf32>
    %cst_64 = arith.constant 9.99999974E-6 : f32
    %114 = vector.broadcast %cst_64 : f32 to vector<24x1xf32>
    %115 = arith.addf %113, %114 : vector<24x1xf32>
    %116 = math.rsqrt %115 : vector<24x1xf32>
    %117 = vector.broadcast %116 : vector<24x1xf32> to vector<24x32xf32>
    %118 = arith.mulf %108, %117 : vector<24x32xf32>
    %cst_65 = arith.constant 0.000000e+00 : f32
    %119 = vector.broadcast %cst_65 : f32 to vector<24x32xf32>
    %120 = arith.maximumf %118, %119 : vector<24x32xf32>
    %121 = arith.truncf %120 : vector<24x32xf32> to vector<24x32xbf16>
    %c0_66 = arith.constant 0 : index
    %c0_67 = arith.constant 0 : index
    %122 = vector.load %arg18[%c0_66, %c0_67] : memref<32x32xbf16, #tpu.memory_space<vmem>>, vector<32x32xbf16>
    %cst_68 = arith.constant dense<0.000000e+00> : vector<24x32xf32>
    %123 = tpu.matmul %121, %122, %cst_68 {dimension_numbers = #tpu.dot_dimension_numbers<[1], [0], [0], [1], [0, 0, 1, 1], [], []>} : vector<24x32xbf16>, vector<32x32xbf16>, vector<24x32xf32> -> vector<24x32xf32>
    %c0_69 = arith.constant 0 : index
    %c0_70 = arith.constant 0 : index
    %124 = vector.load %arg19[%c0_69, %c0_70] : memref<1x32xf32, #tpu.memory_space<vmem>>, vector<1x32xf32>
    %125 = vector.broadcast %124 : vector<1x32xf32> to vector<24x32xf32>
    %126 = arith.addf %123, %125 : vector<24x32xf32>
    %c0_71 = arith.constant 0 : index
    %c0_72 = arith.constant 0 : index
    %127 = vector.load %arg20[%c0_71, %c0_72] : memref<24x8xf32, #tpu.memory_space<vmem>>, vector<24x8xf32>
    %c0_73 = arith.constant 0 : index
    %c0_74 = arith.constant 0 : index
    %128 = vector.load %arg22[%c0_73, %c0_74] : memref<1x32xf32, #tpu.memory_space<vmem>>, vector<1x32xf32>
    %129 = arith.truncf %127 : vector<24x8xf32> to vector<24x8xbf16>
    %c0_75 = arith.constant 0 : index
    %c0_76 = arith.constant 0 : index
    %130 = vector.load %arg21[%c0_75, %c0_76] : memref<8x32xbf16, #tpu.memory_space<vmem>>, vector<8x32xbf16>
    %cst_77 = arith.constant dense<0.000000e+00> : vector<24x32xf32>
    %131 = tpu.matmul %129, %130, %cst_77 {dimension_numbers = #tpu.dot_dimension_numbers<[1], [0], [0], [1], [0, 0, 1, 1], [], []>} : vector<24x8xbf16>, vector<8x32xbf16>, vector<24x32xf32> -> vector<24x32xf32>
    %132 = vector.broadcast %128 : vector<1x32xf32> to vector<24x32xf32>
    %133 = arith.addf %132, %131 : vector<24x32xf32>
    %cst_78 = arith.constant 0.000000e+00 : f32
    %134 = vector.broadcast %cst_78 : f32 to vector<24x32xf32>
    %135 = arith.maximumf %133, %134 : vector<24x32xf32>
    %136 = arith.truncf %135 : vector<24x32xf32> to vector<24x32xbf16>
    %c0_79 = arith.constant 0 : index
    %c0_80 = arith.constant 0 : index
    %137 = vector.load %arg23[%c0_79, %c0_80] : memref<32x32xbf16, #tpu.memory_space<vmem>>, vector<32x32xbf16>
    %cst_81 = arith.constant dense<0.000000e+00> : vector<24x32xf32>
    %138 = tpu.matmul %136, %137, %cst_81 {dimension_numbers = #tpu.dot_dimension_numbers<[1], [0], [0], [1], [0, 0, 1, 1], [], []>} : vector<24x32xbf16>, vector<32x32xbf16>, vector<24x32xf32> -> vector<24x32xf32>
    %c0_82 = arith.constant 0 : index
    %c0_83 = arith.constant 0 : index
    %139 = vector.load %arg24[%c0_82, %c0_83] : memref<1x32xf32, #tpu.memory_space<vmem>>, vector<1x32xf32>
    %140 = vector.broadcast %139 : vector<1x32xf32> to vector<24x32xf32>
    %141 = arith.addf %138, %140 : vector<24x32xf32>
    %142 = arith.addf %126, %141 : vector<24x32xf32>
    %c0_84 = arith.constant 0 : index
    %c0_85 = arith.constant 0 : index
    %143 = vector.load %arg34[%c0_84, %c0_85] : memref<24x32xf32, #tpu.memory_space<vmem>>, vector<24x32xf32>
    tpu.vector_store %arg34[%c0_84, %c0_85], %142 {strides = array<i32>} : memref<24x32xf32, #tpu.memory_space<vmem>>, vector<24x32xf32>,
    %c0_86 = arith.constant 0 : index
    %c0_87 = arith.constant 0 : index
    %144 = vector.load %arg25[%c0_86, %c0_87] : memref<24x1xf32, #tpu.memory_space<vmem>>, vector<24x1xf32>
    %c0_88 = arith.constant 0 : index
    %c0_89 = arith.constant 0 : index
    %145 = vector.load %arg26[%c0_88, %c0_89] : memref<1x32xf32, #tpu.memory_space<vmem>>, vector<1x32xf32>
    %146 = vector.broadcast %144 : vector<24x1xf32> to vector<24x32xf32>
    %147 = vector.broadcast %145 : vector<1x32xf32> to vector<24x32xf32>
    %148 = arith.subf %146, %147 : vector<24x32xf32>
    %cst_90 = arith.constant -1.000000e+01 : f32
    %149 = vector.broadcast %cst_90 : f32 to vector<24x32xf32>
    %150 = arith.mulf %149, %148 : vector<24x32xf32>
    %151 = arith.mulf %150, %148 : vector<24x32xf32>
    %152 = math.exp %151 : vector<24x32xf32>
    %c0_91 = arith.constant 0 : index
    %c0_92 = arith.constant 0 : index
    %153 = vector.load %arg28[%c0_91, %c0_92] : memref<1x32xf32, #tpu.memory_space<vmem>>, vector<1x32xf32>
    %154 = arith.truncf %152 : vector<24x32xf32> to vector<24x32xbf16>
    %c0_93 = arith.constant 0 : index
    %c0_94 = arith.constant 0 : index
    %155 = vector.load %arg27[%c0_93, %c0_94] : memref<32x32xbf16, #tpu.memory_space<vmem>>, vector<32x32xbf16>
    %cst_95 = arith.constant dense<0.000000e+00> : vector<24x32xf32>
    %156 = tpu.matmul %154, %155, %cst_95 {dimension_numbers = #tpu.dot_dimension_numbers<[1], [0], [0], [1], [0, 0, 1, 1], [], []>} : vector<24x32xbf16>, vector<32x32xbf16>, vector<24x32xf32> -> vector<24x32xf32>
    %157 = vector.broadcast %153 : vector<1x32xf32> to vector<24x32xf32>
    %158 = arith.addf %157, %156 : vector<24x32xf32>
    %c0_96 = arith.constant 0 : index
    %c0_97 = arith.constant 0 : index
    %159 = vector.load %arg35[%c0_96, %c0_97] : memref<24x32xf32, #tpu.memory_space<vmem>>, vector<24x32xf32>
    tpu.vector_store %arg35[%c0_96, %c0_97], %158 {strides = array<i32>} : memref<24x32xf32, #tpu.memory_space<vmem>>, vector<24x32xf32>,
    %c0_98 = arith.constant 0 : index
    %c0_99 = arith.constant 0 : index
    %160 = vector.load %arg29[%c0_98, %c0_99] : memref<24x1xf32, #tpu.memory_space<vmem>>, vector<24x1xf32>
    %c0_100 = arith.constant 0 : index
    %c0_101 = arith.constant 0 : index
    %161 = vector.load %arg30[%c0_100, %c0_101] : memref<1x64xf32, #tpu.memory_space<vmem>>, vector<1x64xf32>
    %162 = vector.broadcast %160 : vector<24x1xf32> to vector<24x64xf32>
    %163 = vector.broadcast %161 : vector<1x64xf32> to vector<24x64xf32>
    %164 = arith.subf %162, %163 : vector<24x64xf32>
    %cst_102 = arith.constant -1.000000e+01 : f32
    %165 = vector.broadcast %cst_102 : f32 to vector<24x64xf32>
    %166 = arith.mulf %165, %164 : vector<24x64xf32>
    %167 = arith.mulf %166, %164 : vector<24x64xf32>
    %168 = math.exp %167 : vector<24x64xf32>
    %c0_103 = arith.constant 0 : index
    %c0_104 = arith.constant 0 : index
    %169 = vector.load %arg32[%c0_103, %c0_104] : memref<1x32xf32, #tpu.memory_space<vmem>>, vector<1x32xf32>
    %170 = arith.truncf %168 : vector<24x64xf32> to vector<24x64xbf16>
    %c0_105 = arith.constant 0 : index
    %c0_106 = arith.constant 0 : index
    %171 = vector.load %arg31[%c0_105, %c0_106] : memref<64x32xbf16, #tpu.memory_space<vmem>>, vector<64x32xbf16>
    %cst_107 = arith.constant dense<0.000000e+00> : vector<24x32xf32>
    %172 = tpu.matmul %170, %171, %cst_107 {dimension_numbers = #tpu.dot_dimension_numbers<[1], [0], [0], [1], [0, 0, 1, 1], [], []>} : vector<24x64xbf16>, vector<64x32xbf16>, vector<24x32xf32> -> vector<24x32xf32>
    %173 = vector.broadcast %169 : vector<1x32xf32> to vector<24x32xf32>
    %174 = arith.addf %173, %172 : vector<24x32xf32>
    %c0_108 = arith.constant 0 : index
    %c0_109 = arith.constant 0 : index
    %175 = vector.load %arg36[%c0_108, %c0_109] : memref<24x32xf32, #tpu.memory_space<vmem>>, vector<24x32xf32>
    tpu.vector_store %arg36[%c0_108, %c0_109], %174 {strides = array<i32>} : memref<24x32xf32, #tpu.memory_space<vmem>>, vector<24x32xf32>,
    return
  }
  func.func @transform_0(%arg0: i32) -> (i32, i32) {
    %c0_i32 = arith.constant 0 : i32
    %c0_i32_0 = arith.constant 0 : i32
    return %arg0, %c0_i32 : i32, i32
  }
  func.func @transform_1(%arg0: i32) -> (i32, i32) {
    %c0_i32 = arith.constant 0 : i32
    %c0_i32_0 = arith.constant 0 : i32
    %c0_i32_1 = arith.constant 0 : i32
    return %c0_i32, %c0_i32_0 : i32, i32
  }
  func.func @transform_2(%arg0: i32) -> (i32, i32) {
    %c0_i32 = arith.constant 0 : i32
    %c0_i32_0 = arith.constant 0 : i32
    %c0_i32_1 = arith.constant 0 : i32
    return %c0_i32, %c0_i32_0 : i32, i32
  }
  func.func @transform_3(%arg0: i32) -> (i32, i32) {
    %c0_i32 = arith.constant 0 : i32
    %c0_i32_0 = arith.constant 0 : i32
    %c0_i32_1 = arith.constant 0 : i32
    return %c0_i32, %c0_i32_0 : i32, i32
  }
  func.func @transform_4(%arg0: i32) -> (i32, i32) {
    %c0_i32 = arith.constant 0 : i32
    %c0_i32_0 = arith.constant 0 : i32
    %c0_i32_1 = arith.constant 0 : i32
    return %c0_i32, %c0_i32_0 : i32, i32
  }
  func.func @transform_5(%arg0: i32) -> (i32, i32) {
    %c0_i32 = arith.constant 0 : i32
    %c0_i32_0 = arith.constant 0 : i32
    %c0_i32_1 = arith.constant 0 : i32
    return %c0_i32, %c0_i32_0 : i32, i32
  }
  func.func @transform_6(%arg0: i32) -> (i32, i32) {
    %c0_i32 = arith.constant 0 : i32
    %c0_i32_0 = arith.constant 0 : i32
    %c0_i32_1 = arith.constant 0 : i32
    return %c0_i32, %c0_i32_0 : i32, i32
  }
  func.func @transform_7(%arg0: i32) -> (i32, i32) {
    %c0_i32 = arith.constant 0 : i32
    %c0_i32_0 = arith.constant 0 : i32
    return %arg0, %c0_i32 : i32, i32
  }
  func.func @transform_8(%arg0: i32) -> (i32, i32) {
    %c0_i32 = arith.constant 0 : i32
    %c0_i32_0 = arith.constant 0 : i32
    %c0_i32_1 = arith.constant 0 : i32
    return %c0_i32, %c0_i32_0 : i32, i32
  }
  func.func @transform_9(%arg0: i32) -> (i32, i32) {
    %c0_i32 = arith.constant 0 : i32
    %c0_i32_0 = arith.constant 0 : i32
    %c0_i32_1 = arith.constant 0 : i32
    return %c0_i32, %c0_i32_0 : i32, i32
  }
  func.func @transform_10(%arg0: i32) -> (i32, i32) {
    %c0_i32 = arith.constant 0 : i32
    %c0_i32_0 = arith.constant 0 : i32
    %c0_i32_1 = arith.constant 0 : i32
    return %c0_i32, %c0_i32_0 : i32, i32
  }
  func.func @transform_11(%arg0: i32) -> (i32, i32) {
    %c0_i32 = arith.constant 0 : i32
    %c0_i32_0 = arith.constant 0 : i32
    %c0_i32_1 = arith.constant 0 : i32
    return %c0_i32, %c0_i32_0 : i32, i32
  }
  func.func @transform_12(%arg0: i32) -> (i32, i32) {
    %c0_i32 = arith.constant 0 : i32
    %c0_i32_0 = arith.constant 0 : i32
    return %arg0, %c0_i32 : i32, i32
  }
  func.func @transform_13(%arg0: i32) -> (i32, i32) {
    %c0_i32 = arith.constant 0 : i32
    %c0_i32_0 = arith.constant 0 : i32
    %c0_i32_1 = arith.constant 0 : i32
    return %c0_i32, %c0_i32_0 : i32, i32
  }
  func.func @transform_14(%arg0: i32) -> (i32, i32) {
    %c0_i32 = arith.constant 0 : i32
    %c0_i32_0 = arith.constant 0 : i32
    %c0_i32_1 = arith.constant 0 : i32
    return %c0_i32, %c0_i32_0 : i32, i32
  }
  func.func @transform_15(%arg0: i32) -> (i32, i32) {
    %c0_i32 = arith.constant 0 : i32
    %c0_i32_0 = arith.constant 0 : i32
    %c0_i32_1 = arith.constant 0 : i32
    return %c0_i32, %c0_i32_0 : i32, i32
  }
  func.func @transform_16(%arg0: i32) -> (i32, i32) {
    %c0_i32 = arith.constant 0 : i32
    %c0_i32_0 = arith.constant 0 : i32
    %c0_i32_1 = arith.constant 0 : i32
    return %c0_i32, %c0_i32_0 : i32, i32
  }
  func.func @transform_17(%arg0: i32) -> (i32, i32) {
    %c0_i32 = arith.constant 0 : i32
    %c0_i32_0 = arith.constant 0 : i32
    %c0_i32_1 = arith.constant 0 : i32
    return %c0_i32, %c0_i32_0 : i32, i32
  }
  func.func @transform_18(%arg0: i32) -> (i32, i32) {
    %c0_i32 = arith.constant 0 : i32
    %c0_i32_0 = arith.constant 0 : i32
    %c0_i32_1 = arith.constant 0 : i32
    return %c0_i32, %c0_i32_0 : i32, i32
  }
  func.func @transform_19(%arg0: i32) -> (i32, i32) {
    %c0_i32 = arith.constant 0 : i32
    %c0_i32_0 = arith.constant 0 : i32
    return %arg0, %c0_i32 : i32, i32
  }
  func.func @transform_20(%arg0: i32) -> (i32, i32) {
    %c0_i32 = arith.constant 0 : i32
    %c0_i32_0 = arith.constant 0 : i32
    %c0_i32_1 = arith.constant 0 : i32
    return %c0_i32, %c0_i32_0 : i32, i32
  }
  func.func @transform_21(%arg0: i32) -> (i32, i32) {
    %c0_i32 = arith.constant 0 : i32
    %c0_i32_0 = arith.constant 0 : i32
    %c0_i32_1 = arith.constant 0 : i32
    return %c0_i32, %c0_i32_0 : i32, i32
  }
  func.func @transform_22(%arg0: i32) -> (i32, i32) {
    %c0_i32 = arith.constant 0 : i32
    %c0_i32_0 = arith.constant 0 : i32
    %c0_i32_1 = arith.constant 0 : i32
    return %c0_i32, %c0_i32_0 : i32, i32
  }
  func.func @transform_23(%arg0: i32) -> (i32, i32) {
    %c0_i32 = arith.constant 0 : i32
    %c0_i32_0 = arith.constant 0 : i32
    %c0_i32_1 = arith.constant 0 : i32
    return %c0_i32, %c0_i32_0 : i32, i32
  }
  func.func @transform_24(%arg0: i32) -> (i32, i32) {
    %c0_i32 = arith.constant 0 : i32
    %c0_i32_0 = arith.constant 0 : i32
    return %arg0, %c0_i32 : i32, i32
  }
  func.func @transform_25(%arg0: i32) -> (i32, i32) {
    %c0_i32 = arith.constant 0 : i32
    %c0_i32_0 = arith.constant 0 : i32
    %c0_i32_1 = arith.constant 0 : i32
    return %c0_i32, %c0_i32_0 : i32, i32
  }
  func.func @transform_26(%arg0: i32) -> (i32, i32) {
    %c0_i32 = arith.constant 0 : i32
    %c0_i32_0 = arith.constant 0 : i32
    %c0_i32_1 = arith.constant 0 : i32
    return %c0_i32, %c0_i32_0 : i32, i32
  }
  func.func @transform_27(%arg0: i32) -> (i32, i32) {
    %c0_i32 = arith.constant 0 : i32
    %c0_i32_0 = arith.constant 0 : i32
    %c0_i32_1 = arith.constant 0 : i32
    return %c0_i32, %c0_i32_0 : i32, i32
  }
  func.func @transform_28(%arg0: i32) -> (i32, i32) {
    %c0_i32 = arith.constant 0 : i32
    %c0_i32_0 = arith.constant 0 : i32
    return %arg0, %c0_i32 : i32, i32
  }
  func.func @transform_29(%arg0: i32) -> (i32, i32) {
    %c0_i32 = arith.constant 0 : i32
    %c0_i32_0 = arith.constant 0 : i32
    %c0_i32_1 = arith.constant 0 : i32
    return %c0_i32, %c0_i32_0 : i32, i32
  }
  func.func @transform_30(%arg0: i32) -> (i32, i32) {
    %c0_i32 = arith.constant 0 : i32
    %c0_i32_0 = arith.constant 0 : i32
    %c0_i32_1 = arith.constant 0 : i32
    return %c0_i32, %c0_i32_0 : i32, i32
  }
  func.func @transform_31(%arg0: i32) -> (i32, i32) {
    %c0_i32 = arith.constant 0 : i32
    %c0_i32_0 = arith.constant 0 : i32
    %c0_i32_1 = arith.constant 0 : i32
    return %c0_i32, %c0_i32_0 : i32, i32
  }
  func.func @transform_32(%arg0: i32) -> (i32, i32) {
    %c0_i32 = arith.constant 0 : i32
    %c0_i32_0 = arith.constant 0 : i32
    return %arg0, %c0_i32 : i32, i32
  }
  func.func @transform_33(%arg0: i32) -> (i32, i32) {
    %c0_i32 = arith.constant 0 : i32
    %c0_i32_0 = arith.constant 0 : i32
    return %arg0, %c0_i32 : i32, i32
  }
  func.func @transform_34(%arg0: i32) -> (i32, i32) {
    %c0_i32 = arith.constant 0 : i32
    %c0_i32_0 = arith.constant 0 : i32
    return %arg0, %c0_i32 : i32, i32
  }
  func.func @transform_35(%arg0: i32) -> (i32, i32) {
    %c0_i32 = arith.constant 0 : i32
    %c0_i32_0 = arith.constant 0 : i32
    return %arg0, %c0_i32 : i32, i32
  }
}

module attributes {stable_mosaic.version = 11 : i64} {
  func.func @_fused_mlp_kernel(%arg0: i32, %arg1: memref<16x32xf32, #tpu.memory_space<vmem>>, %arg2: memref<16x32xf32, #tpu.memory_space<vmem>>, %arg3: memref<16x32xf32, #tpu.memory_space<vmem>>, %arg4: memref<32x32xbf16, #tpu.memory_space<vmem>>, %arg5: memref<32x32xbf16, #tpu.memory_space<vmem>>, %arg6: memref<32x32xbf16, #tpu.memory_space<vmem>>, %arg7: memref<1x32xf32, #tpu.memory_space<vmem>>, %arg8: memref<32x32xbf16, #tpu.memory_space<vmem>>, %arg9: memref<1x32xf32, #tpu.memory_space<vmem>>, %arg10: memref<16x32xf32, #tpu.memory_space<vmem>>) attributes {dimension_semantics = [#tpu.dimension_semantics<parallel>], iteration_bounds = array<i64: 1>, scalar_prefetch = 0 : i64, scratch_operands = 0 : i64, tpu.core_type = #tpu.core_type<tc>, window_params = [{transform_indices = @transform_0, window_bounds = array<i64: 16, 32>}, {transform_indices = @transform_1, window_bounds = array<i64: 16, 32>}, {transform_indices = @transform_2, window_bounds = array<i64: 16, 32>}, {pipeline_mode = #tpu.pipeline_mode<synchronous>, transform_indices = @transform_3, window_bounds = array<i64: 32, 32>}, {pipeline_mode = #tpu.pipeline_mode<synchronous>, transform_indices = @transform_4, window_bounds = array<i64: 32, 32>}, {pipeline_mode = #tpu.pipeline_mode<synchronous>, transform_indices = @transform_5, window_bounds = array<i64: 32, 32>}, {pipeline_mode = #tpu.pipeline_mode<synchronous>, transform_indices = @transform_6, window_bounds = array<i64: 1, 32>}, {pipeline_mode = #tpu.pipeline_mode<synchronous>, transform_indices = @transform_7, window_bounds = array<i64: 32, 32>}, {pipeline_mode = #tpu.pipeline_mode<synchronous>, transform_indices = @transform_8, window_bounds = array<i64: 1, 32>}, {transform_indices = @transform_9, window_bounds = array<i64: 16, 32>}]} {
    %c0 = arith.constant 0 : index
    %c0_0 = arith.constant 0 : index
    %0 = vector.load %arg1[%c0, %c0_0] : memref<16x32xf32, #tpu.memory_space<vmem>>, vector<16x32xf32>
    %c0_1 = arith.constant 0 : index
    %c0_2 = arith.constant 0 : index
    %1 = vector.load %arg2[%c0_1, %c0_2] : memref<16x32xf32, #tpu.memory_space<vmem>>, vector<16x32xf32>
    %c0_3 = arith.constant 0 : index
    %c0_4 = arith.constant 0 : index
    %2 = vector.load %arg3[%c0_3, %c0_4] : memref<16x32xf32, #tpu.memory_space<vmem>>, vector<16x32xf32>
    %c0_5 = arith.constant 0 : index
    %c0_6 = arith.constant 0 : index
    %3 = vector.load %arg7[%c0_5, %c0_6] : memref<1x32xf32, #tpu.memory_space<vmem>>, vector<1x32xf32>
    %4 = arith.truncf %0 : vector<16x32xf32> to vector<16x32xbf16>
    %c0_7 = arith.constant 0 : index
    %c0_8 = arith.constant 0 : index
    %5 = vector.load %arg4[%c0_7, %c0_8] : memref<32x32xbf16, #tpu.memory_space<vmem>>, vector<32x32xbf16>
    %cst = arith.constant dense<0.000000e+00> : vector<16x32xf32>
    %6 = tpu.matmul %4, %5, %cst {dimension_numbers = #tpu.dot_dimension_numbers<[1], [0], [0], [1], [0, 0, 1, 1], [], []>} : vector<16x32xbf16>, vector<32x32xbf16>, vector<16x32xf32> -> vector<16x32xf32>
    %7 = vector.broadcast %3 : vector<1x32xf32> to vector<16x32xf32>
    %8 = arith.addf %7, %6 : vector<16x32xf32>
    %9 = arith.truncf %1 : vector<16x32xf32> to vector<16x32xbf16>
    %c0_9 = arith.constant 0 : index
    %c0_10 = arith.constant 0 : index
    %10 = vector.load %arg5[%c0_9, %c0_10] : memref<32x32xbf16, #tpu.memory_space<vmem>>, vector<32x32xbf16>
    %cst_11 = arith.constant dense<0.000000e+00> : vector<16x32xf32>
    %11 = tpu.matmul %9, %10, %cst_11 {dimension_numbers = #tpu.dot_dimension_numbers<[1], [0], [0], [1], [0, 0, 1, 1], [], []>} : vector<16x32xbf16>, vector<32x32xbf16>, vector<16x32xf32> -> vector<16x32xf32>
    %12 = arith.addf %8, %11 : vector<16x32xf32>
    %13 = arith.truncf %2 : vector<16x32xf32> to vector<16x32xbf16>
    %c0_12 = arith.constant 0 : index
    %c0_13 = arith.constant 0 : index
    %14 = vector.load %arg6[%c0_12, %c0_13] : memref<32x32xbf16, #tpu.memory_space<vmem>>, vector<32x32xbf16>
    %cst_14 = arith.constant dense<0.000000e+00> : vector<16x32xf32>
    %15 = tpu.matmul %13, %14, %cst_14 {dimension_numbers = #tpu.dot_dimension_numbers<[1], [0], [0], [1], [0, 0, 1, 1], [], []>} : vector<16x32xbf16>, vector<32x32xbf16>, vector<16x32xf32> -> vector<16x32xf32>
    %16 = arith.addf %12, %15 : vector<16x32xf32>
    %cst_15 = arith.constant dense<0.000000e+00> : vector<16xf32>
    %17 = vector.multi_reduction <add>, %16, %cst_15 [1] : vector<16x32xf32> to vector<16xf32>
    %18 = vector.shape_cast %17 : vector<16xf32> to vector<16x1xf32>
    %cst_16 = arith.constant 3.200000e+01 : f32
    %19 = vector.broadcast %cst_16 : f32 to vector<16x1xf32>
    %20 = arith.divf %18, %19 : vector<16x1xf32>
    %21 = vector.broadcast %20 : vector<16x1xf32> to vector<16x32xf32>
    %22 = arith.subf %16, %21 : vector<16x32xf32>
    %23 = arith.mulf %22, %22 : vector<16x32xf32>
    %cst_17 = arith.constant dense<0.000000e+00> : vector<16xf32>
    %24 = vector.multi_reduction <add>, %23, %cst_17 [1] : vector<16x32xf32> to vector<16xf32>
    %25 = vector.shape_cast %24 : vector<16xf32> to vector<16x1xf32>
    %cst_18 = arith.constant 3.200000e+01 : f32
    %26 = vector.broadcast %cst_18 : f32 to vector<16x1xf32>
    %27 = arith.divf %25, %26 : vector<16x1xf32>
    %cst_19 = arith.constant 9.99999974E-6 : f32
    %28 = vector.broadcast %cst_19 : f32 to vector<16x1xf32>
    %29 = arith.addf %27, %28 : vector<16x1xf32>
    %30 = math.rsqrt %29 : vector<16x1xf32>
    %31 = vector.broadcast %30 : vector<16x1xf32> to vector<16x32xf32>
    %32 = arith.mulf %22, %31 : vector<16x32xf32>
    %cst_20 = arith.constant 0.000000e+00 : f32
    %33 = vector.broadcast %cst_20 : f32 to vector<16x32xf32>
    %34 = arith.maximumf %32, %33 : vector<16x32xf32>
    %35 = arith.truncf %34 : vector<16x32xf32> to vector<16x32xbf16>
    %c0_21 = arith.constant 0 : index
    %c0_22 = arith.constant 0 : index
    %36 = vector.load %arg8[%c0_21, %c0_22] : memref<32x32xbf16, #tpu.memory_space<vmem>>, vector<32x32xbf16>
    %cst_23 = arith.constant dense<0.000000e+00> : vector<16x32xf32>
    %37 = tpu.matmul %35, %36, %cst_23 {dimension_numbers = #tpu.dot_dimension_numbers<[1], [0], [0], [1], [0, 0, 1, 1], [], []>} : vector<16x32xbf16>, vector<32x32xbf16>, vector<16x32xf32> -> vector<16x32xf32>
    %c0_24 = arith.constant 0 : index
    %c0_25 = arith.constant 0 : index
    %38 = vector.load %arg9[%c0_24, %c0_25] : memref<1x32xf32, #tpu.memory_space<vmem>>, vector<1x32xf32>
    %39 = vector.broadcast %38 : vector<1x32xf32> to vector<16x32xf32>
    %40 = arith.addf %37, %39 : vector<16x32xf32>
    %c0_26 = arith.constant 0 : index
    %c0_27 = arith.constant 0 : index
    %41 = vector.load %arg10[%c0_26, %c0_27] : memref<16x32xf32, #tpu.memory_space<vmem>>, vector<16x32xf32>
    tpu.vector_store %arg10[%c0_26, %c0_27], %40 {strides = array<i32>} : memref<16x32xf32, #tpu.memory_space<vmem>>, vector<16x32xf32>,
    return
  }
  func.func @transform_0(%arg0: i32) -> (i32, i32) {
    %c0_i32 = arith.constant 0 : i32
    %c0_i32_0 = arith.constant 0 : i32
    return %arg0, %c0_i32 : i32, i32
  }
  func.func @transform_1(%arg0: i32) -> (i32, i32) {
    %c0_i32 = arith.constant 0 : i32
    %c0_i32_0 = arith.constant 0 : i32
    return %arg0, %c0_i32 : i32, i32
  }
  func.func @transform_2(%arg0: i32) -> (i32, i32) {
    %c0_i32 = arith.constant 0 : i32
    %c0_i32_0 = arith.constant 0 : i32
    return %arg0, %c0_i32 : i32, i32
  }
  func.func @transform_3(%arg0: i32) -> (i32, i32) {
    %c0_i32 = arith.constant 0 : i32
    %c0_i32_0 = arith.constant 0 : i32
    %c0_i32_1 = arith.constant 0 : i32
    return %c0_i32, %c0_i32_0 : i32, i32
  }
  func.func @transform_4(%arg0: i32) -> (i32, i32) {
    %c0_i32 = arith.constant 0 : i32
    %c0_i32_0 = arith.constant 0 : i32
    %c0_i32_1 = arith.constant 0 : i32
    return %c0_i32, %c0_i32_0 : i32, i32
  }
  func.func @transform_5(%arg0: i32) -> (i32, i32) {
    %c0_i32 = arith.constant 0 : i32
    %c0_i32_0 = arith.constant 0 : i32
    %c0_i32_1 = arith.constant 0 : i32
    return %c0_i32, %c0_i32_0 : i32, i32
  }
  func.func @transform_6(%arg0: i32) -> (i32, i32) {
    %c0_i32 = arith.constant 0 : i32
    %c0_i32_0 = arith.constant 0 : i32
    %c0_i32_1 = arith.constant 0 : i32
    return %c0_i32, %c0_i32_0 : i32, i32
  }
  func.func @transform_7(%arg0: i32) -> (i32, i32) {
    %c0_i32 = arith.constant 0 : i32
    %c0_i32_0 = arith.constant 0 : i32
    %c0_i32_1 = arith.constant 0 : i32
    return %c0_i32, %c0_i32_0 : i32, i32
  }
  func.func @transform_8(%arg0: i32) -> (i32, i32) {
    %c0_i32 = arith.constant 0 : i32
    %c0_i32_0 = arith.constant 0 : i32
    %c0_i32_1 = arith.constant 0 : i32
    return %c0_i32, %c0_i32_0 : i32, i32
  }
  func.func @transform_9(%arg0: i32) -> (i32, i32) {
    %c0_i32 = arith.constant 0 : i32
    %c0_i32_0 = arith.constant 0 : i32
    return %arg0, %c0_i32 : i32, i32
  }
}

module attributes {stable_mosaic.version = 11 : i64} {
  func.func @_fused_mlp_kernel(%arg0: i32, %arg1: memref<16x32xf32, #tpu.memory_space<vmem>>, %arg2: memref<16x32xf32, #tpu.memory_space<vmem>>, %arg3: memref<16x32xf32, #tpu.memory_space<vmem>>, %arg4: memref<32x32xbf16, #tpu.memory_space<vmem>>, %arg5: memref<32x32xbf16, #tpu.memory_space<vmem>>, %arg6: memref<32x32xbf16, #tpu.memory_space<vmem>>, %arg7: memref<1x32xf32, #tpu.memory_space<vmem>>, %arg8: memref<32x32xbf16, #tpu.memory_space<vmem>>, %arg9: memref<1x32xf32, #tpu.memory_space<vmem>>, %arg10: memref<16x32xf32, #tpu.memory_space<vmem>>, %arg11: memref<16x32xf32, #tpu.memory_space<vmem>>) attributes {dimension_semantics = [#tpu.dimension_semantics<parallel>], iteration_bounds = array<i64: 1>, scalar_prefetch = 0 : i64, scratch_operands = 0 : i64, tpu.core_type = #tpu.core_type<tc>, window_params = [{transform_indices = @transform_0, window_bounds = array<i64: 16, 32>}, {transform_indices = @transform_1, window_bounds = array<i64: 16, 32>}, {transform_indices = @transform_2, window_bounds = array<i64: 16, 32>}, {pipeline_mode = #tpu.pipeline_mode<synchronous>, transform_indices = @transform_3, window_bounds = array<i64: 32, 32>}, {pipeline_mode = #tpu.pipeline_mode<synchronous>, transform_indices = @transform_4, window_bounds = array<i64: 32, 32>}, {pipeline_mode = #tpu.pipeline_mode<synchronous>, transform_indices = @transform_5, window_bounds = array<i64: 32, 32>}, {pipeline_mode = #tpu.pipeline_mode<synchronous>, transform_indices = @transform_6, window_bounds = array<i64: 1, 32>}, {pipeline_mode = #tpu.pipeline_mode<synchronous>, transform_indices = @transform_7, window_bounds = array<i64: 32, 32>}, {pipeline_mode = #tpu.pipeline_mode<synchronous>, transform_indices = @transform_8, window_bounds = array<i64: 1, 32>}, {transform_indices = @transform_9, window_bounds = array<i64: 16, 32>}, {transform_indices = @transform_10, window_bounds = array<i64: 16, 32>}]} {
    %c0 = arith.constant 0 : index
    %c0_0 = arith.constant 0 : index
    %0 = vector.load %arg1[%c0, %c0_0] : memref<16x32xf32, #tpu.memory_space<vmem>>, vector<16x32xf32>
    %c0_1 = arith.constant 0 : index
    %c0_2 = arith.constant 0 : index
    %1 = vector.load %arg2[%c0_1, %c0_2] : memref<16x32xf32, #tpu.memory_space<vmem>>, vector<16x32xf32>
    %c0_3 = arith.constant 0 : index
    %c0_4 = arith.constant 0 : index
    %2 = vector.load %arg3[%c0_3, %c0_4] : memref<16x32xf32, #tpu.memory_space<vmem>>, vector<16x32xf32>
    %c0_5 = arith.constant 0 : index
    %c0_6 = arith.constant 0 : index
    %3 = vector.load %arg7[%c0_5, %c0_6] : memref<1x32xf32, #tpu.memory_space<vmem>>, vector<1x32xf32>
    %4 = arith.truncf %0 : vector<16x32xf32> to vector<16x32xbf16>
    %c0_7 = arith.constant 0 : index
    %c0_8 = arith.constant 0 : index
    %5 = vector.load %arg4[%c0_7, %c0_8] : memref<32x32xbf16, #tpu.memory_space<vmem>>, vector<32x32xbf16>
    %cst = arith.constant dense<0.000000e+00> : vector<16x32xf32>
    %6 = tpu.matmul %4, %5, %cst {dimension_numbers = #tpu.dot_dimension_numbers<[1], [0], [0], [1], [0, 0, 1, 1], [], []>} : vector<16x32xbf16>, vector<32x32xbf16>, vector<16x32xf32> -> vector<16x32xf32>
    %7 = vector.broadcast %3 : vector<1x32xf32> to vector<16x32xf32>
    %8 = arith.addf %7, %6 : vector<16x32xf32>
    %9 = arith.truncf %1 : vector<16x32xf32> to vector<16x32xbf16>
    %c0_9 = arith.constant 0 : index
    %c0_10 = arith.constant 0 : index
    %10 = vector.load %arg5[%c0_9, %c0_10] : memref<32x32xbf16, #tpu.memory_space<vmem>>, vector<32x32xbf16>
    %cst_11 = arith.constant dense<0.000000e+00> : vector<16x32xf32>
    %11 = tpu.matmul %9, %10, %cst_11 {dimension_numbers = #tpu.dot_dimension_numbers<[1], [0], [0], [1], [0, 0, 1, 1], [], []>} : vector<16x32xbf16>, vector<32x32xbf16>, vector<16x32xf32> -> vector<16x32xf32>
    %12 = arith.addf %8, %11 : vector<16x32xf32>
    %13 = arith.truncf %2 : vector<16x32xf32> to vector<16x32xbf16>
    %c0_12 = arith.constant 0 : index
    %c0_13 = arith.constant 0 : index
    %14 = vector.load %arg6[%c0_12, %c0_13] : memref<32x32xbf16, #tpu.memory_space<vmem>>, vector<32x32xbf16>
    %cst_14 = arith.constant dense<0.000000e+00> : vector<16x32xf32>
    %15 = tpu.matmul %13, %14, %cst_14 {dimension_numbers = #tpu.dot_dimension_numbers<[1], [0], [0], [1], [0, 0, 1, 1], [], []>} : vector<16x32xbf16>, vector<32x32xbf16>, vector<16x32xf32> -> vector<16x32xf32>
    %16 = arith.addf %12, %15 : vector<16x32xf32>
    %cst_15 = arith.constant dense<0.000000e+00> : vector<16xf32>
    %17 = vector.multi_reduction <add>, %16, %cst_15 [1] : vector<16x32xf32> to vector<16xf32>
    %18 = vector.shape_cast %17 : vector<16xf32> to vector<16x1xf32>
    %cst_16 = arith.constant 3.200000e+01 : f32
    %19 = vector.broadcast %cst_16 : f32 to vector<16x1xf32>
    %20 = arith.divf %18, %19 : vector<16x1xf32>
    %21 = vector.broadcast %20 : vector<16x1xf32> to vector<16x32xf32>
    %22 = arith.subf %16, %21 : vector<16x32xf32>
    %23 = arith.mulf %22, %22 : vector<16x32xf32>
    %cst_17 = arith.constant dense<0.000000e+00> : vector<16xf32>
    %24 = vector.multi_reduction <add>, %23, %cst_17 [1] : vector<16x32xf32> to vector<16xf32>
    %25 = vector.shape_cast %24 : vector<16xf32> to vector<16x1xf32>
    %cst_18 = arith.constant 3.200000e+01 : f32
    %26 = vector.broadcast %cst_18 : f32 to vector<16x1xf32>
    %27 = arith.divf %25, %26 : vector<16x1xf32>
    %cst_19 = arith.constant 9.99999974E-6 : f32
    %28 = vector.broadcast %cst_19 : f32 to vector<16x1xf32>
    %29 = arith.addf %27, %28 : vector<16x1xf32>
    %30 = math.rsqrt %29 : vector<16x1xf32>
    %31 = vector.broadcast %30 : vector<16x1xf32> to vector<16x32xf32>
    %32 = arith.mulf %22, %31 : vector<16x32xf32>
    %cst_20 = arith.constant 0.000000e+00 : f32
    %33 = vector.broadcast %cst_20 : f32 to vector<16x32xf32>
    %34 = arith.maximumf %32, %33 : vector<16x32xf32>
    %35 = arith.truncf %34 : vector<16x32xf32> to vector<16x32xbf16>
    %c0_21 = arith.constant 0 : index
    %c0_22 = arith.constant 0 : index
    %36 = vector.load %arg8[%c0_21, %c0_22] : memref<32x32xbf16, #tpu.memory_space<vmem>>, vector<32x32xbf16>
    %cst_23 = arith.constant dense<0.000000e+00> : vector<16x32xf32>
    %37 = tpu.matmul %35, %36, %cst_23 {dimension_numbers = #tpu.dot_dimension_numbers<[1], [0], [0], [1], [0, 0, 1, 1], [], []>} : vector<16x32xbf16>, vector<32x32xbf16>, vector<16x32xf32> -> vector<16x32xf32>
    %c0_24 = arith.constant 0 : index
    %c0_25 = arith.constant 0 : index
    %38 = vector.load %arg9[%c0_24, %c0_25] : memref<1x32xf32, #tpu.memory_space<vmem>>, vector<1x32xf32>
    %39 = vector.broadcast %38 : vector<1x32xf32> to vector<16x32xf32>
    %40 = arith.addf %37, %39 : vector<16x32xf32>
    %c0_26 = arith.constant 0 : index
    %c0_27 = arith.constant 0 : index
    %41 = vector.load %arg10[%c0_26, %c0_27] : memref<16x32xf32, #tpu.memory_space<vmem>>, vector<16x32xf32>
    %42 = arith.addf %40, %41 : vector<16x32xf32>
    %c0_28 = arith.constant 0 : index
    %c0_29 = arith.constant 0 : index
    %43 = vector.load %arg11[%c0_28, %c0_29] : memref<16x32xf32, #tpu.memory_space<vmem>>, vector<16x32xf32>
    tpu.vector_store %arg11[%c0_28, %c0_29], %42 {strides = array<i32>} : memref<16x32xf32, #tpu.memory_space<vmem>>, vector<16x32xf32>,
    return
  }
  func.func @transform_0(%arg0: i32) -> (i32, i32) {
    %c0_i32 = arith.constant 0 : i32
    %c0_i32_0 = arith.constant 0 : i32
    return %arg0, %c0_i32 : i32, i32
  }
  func.func @transform_1(%arg0: i32) -> (i32, i32) {
    %c0_i32 = arith.constant 0 : i32
    %c0_i32_0 = arith.constant 0 : i32
    return %arg0, %c0_i32 : i32, i32
  }
  func.func @transform_2(%arg0: i32) -> (i32, i32) {
    %c0_i32 = arith.constant 0 : i32
    %c0_i32_0 = arith.constant 0 : i32
    return %arg0, %c0_i32 : i32, i32
  }
  func.func @transform_3(%arg0: i32) -> (i32, i32) {
    %c0_i32 = arith.constant 0 : i32
    %c0_i32_0 = arith.constant 0 : i32
    %c0_i32_1 = arith.constant 0 : i32
    return %c0_i32, %c0_i32_0 : i32, i32
  }
  func.func @transform_4(%arg0: i32) -> (i32, i32) {
    %c0_i32 = arith.constant 0 : i32
    %c0_i32_0 = arith.constant 0 : i32
    %c0_i32_1 = arith.constant 0 : i32
    return %c0_i32, %c0_i32_0 : i32, i32
  }
  func.func @transform_5(%arg0: i32) -> (i32, i32) {
    %c0_i32 = arith.constant 0 : i32
    %c0_i32_0 = arith.constant 0 : i32
    %c0_i32_1 = arith.constant 0 : i32
    return %c0_i32, %c0_i32_0 : i32, i32
  }
  func.func @transform_6(%arg0: i32) -> (i32, i32) {
    %c0_i32 = arith.constant 0 : i32
    %c0_i32_0 = arith.constant 0 : i32
    %c0_i32_1 = arith.constant 0 : i32
    return %c0_i32, %c0_i32_0 : i32, i32
  }
  func.func @transform_7(%arg0: i32) -> (i32, i32) {
    %c0_i32 = arith.constant 0 : i32
    %c0_i32_0 = arith.constant 0 : i32
    %c0_i32_1 = arith.constant 0 : i32
    return %c0_i32, %c0_i32_0 : i32, i32
  }
  func.func @transform_8(%arg0: i32) -> (i32, i32) {
    %c0_i32 = arith.constant 0 : i32
    %c0_i32_0 = arith.constant 0 : i32
    %c0_i32_1 = arith.constant 0 : i32
    return %c0_i32, %c0_i32_0 : i32, i32
  }
  func.func @transform_9(%arg0: i32) -> (i32, i32) {
    %c0_i32 = arith.constant 0 : i32
    %c0_i32_0 = arith.constant 0 : i32
    return %arg0, %c0_i32 : i32, i32
  }
  func.func @transform_10(%arg0: i32) -> (i32, i32) {
    %c0_i32 = arith.constant 0 : i32
    %c0_i32_0 = arith.constant 0 : i32
    return %arg0, %c0_i32 : i32, i32
  }
}

module attributes {stable_mosaic.version = 11 : i64} {
  func.func @_fused_mlp_kernel(%arg0: i32, %arg1: memref<24x32xf32, #tpu.memory_space<vmem>>, %arg2: memref<24x32xf32, #tpu.memory_space<vmem>>, %arg3: memref<24x32xf32, #tpu.memory_space<vmem>>, %arg4: memref<32x32xbf16, #tpu.memory_space<vmem>>, %arg5: memref<32x32xbf16, #tpu.memory_space<vmem>>, %arg6: memref<32x32xbf16, #tpu.memory_space<vmem>>, %arg7: memref<1x32xf32, #tpu.memory_space<vmem>>, %arg8: memref<32x32xbf16, #tpu.memory_space<vmem>>, %arg9: memref<1x32xf32, #tpu.memory_space<vmem>>, %arg10: memref<24x32xf32, #tpu.memory_space<vmem>>, %arg11: memref<24x32xf32, #tpu.memory_space<vmem>>) attributes {dimension_semantics = [#tpu.dimension_semantics<parallel>], iteration_bounds = array<i64: 1>, scalar_prefetch = 0 : i64, scratch_operands = 0 : i64, tpu.core_type = #tpu.core_type<tc>, window_params = [{transform_indices = @transform_0, window_bounds = array<i64: 24, 32>}, {transform_indices = @transform_1, window_bounds = array<i64: 24, 32>}, {transform_indices = @transform_2, window_bounds = array<i64: 24, 32>}, {pipeline_mode = #tpu.pipeline_mode<synchronous>, transform_indices = @transform_3, window_bounds = array<i64: 32, 32>}, {pipeline_mode = #tpu.pipeline_mode<synchronous>, transform_indices = @transform_4, window_bounds = array<i64: 32, 32>}, {pipeline_mode = #tpu.pipeline_mode<synchronous>, transform_indices = @transform_5, window_bounds = array<i64: 32, 32>}, {pipeline_mode = #tpu.pipeline_mode<synchronous>, transform_indices = @transform_6, window_bounds = array<i64: 1, 32>}, {pipeline_mode = #tpu.pipeline_mode<synchronous>, transform_indices = @transform_7, window_bounds = array<i64: 32, 32>}, {pipeline_mode = #tpu.pipeline_mode<synchronous>, transform_indices = @transform_8, window_bounds = array<i64: 1, 32>}, {transform_indices = @transform_9, window_bounds = array<i64: 24, 32>}, {transform_indices = @transform_10, window_bounds = array<i64: 24, 32>}]} {
    %c0 = arith.constant 0 : index
    %c0_0 = arith.constant 0 : index
    %0 = vector.load %arg1[%c0, %c0_0] : memref<24x32xf32, #tpu.memory_space<vmem>>, vector<24x32xf32>
    %c0_1 = arith.constant 0 : index
    %c0_2 = arith.constant 0 : index
    %1 = vector.load %arg2[%c0_1, %c0_2] : memref<24x32xf32, #tpu.memory_space<vmem>>, vector<24x32xf32>
    %c0_3 = arith.constant 0 : index
    %c0_4 = arith.constant 0 : index
    %2 = vector.load %arg3[%c0_3, %c0_4] : memref<24x32xf32, #tpu.memory_space<vmem>>, vector<24x32xf32>
    %c0_5 = arith.constant 0 : index
    %c0_6 = arith.constant 0 : index
    %3 = vector.load %arg7[%c0_5, %c0_6] : memref<1x32xf32, #tpu.memory_space<vmem>>, vector<1x32xf32>
    %4 = arith.truncf %0 : vector<24x32xf32> to vector<24x32xbf16>
    %c0_7 = arith.constant 0 : index
    %c0_8 = arith.constant 0 : index
    %5 = vector.load %arg4[%c0_7, %c0_8] : memref<32x32xbf16, #tpu.memory_space<vmem>>, vector<32x32xbf16>
    %cst = arith.constant dense<0.000000e+00> : vector<24x32xf32>
    %6 = tpu.matmul %4, %5, %cst {dimension_numbers = #tpu.dot_dimension_numbers<[1], [0], [0], [1], [0, 0, 1, 1], [], []>} : vector<24x32xbf16>, vector<32x32xbf16>, vector<24x32xf32> -> vector<24x32xf32>
    %7 = vector.broadcast %3 : vector<1x32xf32> to vector<24x32xf32>
    %8 = arith.addf %7, %6 : vector<24x32xf32>
    %9 = arith.truncf %1 : vector<24x32xf32> to vector<24x32xbf16>
    %c0_9 = arith.constant 0 : index
    %c0_10 = arith.constant 0 : index
    %10 = vector.load %arg5[%c0_9, %c0_10] : memref<32x32xbf16, #tpu.memory_space<vmem>>, vector<32x32xbf16>
    %cst_11 = arith.constant dense<0.000000e+00> : vector<24x32xf32>
    %11 = tpu.matmul %9, %10, %cst_11 {dimension_numbers = #tpu.dot_dimension_numbers<[1], [0], [0], [1], [0, 0, 1, 1], [], []>} : vector<24x32xbf16>, vector<32x32xbf16>, vector<24x32xf32> -> vector<24x32xf32>
    %12 = arith.addf %8, %11 : vector<24x32xf32>
    %13 = arith.truncf %2 : vector<24x32xf32> to vector<24x32xbf16>
    %c0_12 = arith.constant 0 : index
    %c0_13 = arith.constant 0 : index
    %14 = vector.load %arg6[%c0_12, %c0_13] : memref<32x32xbf16, #tpu.memory_space<vmem>>, vector<32x32xbf16>
    %cst_14 = arith.constant dense<0.000000e+00> : vector<24x32xf32>
    %15 = tpu.matmul %13, %14, %cst_14 {dimension_numbers = #tpu.dot_dimension_numbers<[1], [0], [0], [1], [0, 0, 1, 1], [], []>} : vector<24x32xbf16>, vector<32x32xbf16>, vector<24x32xf32> -> vector<24x32xf32>
    %16 = arith.addf %12, %15 : vector<24x32xf32>
    %cst_15 = arith.constant dense<0.000000e+00> : vector<24xf32>
    %17 = vector.multi_reduction <add>, %16, %cst_15 [1] : vector<24x32xf32> to vector<24xf32>
    %18 = vector.shape_cast %17 : vector<24xf32> to vector<24x1xf32>
    %cst_16 = arith.constant 3.200000e+01 : f32
    %19 = vector.broadcast %cst_16 : f32 to vector<24x1xf32>
    %20 = arith.divf %18, %19 : vector<24x1xf32>
    %21 = vector.broadcast %20 : vector<24x1xf32> to vector<24x32xf32>
    %22 = arith.subf %16, %21 : vector<24x32xf32>
    %23 = arith.mulf %22, %22 : vector<24x32xf32>
    %cst_17 = arith.constant dense<0.000000e+00> : vector<24xf32>
    %24 = vector.multi_reduction <add>, %23, %cst_17 [1] : vector<24x32xf32> to vector<24xf32>
    %25 = vector.shape_cast %24 : vector<24xf32> to vector<24x1xf32>
    %cst_18 = arith.constant 3.200000e+01 : f32
    %26 = vector.broadcast %cst_18 : f32 to vector<24x1xf32>
    %27 = arith.divf %25, %26 : vector<24x1xf32>
    %cst_19 = arith.constant 9.99999974E-6 : f32
    %28 = vector.broadcast %cst_19 : f32 to vector<24x1xf32>
    %29 = arith.addf %27, %28 : vector<24x1xf32>
    %30 = math.rsqrt %29 : vector<24x1xf32>
    %31 = vector.broadcast %30 : vector<24x1xf32> to vector<24x32xf32>
    %32 = arith.mulf %22, %31 : vector<24x32xf32>
    %cst_20 = arith.constant 0.000000e+00 : f32
    %33 = vector.broadcast %cst_20 : f32 to vector<24x32xf32>
    %34 = arith.maximumf %32, %33 : vector<24x32xf32>
    %35 = arith.truncf %34 : vector<24x32xf32> to vector<24x32xbf16>
    %c0_21 = arith.constant 0 : index
    %c0_22 = arith.constant 0 : index
    %36 = vector.load %arg8[%c0_21, %c0_22] : memref<32x32xbf16, #tpu.memory_space<vmem>>, vector<32x32xbf16>
    %cst_23 = arith.constant dense<0.000000e+00> : vector<24x32xf32>
    %37 = tpu.matmul %35, %36, %cst_23 {dimension_numbers = #tpu.dot_dimension_numbers<[1], [0], [0], [1], [0, 0, 1, 1], [], []>} : vector<24x32xbf16>, vector<32x32xbf16>, vector<24x32xf32> -> vector<24x32xf32>
    %c0_24 = arith.constant 0 : index
    %c0_25 = arith.constant 0 : index
    %38 = vector.load %arg9[%c0_24, %c0_25] : memref<1x32xf32, #tpu.memory_space<vmem>>, vector<1x32xf32>
    %39 = vector.broadcast %38 : vector<1x32xf32> to vector<24x32xf32>
    %40 = arith.addf %37, %39 : vector<24x32xf32>
    %c0_26 = arith.constant 0 : index
    %c0_27 = arith.constant 0 : index
    %41 = vector.load %arg10[%c0_26, %c0_27] : memref<24x32xf32, #tpu.memory_space<vmem>>, vector<24x32xf32>
    %42 = arith.addf %40, %41 : vector<24x32xf32>
    %c0_28 = arith.constant 0 : index
    %c0_29 = arith.constant 0 : index
    %43 = vector.load %arg11[%c0_28, %c0_29] : memref<24x32xf32, #tpu.memory_space<vmem>>, vector<24x32xf32>
    tpu.vector_store %arg11[%c0_28, %c0_29], %42 {strides = array<i32>} : memref<24x32xf32, #tpu.memory_space<vmem>>, vector<24x32xf32>,
    return
  }
  func.func @transform_0(%arg0: i32) -> (i32, i32) {
    %c0_i32 = arith.constant 0 : i32
    %c0_i32_0 = arith.constant 0 : i32
    return %arg0, %c0_i32 : i32, i32
  }
  func.func @transform_1(%arg0: i32) -> (i32, i32) {
    %c0_i32 = arith.constant 0 : i32
    %c0_i32_0 = arith.constant 0 : i32
    return %arg0, %c0_i32 : i32, i32
  }
  func.func @transform_2(%arg0: i32) -> (i32, i32) {
    %c0_i32 = arith.constant 0 : i32
    %c0_i32_0 = arith.constant 0 : i32
    return %arg0, %c0_i32 : i32, i32
  }
  func.func @transform_3(%arg0: i32) -> (i32, i32) {
    %c0_i32 = arith.constant 0 : i32
    %c0_i32_0 = arith.constant 0 : i32
    %c0_i32_1 = arith.constant 0 : i32
    return %c0_i32, %c0_i32_0 : i32, i32
  }
  func.func @transform_4(%arg0: i32) -> (i32, i32) {
    %c0_i32 = arith.constant 0 : i32
    %c0_i32_0 = arith.constant 0 : i32
    %c0_i32_1 = arith.constant 0 : i32
    return %c0_i32, %c0_i32_0 : i32, i32
  }
  func.func @transform_5(%arg0: i32) -> (i32, i32) {
    %c0_i32 = arith.constant 0 : i32
    %c0_i32_0 = arith.constant 0 : i32
    %c0_i32_1 = arith.constant 0 : i32
    return %c0_i32, %c0_i32_0 : i32, i32
  }
  func.func @transform_6(%arg0: i32) -> (i32, i32) {
    %c0_i32 = arith.constant 0 : i32
    %c0_i32_0 = arith.constant 0 : i32
    %c0_i32_1 = arith.constant 0 : i32
    return %c0_i32, %c0_i32_0 : i32, i32
  }
  func.func @transform_7(%arg0: i32) -> (i32, i32) {
    %c0_i32 = arith.constant 0 : i32
    %c0_i32_0 = arith.constant 0 : i32
    %c0_i32_1 = arith.constant 0 : i32
    return %c0_i32, %c0_i32_0 : i32, i32
  }
  func.func @transform_8(%arg0: i32) -> (i32, i32) {
    %c0_i32 = arith.constant 0 : i32
    %c0_i32_0 = arith.constant 0 : i32
    %c0_i32_1 = arith.constant 0 : i32
    return %c0_i32, %c0_i32_0 : i32, i32
  }
  func.func @transform_9(%arg0: i32) -> (i32, i32) {
    %c0_i32 = arith.constant 0 : i32
    %c0_i32_0 = arith.constant 0 : i32
    return %arg0, %c0_i32 : i32, i32
  }
  func.func @transform_10(%arg0: i32) -> (i32, i32) {
    %c0_i32 = arith.constant 0 : i32
    %c0_i32_0 = arith.constant 0 : i32
    return %arg0, %c0_i32 : i32, i32
  }
}

module attributes {stable_mosaic.version = 11 : i64} {
  func.func @_fused_mlp_kernel(%arg0: i32, %arg1: memref<24x32xf32, #tpu.memory_space<vmem>>, %arg2: memref<24x32xf32, #tpu.memory_space<vmem>>, %arg3: memref<24x32xf32, #tpu.memory_space<vmem>>, %arg4: memref<32x32xbf16, #tpu.memory_space<vmem>>, %arg5: memref<32x32xbf16, #tpu.memory_space<vmem>>, %arg6: memref<32x32xbf16, #tpu.memory_space<vmem>>, %arg7: memref<1x32xf32, #tpu.memory_space<vmem>>, %arg8: memref<32x32xbf16, #tpu.memory_space<vmem>>, %arg9: memref<1x32xf32, #tpu.memory_space<vmem>>, %arg10: memref<24x32xf32, #tpu.memory_space<vmem>>) attributes {dimension_semantics = [#tpu.dimension_semantics<parallel>], iteration_bounds = array<i64: 1>, scalar_prefetch = 0 : i64, scratch_operands = 0 : i64, tpu.core_type = #tpu.core_type<tc>, window_params = [{transform_indices = @transform_0, window_bounds = array<i64: 24, 32>}, {transform_indices = @transform_1, window_bounds = array<i64: 24, 32>}, {transform_indices = @transform_2, window_bounds = array<i64: 24, 32>}, {pipeline_mode = #tpu.pipeline_mode<synchronous>, transform_indices = @transform_3, window_bounds = array<i64: 32, 32>}, {pipeline_mode = #tpu.pipeline_mode<synchronous>, transform_indices = @transform_4, window_bounds = array<i64: 32, 32>}, {pipeline_mode = #tpu.pipeline_mode<synchronous>, transform_indices = @transform_5, window_bounds = array<i64: 32, 32>}, {pipeline_mode = #tpu.pipeline_mode<synchronous>, transform_indices = @transform_6, window_bounds = array<i64: 1, 32>}, {pipeline_mode = #tpu.pipeline_mode<synchronous>, transform_indices = @transform_7, window_bounds = array<i64: 32, 32>}, {pipeline_mode = #tpu.pipeline_mode<synchronous>, transform_indices = @transform_8, window_bounds = array<i64: 1, 32>}, {transform_indices = @transform_9, window_bounds = array<i64: 24, 32>}]} {
    %c0 = arith.constant 0 : index
    %c0_0 = arith.constant 0 : index
    %0 = vector.load %arg1[%c0, %c0_0] : memref<24x32xf32, #tpu.memory_space<vmem>>, vector<24x32xf32>
    %c0_1 = arith.constant 0 : index
    %c0_2 = arith.constant 0 : index
    %1 = vector.load %arg2[%c0_1, %c0_2] : memref<24x32xf32, #tpu.memory_space<vmem>>, vector<24x32xf32>
    %c0_3 = arith.constant 0 : index
    %c0_4 = arith.constant 0 : index
    %2 = vector.load %arg3[%c0_3, %c0_4] : memref<24x32xf32, #tpu.memory_space<vmem>>, vector<24x32xf32>
    %c0_5 = arith.constant 0 : index
    %c0_6 = arith.constant 0 : index
    %3 = vector.load %arg7[%c0_5, %c0_6] : memref<1x32xf32, #tpu.memory_space<vmem>>, vector<1x32xf32>
    %4 = arith.truncf %0 : vector<24x32xf32> to vector<24x32xbf16>
    %c0_7 = arith.constant 0 : index
    %c0_8 = arith.constant 0 : index
    %5 = vector.load %arg4[%c0_7, %c0_8] : memref<32x32xbf16, #tpu.memory_space<vmem>>, vector<32x32xbf16>
    %cst = arith.constant dense<0.000000e+00> : vector<24x32xf32>
    %6 = tpu.matmul %4, %5, %cst {dimension_numbers = #tpu.dot_dimension_numbers<[1], [0], [0], [1], [0, 0, 1, 1], [], []>} : vector<24x32xbf16>, vector<32x32xbf16>, vector<24x32xf32> -> vector<24x32xf32>
    %7 = vector.broadcast %3 : vector<1x32xf32> to vector<24x32xf32>
    %8 = arith.addf %7, %6 : vector<24x32xf32>
    %9 = arith.truncf %1 : vector<24x32xf32> to vector<24x32xbf16>
    %c0_9 = arith.constant 0 : index
    %c0_10 = arith.constant 0 : index
    %10 = vector.load %arg5[%c0_9, %c0_10] : memref<32x32xbf16, #tpu.memory_space<vmem>>, vector<32x32xbf16>
    %cst_11 = arith.constant dense<0.000000e+00> : vector<24x32xf32>
    %11 = tpu.matmul %9, %10, %cst_11 {dimension_numbers = #tpu.dot_dimension_numbers<[1], [0], [0], [1], [0, 0, 1, 1], [], []>} : vector<24x32xbf16>, vector<32x32xbf16>, vector<24x32xf32> -> vector<24x32xf32>
    %12 = arith.addf %8, %11 : vector<24x32xf32>
    %13 = arith.truncf %2 : vector<24x32xf32> to vector<24x32xbf16>
    %c0_12 = arith.constant 0 : index
    %c0_13 = arith.constant 0 : index
    %14 = vector.load %arg6[%c0_12, %c0_13] : memref<32x32xbf16, #tpu.memory_space<vmem>>, vector<32x32xbf16>
    %cst_14 = arith.constant dense<0.000000e+00> : vector<24x32xf32>
    %15 = tpu.matmul %13, %14, %cst_14 {dimension_numbers = #tpu.dot_dimension_numbers<[1], [0], [0], [1], [0, 0, 1, 1], [], []>} : vector<24x32xbf16>, vector<32x32xbf16>, vector<24x32xf32> -> vector<24x32xf32>
    %16 = arith.addf %12, %15 : vector<24x32xf32>
    %cst_15 = arith.constant dense<0.000000e+00> : vector<24xf32>
    %17 = vector.multi_reduction <add>, %16, %cst_15 [1] : vector<24x32xf32> to vector<24xf32>
    %18 = vector.shape_cast %17 : vector<24xf32> to vector<24x1xf32>
    %cst_16 = arith.constant 3.200000e+01 : f32
    %19 = vector.broadcast %cst_16 : f32 to vector<24x1xf32>
    %20 = arith.divf %18, %19 : vector<24x1xf32>
    %21 = vector.broadcast %20 : vector<24x1xf32> to vector<24x32xf32>
    %22 = arith.subf %16, %21 : vector<24x32xf32>
    %23 = arith.mulf %22, %22 : vector<24x32xf32>
    %cst_17 = arith.constant dense<0.000000e+00> : vector<24xf32>
    %24 = vector.multi_reduction <add>, %23, %cst_17 [1] : vector<24x32xf32> to vector<24xf32>
    %25 = vector.shape_cast %24 : vector<24xf32> to vector<24x1xf32>
    %cst_18 = arith.constant 3.200000e+01 : f32
    %26 = vector.broadcast %cst_18 : f32 to vector<24x1xf32>
    %27 = arith.divf %25, %26 : vector<24x1xf32>
    %cst_19 = arith.constant 9.99999974E-6 : f32
    %28 = vector.broadcast %cst_19 : f32 to vector<24x1xf32>
    %29 = arith.addf %27, %28 : vector<24x1xf32>
    %30 = math.rsqrt %29 : vector<24x1xf32>
    %31 = vector.broadcast %30 : vector<24x1xf32> to vector<24x32xf32>
    %32 = arith.mulf %22, %31 : vector<24x32xf32>
    %cst_20 = arith.constant 0.000000e+00 : f32
    %33 = vector.broadcast %cst_20 : f32 to vector<24x32xf32>
    %34 = arith.maximumf %32, %33 : vector<24x32xf32>
    %35 = arith.truncf %34 : vector<24x32xf32> to vector<24x32xbf16>
    %c0_21 = arith.constant 0 : index
    %c0_22 = arith.constant 0 : index
    %36 = vector.load %arg8[%c0_21, %c0_22] : memref<32x32xbf16, #tpu.memory_space<vmem>>, vector<32x32xbf16>
    %cst_23 = arith.constant dense<0.000000e+00> : vector<24x32xf32>
    %37 = tpu.matmul %35, %36, %cst_23 {dimension_numbers = #tpu.dot_dimension_numbers<[1], [0], [0], [1], [0, 0, 1, 1], [], []>} : vector<24x32xbf16>, vector<32x32xbf16>, vector<24x32xf32> -> vector<24x32xf32>
    %c0_24 = arith.constant 0 : index
    %c0_25 = arith.constant 0 : index
    %38 = vector.load %arg9[%c0_24, %c0_25] : memref<1x32xf32, #tpu.memory_space<vmem>>, vector<1x32xf32>
    %39 = vector.broadcast %38 : vector<1x32xf32> to vector<24x32xf32>
    %40 = arith.addf %37, %39 : vector<24x32xf32>
    %c0_26 = arith.constant 0 : index
    %c0_27 = arith.constant 0 : index
    %41 = vector.load %arg10[%c0_26, %c0_27] : memref<24x32xf32, #tpu.memory_space<vmem>>, vector<24x32xf32>
    tpu.vector_store %arg10[%c0_26, %c0_27], %40 {strides = array<i32>} : memref<24x32xf32, #tpu.memory_space<vmem>>, vector<24x32xf32>,
    return
  }
  func.func @transform_0(%arg0: i32) -> (i32, i32) {
    %c0_i32 = arith.constant 0 : i32
    %c0_i32_0 = arith.constant 0 : i32
    return %arg0, %c0_i32 : i32, i32
  }
  func.func @transform_1(%arg0: i32) -> (i32, i32) {
    %c0_i32 = arith.constant 0 : i32
    %c0_i32_0 = arith.constant 0 : i32
    return %arg0, %c0_i32 : i32, i32
  }
  func.func @transform_2(%arg0: i32) -> (i32, i32) {
    %c0_i32 = arith.constant 0 : i32
    %c0_i32_0 = arith.constant 0 : i32
    return %arg0, %c0_i32 : i32, i32
  }
  func.func @transform_3(%arg0: i32) -> (i32, i32) {
    %c0_i32 = arith.constant 0 : i32
    %c0_i32_0 = arith.constant 0 : i32
    %c0_i32_1 = arith.constant 0 : i32
    return %c0_i32, %c0_i32_0 : i32, i32
  }
  func.func @transform_4(%arg0: i32) -> (i32, i32) {
    %c0_i32 = arith.constant 0 : i32
    %c0_i32_0 = arith.constant 0 : i32
    %c0_i32_1 = arith.constant 0 : i32
    return %c0_i32, %c0_i32_0 : i32, i32
  }
  func.func @transform_5(%arg0: i32) -> (i32, i32) {
    %c0_i32 = arith.constant 0 : i32
    %c0_i32_0 = arith.constant 0 : i32
    %c0_i32_1 = arith.constant 0 : i32
    return %c0_i32, %c0_i32_0 : i32, i32
  }
  func.func @transform_6(%arg0: i32) -> (i32, i32) {
    %c0_i32 = arith.constant 0 : i32
    %c0_i32_0 = arith.constant 0 : i32
    %c0_i32_1 = arith.constant 0 : i32
    return %c0_i32, %c0_i32_0 : i32, i32
  }
  func.func @transform_7(%arg0: i32) -> (i32, i32) {
    %c0_i32 = arith.constant 0 : i32
    %c0_i32_0 = arith.constant 0 : i32
    %c0_i32_1 = arith.constant 0 : i32
    return %c0_i32, %c0_i32_0 : i32, i32
  }
  func.func @transform_8(%arg0: i32) -> (i32, i32) {
    %c0_i32 = arith.constant 0 : i32
    %c0_i32_0 = arith.constant 0 : i32
    %c0_i32_1 = arith.constant 0 : i32
    return %c0_i32, %c0_i32_0 : i32, i32
  }
  func.func @transform_9(%arg0: i32) -> (i32, i32) {
    %c0_i32 = arith.constant 0 : i32
    %c0_i32_0 = arith.constant 0 : i32
    return %arg0, %c0_i32 : i32, i32
  }
}

module attributes {stable_mosaic.version = 11 : i64} {
  func.func @_fused_mlp_kernel(%arg0: i32, %arg1: memref<8x32xf32, #tpu.memory_space<vmem>>, %arg2: memref<8x32xf32, #tpu.memory_space<vmem>>, %arg3: memref<8x32xf32, #tpu.memory_space<vmem>>, %arg4: memref<32x32xbf16, #tpu.memory_space<vmem>>, %arg5: memref<32x32xbf16, #tpu.memory_space<vmem>>, %arg6: memref<32x32xbf16, #tpu.memory_space<vmem>>, %arg7: memref<1x32xf32, #tpu.memory_space<vmem>>, %arg8: memref<32x32xbf16, #tpu.memory_space<vmem>>, %arg9: memref<1x32xf32, #tpu.memory_space<vmem>>, %arg10: memref<8x32xf32, #tpu.memory_space<vmem>>, %arg11: memref<8x32xf32, #tpu.memory_space<vmem>>) attributes {dimension_semantics = [#tpu.dimension_semantics<parallel>], iteration_bounds = array<i64: 1>, scalar_prefetch = 0 : i64, scratch_operands = 0 : i64, tpu.core_type = #tpu.core_type<tc>, window_params = [{transform_indices = @transform_0, window_bounds = array<i64: 8, 32>}, {transform_indices = @transform_1, window_bounds = array<i64: 8, 32>}, {transform_indices = @transform_2, window_bounds = array<i64: 8, 32>}, {pipeline_mode = #tpu.pipeline_mode<synchronous>, transform_indices = @transform_3, window_bounds = array<i64: 32, 32>}, {pipeline_mode = #tpu.pipeline_mode<synchronous>, transform_indices = @transform_4, window_bounds = array<i64: 32, 32>}, {pipeline_mode = #tpu.pipeline_mode<synchronous>, transform_indices = @transform_5, window_bounds = array<i64: 32, 32>}, {pipeline_mode = #tpu.pipeline_mode<synchronous>, transform_indices = @transform_6, window_bounds = array<i64: 1, 32>}, {pipeline_mode = #tpu.pipeline_mode<synchronous>, transform_indices = @transform_7, window_bounds = array<i64: 32, 32>}, {pipeline_mode = #tpu.pipeline_mode<synchronous>, transform_indices = @transform_8, window_bounds = array<i64: 1, 32>}, {transform_indices = @transform_9, window_bounds = array<i64: 8, 32>}, {transform_indices = @transform_10, window_bounds = array<i64: 8, 32>}]} {
    %c0 = arith.constant 0 : index
    %c0_0 = arith.constant 0 : index
    %0 = vector.load %arg1[%c0, %c0_0] : memref<8x32xf32, #tpu.memory_space<vmem>>, vector<8x32xf32>
    %c0_1 = arith.constant 0 : index
    %c0_2 = arith.constant 0 : index
    %1 = vector.load %arg2[%c0_1, %c0_2] : memref<8x32xf32, #tpu.memory_space<vmem>>, vector<8x32xf32>
    %c0_3 = arith.constant 0 : index
    %c0_4 = arith.constant 0 : index
    %2 = vector.load %arg3[%c0_3, %c0_4] : memref<8x32xf32, #tpu.memory_space<vmem>>, vector<8x32xf32>
    %c0_5 = arith.constant 0 : index
    %c0_6 = arith.constant 0 : index
    %3 = vector.load %arg7[%c0_5, %c0_6] : memref<1x32xf32, #tpu.memory_space<vmem>>, vector<1x32xf32>
    %4 = arith.truncf %0 : vector<8x32xf32> to vector<8x32xbf16>
    %c0_7 = arith.constant 0 : index
    %c0_8 = arith.constant 0 : index
    %5 = vector.load %arg4[%c0_7, %c0_8] : memref<32x32xbf16, #tpu.memory_space<vmem>>, vector<32x32xbf16>
    %cst = arith.constant dense<0.000000e+00> : vector<8x32xf32>
    %6 = tpu.matmul %4, %5, %cst {dimension_numbers = #tpu.dot_dimension_numbers<[1], [0], [0], [1], [0, 0, 1, 1], [], []>} : vector<8x32xbf16>, vector<32x32xbf16>, vector<8x32xf32> -> vector<8x32xf32>
    %7 = vector.broadcast %3 : vector<1x32xf32> to vector<8x32xf32>
    %8 = arith.addf %7, %6 : vector<8x32xf32>
    %9 = arith.truncf %1 : vector<8x32xf32> to vector<8x32xbf16>
    %c0_9 = arith.constant 0 : index
    %c0_10 = arith.constant 0 : index
    %10 = vector.load %arg5[%c0_9, %c0_10] : memref<32x32xbf16, #tpu.memory_space<vmem>>, vector<32x32xbf16>
    %cst_11 = arith.constant dense<0.000000e+00> : vector<8x32xf32>
    %11 = tpu.matmul %9, %10, %cst_11 {dimension_numbers = #tpu.dot_dimension_numbers<[1], [0], [0], [1], [0, 0, 1, 1], [], []>} : vector<8x32xbf16>, vector<32x32xbf16>, vector<8x32xf32> -> vector<8x32xf32>
    %12 = arith.addf %8, %11 : vector<8x32xf32>
    %13 = arith.truncf %2 : vector<8x32xf32> to vector<8x32xbf16>
    %c0_12 = arith.constant 0 : index
    %c0_13 = arith.constant 0 : index
    %14 = vector.load %arg6[%c0_12, %c0_13] : memref<32x32xbf16, #tpu.memory_space<vmem>>, vector<32x32xbf16>
    %cst_14 = arith.constant dense<0.000000e+00> : vector<8x32xf32>
    %15 = tpu.matmul %13, %14, %cst_14 {dimension_numbers = #tpu.dot_dimension_numbers<[1], [0], [0], [1], [0, 0, 1, 1], [], []>} : vector<8x32xbf16>, vector<32x32xbf16>, vector<8x32xf32> -> vector<8x32xf32>
    %16 = arith.addf %12, %15 : vector<8x32xf32>
    %cst_15 = arith.constant dense<0.000000e+00> : vector<8xf32>
    %17 = vector.multi_reduction <add>, %16, %cst_15 [1] : vector<8x32xf32> to vector<8xf32>
    %18 = vector.shape_cast %17 : vector<8xf32> to vector<8x1xf32>
    %cst_16 = arith.constant 3.200000e+01 : f32
    %19 = vector.broadcast %cst_16 : f32 to vector<8x1xf32>
    %20 = arith.divf %18, %19 : vector<8x1xf32>
    %21 = vector.broadcast %20 : vector<8x1xf32> to vector<8x32xf32>
    %22 = arith.subf %16, %21 : vector<8x32xf32>
    %23 = arith.mulf %22, %22 : vector<8x32xf32>
    %cst_17 = arith.constant dense<0.000000e+00> : vector<8xf32>
    %24 = vector.multi_reduction <add>, %23, %cst_17 [1] : vector<8x32xf32> to vector<8xf32>
    %25 = vector.shape_cast %24 : vector<8xf32> to vector<8x1xf32>
    %cst_18 = arith.constant 3.200000e+01 : f32
    %26 = vector.broadcast %cst_18 : f32 to vector<8x1xf32>
    %27 = arith.divf %25, %26 : vector<8x1xf32>
    %cst_19 = arith.constant 9.99999974E-6 : f32
    %28 = vector.broadcast %cst_19 : f32 to vector<8x1xf32>
    %29 = arith.addf %27, %28 : vector<8x1xf32>
    %30 = math.rsqrt %29 : vector<8x1xf32>
    %31 = vector.broadcast %30 : vector<8x1xf32> to vector<8x32xf32>
    %32 = arith.mulf %22, %31 : vector<8x32xf32>
    %cst_20 = arith.constant 0.000000e+00 : f32
    %33 = vector.broadcast %cst_20 : f32 to vector<8x32xf32>
    %34 = arith.maximumf %32, %33 : vector<8x32xf32>
    %35 = arith.truncf %34 : vector<8x32xf32> to vector<8x32xbf16>
    %c0_21 = arith.constant 0 : index
    %c0_22 = arith.constant 0 : index
    %36 = vector.load %arg8[%c0_21, %c0_22] : memref<32x32xbf16, #tpu.memory_space<vmem>>, vector<32x32xbf16>
    %cst_23 = arith.constant dense<0.000000e+00> : vector<8x32xf32>
    %37 = tpu.matmul %35, %36, %cst_23 {dimension_numbers = #tpu.dot_dimension_numbers<[1], [0], [0], [1], [0, 0, 1, 1], [], []>} : vector<8x32xbf16>, vector<32x32xbf16>, vector<8x32xf32> -> vector<8x32xf32>
    %c0_24 = arith.constant 0 : index
    %c0_25 = arith.constant 0 : index
    %38 = vector.load %arg9[%c0_24, %c0_25] : memref<1x32xf32, #tpu.memory_space<vmem>>, vector<1x32xf32>
    %39 = vector.broadcast %38 : vector<1x32xf32> to vector<8x32xf32>
    %40 = arith.addf %37, %39 : vector<8x32xf32>
    %c0_26 = arith.constant 0 : index
    %c0_27 = arith.constant 0 : index
    %41 = vector.load %arg10[%c0_26, %c0_27] : memref<8x32xf32, #tpu.memory_space<vmem>>, vector<8x32xf32>
    %42 = arith.addf %40, %41 : vector<8x32xf32>
    %c0_28 = arith.constant 0 : index
    %c0_29 = arith.constant 0 : index
    %43 = vector.load %arg11[%c0_28, %c0_29] : memref<8x32xf32, #tpu.memory_space<vmem>>, vector<8x32xf32>
    tpu.vector_store %arg11[%c0_28, %c0_29], %42 {strides = array<i32>} : memref<8x32xf32, #tpu.memory_space<vmem>>, vector<8x32xf32>,
    return
  }
  func.func @transform_0(%arg0: i32) -> (i32, i32) {
    %c0_i32 = arith.constant 0 : i32
    %c0_i32_0 = arith.constant 0 : i32
    return %arg0, %c0_i32 : i32, i32
  }
  func.func @transform_1(%arg0: i32) -> (i32, i32) {
    %c0_i32 = arith.constant 0 : i32
    %c0_i32_0 = arith.constant 0 : i32
    return %arg0, %c0_i32 : i32, i32
  }
  func.func @transform_2(%arg0: i32) -> (i32, i32) {
    %c0_i32 = arith.constant 0 : i32
    %c0_i32_0 = arith.constant 0 : i32
    return %arg0, %c0_i32 : i32, i32
  }
  func.func @transform_3(%arg0: i32) -> (i32, i32) {
    %c0_i32 = arith.constant 0 : i32
    %c0_i32_0 = arith.constant 0 : i32
    %c0_i32_1 = arith.constant 0 : i32
    return %c0_i32, %c0_i32_0 : i32, i32
  }
  func.func @transform_4(%arg0: i32) -> (i32, i32) {
    %c0_i32 = arith.constant 0 : i32
    %c0_i32_0 = arith.constant 0 : i32
    %c0_i32_1 = arith.constant 0 : i32
    return %c0_i32, %c0_i32_0 : i32, i32
  }
  func.func @transform_5(%arg0: i32) -> (i32, i32) {
    %c0_i32 = arith.constant 0 : i32
    %c0_i32_0 = arith.constant 0 : i32
    %c0_i32_1 = arith.constant 0 : i32
    return %c0_i32, %c0_i32_0 : i32, i32
  }
  func.func @transform_6(%arg0: i32) -> (i32, i32) {
    %c0_i32 = arith.constant 0 : i32
    %c0_i32_0 = arith.constant 0 : i32
    %c0_i32_1 = arith.constant 0 : i32
    return %c0_i32, %c0_i32_0 : i32, i32
  }
  func.func @transform_7(%arg0: i32) -> (i32, i32) {
    %c0_i32 = arith.constant 0 : i32
    %c0_i32_0 = arith.constant 0 : i32
    %c0_i32_1 = arith.constant 0 : i32
    return %c0_i32, %c0_i32_0 : i32, i32
  }
  func.func @transform_8(%arg0: i32) -> (i32, i32) {
    %c0_i32 = arith.constant 0 : i32
    %c0_i32_0 = arith.constant 0 : i32
    %c0_i32_1 = arith.constant 0 : i32
    return %c0_i32, %c0_i32_0 : i32, i32
  }
  func.func @transform_9(%arg0: i32) -> (i32, i32) {
    %c0_i32 = arith.constant 0 : i32
    %c0_i32_0 = arith.constant 0 : i32
    return %arg0, %c0_i32 : i32, i32
  }
  func.func @transform_10(%arg0: i32) -> (i32, i32) {
    %c0_i32 = arith.constant 0 : i32
    %c0_i32_0 = arith.constant 0 : i32
    return %arg0, %c0_i32 : i32, i32
  }
}

module attributes {stable_mosaic.version = 11 : i64} {
  func.func @_fused_mlp_kernel(%arg0: i32, %arg1: memref<8x32xf32, #tpu.memory_space<vmem>>, %arg2: memref<8x32xf32, #tpu.memory_space<vmem>>, %arg3: memref<32x32xbf16, #tpu.memory_space<vmem>>, %arg4: memref<32x32xbf16, #tpu.memory_space<vmem>>, %arg5: memref<1x32xf32, #tpu.memory_space<vmem>>, %arg6: memref<32x32xbf16, #tpu.memory_space<vmem>>, %arg7: memref<1x32xf32, #tpu.memory_space<vmem>>, %arg8: memref<32x128xbf16, #tpu.memory_space<vmem>>, %arg9: memref<1x128xf32, #tpu.memory_space<vmem>>, %arg10: memref<8x32xf32, #tpu.memory_space<vmem>>, %arg11: memref<8x32xf32, #tpu.memory_space<vmem>>, %arg12: memref<8x32xf32, #tpu.memory_space<vmem>>, %arg13: memref<32x32xbf16, #tpu.memory_space<vmem>>, %arg14: memref<32x32xbf16, #tpu.memory_space<vmem>>, %arg15: memref<32x32xbf16, #tpu.memory_space<vmem>>, %arg16: memref<1x32xf32, #tpu.memory_space<vmem>>, %arg17: memref<32x32xbf16, #tpu.memory_space<vmem>>, %arg18: memref<1x32xf32, #tpu.memory_space<vmem>>, %arg19: memref<32x128xbf16, #tpu.memory_space<vmem>>, %arg20: memref<1x128xf32, #tpu.memory_space<vmem>>, %arg21: memref<8x32xf32, #tpu.memory_space<vmem>>, %arg22: memref<8x32xf32, #tpu.memory_space<vmem>>, %arg23: memref<8x32xf32, #tpu.memory_space<vmem>>, %arg24: memref<8x32xf32, #tpu.memory_space<vmem>>, %arg25: memref<32x32xbf16, #tpu.memory_space<vmem>>, %arg26: memref<32x32xbf16, #tpu.memory_space<vmem>>, %arg27: memref<32x32xbf16, #tpu.memory_space<vmem>>, %arg28: memref<32x32xbf16, #tpu.memory_space<vmem>>, %arg29: memref<1x32xf32, #tpu.memory_space<vmem>>, %arg30: memref<32x32xbf16, #tpu.memory_space<vmem>>, %arg31: memref<1x32xf32, #tpu.memory_space<vmem>>, %arg32: memref<32x128xbf16, #tpu.memory_space<vmem>>, %arg33: memref<1x128xf32, #tpu.memory_space<vmem>>, %arg34: memref<8x128xf32, #tpu.memory_space<vmem>>, %arg35: memref<8x128xf32, #tpu.memory_space<vmem>>, %arg36: memref<8x128xf32, #tpu.memory_space<vmem>>) attributes {dimension_semantics = [#tpu.dimension_semantics<parallel>], iteration_bounds = array<i64: 1>, scalar_prefetch = 0 : i64, scratch_operands = 0 : i64, tpu.core_type = #tpu.core_type<tc>, window_params = [{transform_indices = @transform_0, window_bounds = array<i64: 8, 32>}, {transform_indices = @transform_1, window_bounds = array<i64: 8, 32>}, {pipeline_mode = #tpu.pipeline_mode<synchronous>, transform_indices = @transform_2, window_bounds = array<i64: 32, 32>}, {pipeline_mode = #tpu.pipeline_mode<synchronous>, transform_indices = @transform_3, window_bounds = array<i64: 32, 32>}, {pipeline_mode = #tpu.pipeline_mode<synchronous>, transform_indices = @transform_4, window_bounds = array<i64: 1, 32>}, {pipeline_mode = #tpu.pipeline_mode<synchronous>, transform_indices = @transform_5, window_bounds = array<i64: 32, 32>}, {pipeline_mode = #tpu.pipeline_mode<synchronous>, transform_indices = @transform_6, window_bounds = array<i64: 1, 32>}, {pipeline_mode = #tpu.pipeline_mode<synchronous>, transform_indices = @transform_7, window_bounds = array<i64: 32, 128>}, {pipeline_mode = #tpu.pipeline_mode<synchronous>, transform_indices = @transform_8, window_bounds = array<i64: 1, 128>}, {transform_indices = @transform_9, window_bounds = array<i64: 8, 32>}, {transform_indices = @transform_10, window_bounds = array<i64: 8, 32>}, {transform_indices = @transform_11, window_bounds = array<i64: 8, 32>}, {pipeline_mode = #tpu.pipeline_mode<synchronous>, transform_indices = @transform_12, window_bounds = array<i64: 32, 32>}, {pipeline_mode = #tpu.pipeline_mode<synchronous>, transform_indices = @transform_13, window_bounds = array<i64: 32, 32>}, {pipeline_mode = #tpu.pipeline_mode<synchronous>, transform_indices = @transform_14, window_bounds = array<i64: 32, 32>}, {pipeline_mode = #tpu.pipeline_mode<synchronous>, transform_indices = @transform_15, window_bounds = array<i64: 1, 32>}, {pipeline_mode = #tpu.pipeline_mode<synchronous>, transform_indices = @transform_16, window_bounds = array<i64: 32, 32>}, {pipeline_mode = #tpu.pipeline_mode<synchronous>, transform_indices = @transform_17, window_bounds = array<i64: 1, 32>}, {pipeline_mode = #tpu.pipeline_mode<synchronous>, transform_indices = @transform_18, window_bounds = array<i64: 32, 128>}, {pipeline_mode = #tpu.pipeline_mode<synchronous>, transform_indices = @transform_19, window_bounds = array<i64: 1, 128>}, {transform_indices = @transform_20, window_bounds = array<i64: 8, 32>}, {transform_indices = @transform_21, window_bounds = array<i64: 8, 32>}, {transform_indices = @transform_22, window_bounds = array<i64: 8, 32>}, {transform_indices = @transform_23, window_bounds = array<i64: 8, 32>}, {pipeline_mode = #tpu.pipeline_mode<synchronous>, transform_indices = @transform_24, window_bounds = array<i64: 32, 32>}, {pipeline_mode = #tpu.pipeline_mode<synchronous>, transform_indices = @transform_25, window_bounds = array<i64: 32, 32>}, {pipeline_mode = #tpu.pipeline_mode<synchronous>, transform_indices = @transform_26, window_bounds = array<i64: 32, 32>}, {pipeline_mode = #tpu.pipeline_mode<synchronous>, transform_indices = @transform_27, window_bounds = array<i64: 32, 32>}, {pipeline_mode = #tpu.pipeline_mode<synchronous>, transform_indices = @transform_28, window_bounds = array<i64: 1, 32>}, {pipeline_mode = #tpu.pipeline_mode<synchronous>, transform_indices = @transform_29, window_bounds = array<i64: 32, 32>}, {pipeline_mode = #tpu.pipeline_mode<synchronous>, transform_indices = @transform_30, window_bounds = array<i64: 1, 32>}, {pipeline_mode = #tpu.pipeline_mode<synchronous>, transform_indices = @transform_31, window_bounds = array<i64: 32, 128>}, {pipeline_mode = #tpu.pipeline_mode<synchronous>, transform_indices = @transform_32, window_bounds = array<i64: 1, 128>}, {transform_indices = @transform_33, window_bounds = array<i64: 8, 128>}, {transform_indices = @transform_34, window_bounds = array<i64: 8, 128>}, {transform_indices = @transform_35, window_bounds = array<i64: 8, 128>}]} {
    %c0 = arith.constant 0 : index
    %c0_0 = arith.constant 0 : index
    %0 = vector.load %arg1[%c0, %c0_0] : memref<8x32xf32, #tpu.memory_space<vmem>>, vector<8x32xf32>
    %c0_1 = arith.constant 0 : index
    %c0_2 = arith.constant 0 : index
    %1 = vector.load %arg2[%c0_1, %c0_2] : memref<8x32xf32, #tpu.memory_space<vmem>>, vector<8x32xf32>
    %c0_3 = arith.constant 0 : index
    %c0_4 = arith.constant 0 : index
    %2 = vector.load %arg5[%c0_3, %c0_4] : memref<1x32xf32, #tpu.memory_space<vmem>>, vector<1x32xf32>
    %3 = arith.truncf %0 : vector<8x32xf32> to vector<8x32xbf16>
    %c0_5 = arith.constant 0 : index
    %c0_6 = arith.constant 0 : index
    %4 = vector.load %arg3[%c0_5, %c0_6] : memref<32x32xbf16, #tpu.memory_space<vmem>>, vector<32x32xbf16>
    %cst = arith.constant dense<0.000000e+00> : vector<8x32xf32>
    %5 = tpu.matmul %3, %4, %cst {dimension_numbers = #tpu.dot_dimension_numbers<[1], [0], [0], [1], [0, 0, 1, 1], [], []>} : vector<8x32xbf16>, vector<32x32xbf16>, vector<8x32xf32> -> vector<8x32xf32>
    %6 = vector.broadcast %2 : vector<1x32xf32> to vector<8x32xf32>
    %7 = arith.addf %6, %5 : vector<8x32xf32>
    %8 = arith.truncf %1 : vector<8x32xf32> to vector<8x32xbf16>
    %c0_7 = arith.constant 0 : index
    %c0_8 = arith.constant 0 : index
    %9 = vector.load %arg4[%c0_7, %c0_8] : memref<32x32xbf16, #tpu.memory_space<vmem>>, vector<32x32xbf16>
    %cst_9 = arith.constant dense<0.000000e+00> : vector<8x32xf32>
    %10 = tpu.matmul %8, %9, %cst_9 {dimension_numbers = #tpu.dot_dimension_numbers<[1], [0], [0], [1], [0, 0, 1, 1], [], []>} : vector<8x32xbf16>, vector<32x32xbf16>, vector<8x32xf32> -> vector<8x32xf32>
    %11 = arith.addf %7, %10 : vector<8x32xf32>
    %cst_10 = arith.constant dense<0.000000e+00> : vector<8xf32>
    %12 = vector.multi_reduction <add>, %11, %cst_10 [1] : vector<8x32xf32> to vector<8xf32>
    %13 = vector.shape_cast %12 : vector<8xf32> to vector<8x1xf32>
    %cst_11 = arith.constant 3.200000e+01 : f32
    %14 = vector.broadcast %cst_11 : f32 to vector<8x1xf32>
    %15 = arith.divf %13, %14 : vector<8x1xf32>
    %16 = vector.broadcast %15 : vector<8x1xf32> to vector<8x32xf32>
    %17 = arith.subf %11, %16 : vector<8x32xf32>
    %18 = arith.mulf %17, %17 : vector<8x32xf32>
    %cst_12 = arith.constant dense<0.000000e+00> : vector<8xf32>
    %19 = vector.multi_reduction <add>, %18, %cst_12 [1] : vector<8x32xf32> to vector<8xf32>
    %20 = vector.shape_cast %19 : vector<8xf32> to vector<8x1xf32>
    %cst_13 = arith.constant 3.200000e+01 : f32
    %21 = vector.broadcast %cst_13 : f32 to vector<8x1xf32>
    %22 = arith.divf %20, %21 : vector<8x1xf32>
    %cst_14 = arith.constant 9.99999974E-6 : f32
    %23 = vector.broadcast %cst_14 : f32 to vector<8x1xf32>
    %24 = arith.addf %22, %23 : vector<8x1xf32>
    %25 = math.rsqrt %24 : vector<8x1xf32>
    %26 = vector.broadcast %25 : vector<8x1xf32> to vector<8x32xf32>
    %27 = arith.mulf %17, %26 : vector<8x32xf32>
    %cst_15 = arith.constant 0.000000e+00 : f32
    %28 = vector.broadcast %cst_15 : f32 to vector<8x32xf32>
    %29 = arith.maximumf %27, %28 : vector<8x32xf32>
    %30 = arith.truncf %29 : vector<8x32xf32> to vector<8x32xbf16>
    %c0_16 = arith.constant 0 : index
    %c0_17 = arith.constant 0 : index
    %31 = vector.load %arg6[%c0_16, %c0_17] : memref<32x32xbf16, #tpu.memory_space<vmem>>, vector<32x32xbf16>
    %cst_18 = arith.constant dense<0.000000e+00> : vector<8x32xf32>
    %32 = tpu.matmul %30, %31, %cst_18 {dimension_numbers = #tpu.dot_dimension_numbers<[1], [0], [0], [1], [0, 0, 1, 1], [], []>} : vector<8x32xbf16>, vector<32x32xbf16>, vector<8x32xf32> -> vector<8x32xf32>
    %c0_19 = arith.constant 0 : index
    %c0_20 = arith.constant 0 : index
    %33 = vector.load %arg7[%c0_19, %c0_20] : memref<1x32xf32, #tpu.memory_space<vmem>>, vector<1x32xf32>
    %34 = vector.broadcast %33 : vector<1x32xf32> to vector<8x32xf32>
    %35 = arith.addf %32, %34 : vector<8x32xf32>
    %cst_21 = arith.constant dense<0.000000e+00> : vector<8xf32>
    %36 = vector.multi_reduction <add>, %35, %cst_21 [1] : vector<8x32xf32> to vector<8xf32>
    %37 = vector.shape_cast %36 : vector<8xf32> to vector<8x1xf32>
    %cst_22 = arith.constant 3.200000e+01 : f32
    %38 = vector.broadcast %cst_22 : f32 to vector<8x1xf32>
    %39 = arith.divf %37, %38 : vector<8x1xf32>
    %40 = vector.broadcast %39 : vector<8x1xf32> to vector<8x32xf32>
    %41 = arith.subf %35, %40 : vector<8x32xf32>
    %42 = arith.mulf %41, %41 : vector<8x32xf32>
    %cst_23 = arith.constant dense<0.000000e+00> : vector<8xf32>
    %43 = vector.multi_reduction <add>, %42, %cst_23 [1] : vector<8x32xf32> to vector<8xf32>
    %44 = vector.shape_cast %43 : vector<8xf32> to vector<8x1xf32>
    %cst_24 = arith.constant 3.200000e+01 : f32
    %45 = vector.broadcast %cst_24 : f32 to vector<8x1xf32>
    %46 = arith.divf %44, %45 : vector<8x1xf32>
    %cst_25 = arith.constant 9.99999974E-6 : f32
    %47 = vector.broadcast %cst_25 : f32 to vector<8x1xf32>
    %48 = arith.addf %46, %47 : vector<8x1xf32>
    %49 = math.rsqrt %48 : vector<8x1xf32>
    %50 = vector.broadcast %49 : vector<8x1xf32> to vector<8x32xf32>
    %51 = arith.mulf %41, %50 : vector<8x32xf32>
    %cst_26 = arith.constant 0.000000e+00 : f32
    %52 = vector.broadcast %cst_26 : f32 to vector<8x32xf32>
    %53 = arith.maximumf %51, %52 : vector<8x32xf32>
    %54 = arith.truncf %53 : vector<8x32xf32> to vector<8x32xbf16>
    %c0_27 = arith.constant 0 : index
    %c0_28 = arith.constant 0 : index
    %55 = vector.load %arg8[%c0_27, %c0_28] : memref<32x128xbf16, #tpu.memory_space<vmem>>, vector<32x128xbf16>
    %cst_29 = arith.constant dense<0.000000e+00> : vector<8x128xf32>
    %56 = tpu.matmul %54, %55, %cst_29 {dimension_numbers = #tpu.dot_dimension_numbers<[1], [0], [0], [1], [0, 0, 1, 1], [], []>} : vector<8x32xbf16>, vector<32x128xbf16>, vector<8x128xf32> -> vector<8x128xf32>
    %c0_30 = arith.constant 0 : index
    %c0_31 = arith.constant 0 : index
    %57 = vector.load %arg9[%c0_30, %c0_31] : memref<1x128xf32, #tpu.memory_space<vmem>>, vector<1x128xf32>
    %58 = vector.broadcast %57 : vector<1x128xf32> to vector<8x128xf32>
    %59 = arith.addf %56, %58 : vector<8x128xf32>
    %c0_32 = arith.constant 0 : index
    %c0_33 = arith.constant 0 : index
    %60 = vector.load %arg34[%c0_32, %c0_33] : memref<8x128xf32, #tpu.memory_space<vmem>>, vector<8x128xf32>
    tpu.vector_store %arg34[%c0_32, %c0_33], %59 {strides = array<i32>} : memref<8x128xf32, #tpu.memory_space<vmem>>, vector<8x128xf32>,
    %c0_34 = arith.constant 0 : index
    %c0_35 = arith.constant 0 : index
    %61 = vector.load %arg10[%c0_34, %c0_35] : memref<8x32xf32, #tpu.memory_space<vmem>>, vector<8x32xf32>
    %c0_36 = arith.constant 0 : index
    %c0_37 = arith.constant 0 : index
    %62 = vector.load %arg11[%c0_36, %c0_37] : memref<8x32xf32, #tpu.memory_space<vmem>>, vector<8x32xf32>
    %c0_38 = arith.constant 0 : index
    %c0_39 = arith.constant 0 : index
    %63 = vector.load %arg12[%c0_38, %c0_39] : memref<8x32xf32, #tpu.memory_space<vmem>>, vector<8x32xf32>
    %c0_40 = arith.constant 0 : index
    %c0_41 = arith.constant 0 : index
    %64 = vector.load %arg16[%c0_40, %c0_41] : memref<1x32xf32, #tpu.memory_space<vmem>>, vector<1x32xf32>
    %65 = arith.truncf %61 : vector<8x32xf32> to vector<8x32xbf16>
    %c0_42 = arith.constant 0 : index
    %c0_43 = arith.constant 0 : index
    %66 = vector.load %arg13[%c0_42, %c0_43] : memref<32x32xbf16, #tpu.memory_space<vmem>>, vector<32x32xbf16>
    %cst_44 = arith.constant dense<0.000000e+00> : vector<8x32xf32>
    %67 = tpu.matmul %65, %66, %cst_44 {dimension_numbers = #tpu.dot_dimension_numbers<[1], [0], [0], [1], [0, 0, 1, 1], [], []>} : vector<8x32xbf16>, vector<32x32xbf16>, vector<8x32xf32> -> vector<8x32xf32>
    %68 = vector.broadcast %64 : vector<1x32xf32> to vector<8x32xf32>
    %69 = arith.addf %68, %67 : vector<8x32xf32>
    %70 = arith.truncf %62 : vector<8x32xf32> to vector<8x32xbf16>
    %c0_45 = arith.constant 0 : index
    %c0_46 = arith.constant 0 : index
    %71 = vector.load %arg14[%c0_45, %c0_46] : memref<32x32xbf16, #tpu.memory_space<vmem>>, vector<32x32xbf16>
    %cst_47 = arith.constant dense<0.000000e+00> : vector<8x32xf32>
    %72 = tpu.matmul %70, %71, %cst_47 {dimension_numbers = #tpu.dot_dimension_numbers<[1], [0], [0], [1], [0, 0, 1, 1], [], []>} : vector<8x32xbf16>, vector<32x32xbf16>, vector<8x32xf32> -> vector<8x32xf32>
    %73 = arith.addf %69, %72 : vector<8x32xf32>
    %74 = arith.truncf %63 : vector<8x32xf32> to vector<8x32xbf16>
    %c0_48 = arith.constant 0 : index
    %c0_49 = arith.constant 0 : index
    %75 = vector.load %arg15[%c0_48, %c0_49] : memref<32x32xbf16, #tpu.memory_space<vmem>>, vector<32x32xbf16>
    %cst_50 = arith.constant dense<0.000000e+00> : vector<8x32xf32>
    %76 = tpu.matmul %74, %75, %cst_50 {dimension_numbers = #tpu.dot_dimension_numbers<[1], [0], [0], [1], [0, 0, 1, 1], [], []>} : vector<8x32xbf16>, vector<32x32xbf16>, vector<8x32xf32> -> vector<8x32xf32>
    %77 = arith.addf %73, %76 : vector<8x32xf32>
    %cst_51 = arith.constant dense<0.000000e+00> : vector<8xf32>
    %78 = vector.multi_reduction <add>, %77, %cst_51 [1] : vector<8x32xf32> to vector<8xf32>
    %79 = vector.shape_cast %78 : vector<8xf32> to vector<8x1xf32>
    %cst_52 = arith.constant 3.200000e+01 : f32
    %80 = vector.broadcast %cst_52 : f32 to vector<8x1xf32>
    %81 = arith.divf %79, %80 : vector<8x1xf32>
    %82 = vector.broadcast %81 : vector<8x1xf32> to vector<8x32xf32>
    %83 = arith.subf %77, %82 : vector<8x32xf32>
    %84 = arith.mulf %83, %83 : vector<8x32xf32>
    %cst_53 = arith.constant dense<0.000000e+00> : vector<8xf32>
    %85 = vector.multi_reduction <add>, %84, %cst_53 [1] : vector<8x32xf32> to vector<8xf32>
    %86 = vector.shape_cast %85 : vector<8xf32> to vector<8x1xf32>
    %cst_54 = arith.constant 3.200000e+01 : f32
    %87 = vector.broadcast %cst_54 : f32 to vector<8x1xf32>
    %88 = arith.divf %86, %87 : vector<8x1xf32>
    %cst_55 = arith.constant 9.99999974E-6 : f32
    %89 = vector.broadcast %cst_55 : f32 to vector<8x1xf32>
    %90 = arith.addf %88, %89 : vector<8x1xf32>
    %91 = math.rsqrt %90 : vector<8x1xf32>
    %92 = vector.broadcast %91 : vector<8x1xf32> to vector<8x32xf32>
    %93 = arith.mulf %83, %92 : vector<8x32xf32>
    %cst_56 = arith.constant 0.000000e+00 : f32
    %94 = vector.broadcast %cst_56 : f32 to vector<8x32xf32>
    %95 = arith.maximumf %93, %94 : vector<8x32xf32>
    %96 = arith.truncf %95 : vector<8x32xf32> to vector<8x32xbf16>
    %c0_57 = arith.constant 0 : index
    %c0_58 = arith.constant 0 : index
    %97 = vector.load %arg17[%c0_57, %c0_58] : memref<32x32xbf16, #tpu.memory_space<vmem>>, vector<32x32xbf16>
    %cst_59 = arith.constant dense<0.000000e+00> : vector<8x32xf32>
    %98 = tpu.matmul %96, %97, %cst_59 {dimension_numbers = #tpu.dot_dimension_numbers<[1], [0], [0], [1], [0, 0, 1, 1], [], []>} : vector<8x32xbf16>, vector<32x32xbf16>, vector<8x32xf32> -> vector<8x32xf32>
    %c0_60 = arith.constant 0 : index
    %c0_61 = arith.constant 0 : index
    %99 = vector.load %arg18[%c0_60, %c0_61] : memref<1x32xf32, #tpu.memory_space<vmem>>, vector<1x32xf32>
    %100 = vector.broadcast %99 : vector<1x32xf32> to vector<8x32xf32>
    %101 = arith.addf %98, %100 : vector<8x32xf32>
    %cst_62 = arith.constant dense<0.000000e+00> : vector<8xf32>
    %102 = vector.multi_reduction <add>, %101, %cst_62 [1] : vector<8x32xf32> to vector<8xf32>
    %103 = vector.shape_cast %102 : vector<8xf32> to vector<8x1xf32>
    %cst_63 = arith.constant 3.200000e+01 : f32
    %104 = vector.broadcast %cst_63 : f32 to vector<8x1xf32>
    %105 = arith.divf %103, %104 : vector<8x1xf32>
    %106 = vector.broadcast %105 : vector<8x1xf32> to vector<8x32xf32>
    %107 = arith.subf %101, %106 : vector<8x32xf32>
    %108 = arith.mulf %107, %107 : vector<8x32xf32>
    %cst_64 = arith.constant dense<0.000000e+00> : vector<8xf32>
    %109 = vector.multi_reduction <add>, %108, %cst_64 [1] : vector<8x32xf32> to vector<8xf32>
    %110 = vector.shape_cast %109 : vector<8xf32> to vector<8x1xf32>
    %cst_65 = arith.constant 3.200000e+01 : f32
    %111 = vector.broadcast %cst_65 : f32 to vector<8x1xf32>
    %112 = arith.divf %110, %111 : vector<8x1xf32>
    %cst_66 = arith.constant 9.99999974E-6 : f32
    %113 = vector.broadcast %cst_66 : f32 to vector<8x1xf32>
    %114 = arith.addf %112, %113 : vector<8x1xf32>
    %115 = math.rsqrt %114 : vector<8x1xf32>
    %116 = vector.broadcast %115 : vector<8x1xf32> to vector<8x32xf32>
    %117 = arith.mulf %107, %116 : vector<8x32xf32>
    %cst_67 = arith.constant 0.000000e+00 : f32
    %118 = vector.broadcast %cst_67 : f32 to vector<8x32xf32>
    %119 = arith.maximumf %117, %118 : vector<8x32xf32>
    %120 = arith.truncf %119 : vector<8x32xf32> to vector<8x32xbf16>
    %c0_68 = arith.constant 0 : index
    %c0_69 = arith.constant 0 : index
    %121 = vector.load %arg19[%c0_68, %c0_69] : memref<32x128xbf16, #tpu.memory_space<vmem>>, vector<32x128xbf16>
    %cst_70 = arith.constant dense<0.000000e+00> : vector<8x128xf32>
    %122 = tpu.matmul %120, %121, %cst_70 {dimension_numbers = #tpu.dot_dimension_numbers<[1], [0], [0], [1], [0, 0, 1, 1], [], []>} : vector<8x32xbf16>, vector<32x128xbf16>, vector<8x128xf32> -> vector<8x128xf32>
    %c0_71 = arith.constant 0 : index
    %c0_72 = arith.constant 0 : index
    %123 = vector.load %arg20[%c0_71, %c0_72] : memref<1x128xf32, #tpu.memory_space<vmem>>, vector<1x128xf32>
    %124 = vector.broadcast %123 : vector<1x128xf32> to vector<8x128xf32>
    %125 = arith.addf %122, %124 : vector<8x128xf32>
    %c0_73 = arith.constant 0 : index
    %c0_74 = arith.constant 0 : index
    %126 = vector.load %arg35[%c0_73, %c0_74] : memref<8x128xf32, #tpu.memory_space<vmem>>, vector<8x128xf32>
    tpu.vector_store %arg35[%c0_73, %c0_74], %125 {strides = array<i32>} : memref<8x128xf32, #tpu.memory_space<vmem>>, vector<8x128xf32>,
    %c0_75 = arith.constant 0 : index
    %c0_76 = arith.constant 0 : index
    %127 = vector.load %arg21[%c0_75, %c0_76] : memref<8x32xf32, #tpu.memory_space<vmem>>, vector<8x32xf32>
    %c0_77 = arith.constant 0 : index
    %c0_78 = arith.constant 0 : index
    %128 = vector.load %arg22[%c0_77, %c0_78] : memref<8x32xf32, #tpu.memory_space<vmem>>, vector<8x32xf32>
    %c0_79 = arith.constant 0 : index
    %c0_80 = arith.constant 0 : index
    %129 = vector.load %arg23[%c0_79, %c0_80] : memref<8x32xf32, #tpu.memory_space<vmem>>, vector<8x32xf32>
    %c0_81 = arith.constant 0 : index
    %c0_82 = arith.constant 0 : index
    %130 = vector.load %arg24[%c0_81, %c0_82] : memref<8x32xf32, #tpu.memory_space<vmem>>, vector<8x32xf32>
    %c0_83 = arith.constant 0 : index
    %c0_84 = arith.constant 0 : index
    %131 = vector.load %arg29[%c0_83, %c0_84] : memref<1x32xf32, #tpu.memory_space<vmem>>, vector<1x32xf32>
    %132 = arith.truncf %127 : vector<8x32xf32> to vector<8x32xbf16>
    %c0_85 = arith.constant 0 : index
    %c0_86 = arith.constant 0 : index
    %133 = vector.load %arg25[%c0_85, %c0_86] : memref<32x32xbf16, #tpu.memory_space<vmem>>, vector<32x32xbf16>
    %cst_87 = arith.constant dense<0.000000e+00> : vector<8x32xf32>
    %134 = tpu.matmul %132, %133, %cst_87 {dimension_numbers = #tpu.dot_dimension_numbers<[1], [0], [0], [1], [0, 0, 1, 1], [], []>} : vector<8x32xbf16>, vector<32x32xbf16>, vector<8x32xf32> -> vector<8x32xf32>
    %135 = vector.broadcast %131 : vector<1x32xf32> to vector<8x32xf32>
    %136 = arith.addf %135, %134 : vector<8x32xf32>
    %137 = arith.truncf %128 : vector<8x32xf32> to vector<8x32xbf16>
    %c0_88 = arith.constant 0 : index
    %c0_89 = arith.constant 0 : index
    %138 = vector.load %arg26[%c0_88, %c0_89] : memref<32x32xbf16, #tpu.memory_space<vmem>>, vector<32x32xbf16>
    %cst_90 = arith.constant dense<0.000000e+00> : vector<8x32xf32>
    %139 = tpu.matmul %137, %138, %cst_90 {dimension_numbers = #tpu.dot_dimension_numbers<[1], [0], [0], [1], [0, 0, 1, 1], [], []>} : vector<8x32xbf16>, vector<32x32xbf16>, vector<8x32xf32> -> vector<8x32xf32>
    %140 = arith.addf %136, %139 : vector<8x32xf32>
    %141 = arith.truncf %129 : vector<8x32xf32> to vector<8x32xbf16>
    %c0_91 = arith.constant 0 : index
    %c0_92 = arith.constant 0 : index
    %142 = vector.load %arg27[%c0_91, %c0_92] : memref<32x32xbf16, #tpu.memory_space<vmem>>, vector<32x32xbf16>
    %cst_93 = arith.constant dense<0.000000e+00> : vector<8x32xf32>
    %143 = tpu.matmul %141, %142, %cst_93 {dimension_numbers = #tpu.dot_dimension_numbers<[1], [0], [0], [1], [0, 0, 1, 1], [], []>} : vector<8x32xbf16>, vector<32x32xbf16>, vector<8x32xf32> -> vector<8x32xf32>
    %144 = arith.addf %140, %143 : vector<8x32xf32>
    %145 = arith.truncf %130 : vector<8x32xf32> to vector<8x32xbf16>
    %c0_94 = arith.constant 0 : index
    %c0_95 = arith.constant 0 : index
    %146 = vector.load %arg28[%c0_94, %c0_95] : memref<32x32xbf16, #tpu.memory_space<vmem>>, vector<32x32xbf16>
    %cst_96 = arith.constant dense<0.000000e+00> : vector<8x32xf32>
    %147 = tpu.matmul %145, %146, %cst_96 {dimension_numbers = #tpu.dot_dimension_numbers<[1], [0], [0], [1], [0, 0, 1, 1], [], []>} : vector<8x32xbf16>, vector<32x32xbf16>, vector<8x32xf32> -> vector<8x32xf32>
    %148 = arith.addf %144, %147 : vector<8x32xf32>
    %cst_97 = arith.constant dense<0.000000e+00> : vector<8xf32>
    %149 = vector.multi_reduction <add>, %148, %cst_97 [1] : vector<8x32xf32> to vector<8xf32>
    %150 = vector.shape_cast %149 : vector<8xf32> to vector<8x1xf32>
    %cst_98 = arith.constant 3.200000e+01 : f32
    %151 = vector.broadcast %cst_98 : f32 to vector<8x1xf32>
    %152 = arith.divf %150, %151 : vector<8x1xf32>
    %153 = vector.broadcast %152 : vector<8x1xf32> to vector<8x32xf32>
    %154 = arith.subf %148, %153 : vector<8x32xf32>
    %155 = arith.mulf %154, %154 : vector<8x32xf32>
    %cst_99 = arith.constant dense<0.000000e+00> : vector<8xf32>
    %156 = vector.multi_reduction <add>, %155, %cst_99 [1] : vector<8x32xf32> to vector<8xf32>
    %157 = vector.shape_cast %156 : vector<8xf32> to vector<8x1xf32>
    %cst_100 = arith.constant 3.200000e+01 : f32
    %158 = vector.broadcast %cst_100 : f32 to vector<8x1xf32>
    %159 = arith.divf %157, %158 : vector<8x1xf32>
    %cst_101 = arith.constant 9.99999974E-6 : f32
    %160 = vector.broadcast %cst_101 : f32 to vector<8x1xf32>
    %161 = arith.addf %159, %160 : vector<8x1xf32>
    %162 = math.rsqrt %161 : vector<8x1xf32>
    %163 = vector.broadcast %162 : vector<8x1xf32> to vector<8x32xf32>
    %164 = arith.mulf %154, %163 : vector<8x32xf32>
    %cst_102 = arith.constant 0.000000e+00 : f32
    %165 = vector.broadcast %cst_102 : f32 to vector<8x32xf32>
    %166 = arith.maximumf %164, %165 : vector<8x32xf32>
    %167 = arith.truncf %166 : vector<8x32xf32> to vector<8x32xbf16>
    %c0_103 = arith.constant 0 : index
    %c0_104 = arith.constant 0 : index
    %168 = vector.load %arg30[%c0_103, %c0_104] : memref<32x32xbf16, #tpu.memory_space<vmem>>, vector<32x32xbf16>
    %cst_105 = arith.constant dense<0.000000e+00> : vector<8x32xf32>
    %169 = tpu.matmul %167, %168, %cst_105 {dimension_numbers = #tpu.dot_dimension_numbers<[1], [0], [0], [1], [0, 0, 1, 1], [], []>} : vector<8x32xbf16>, vector<32x32xbf16>, vector<8x32xf32> -> vector<8x32xf32>
    %c0_106 = arith.constant 0 : index
    %c0_107 = arith.constant 0 : index
    %170 = vector.load %arg31[%c0_106, %c0_107] : memref<1x32xf32, #tpu.memory_space<vmem>>, vector<1x32xf32>
    %171 = vector.broadcast %170 : vector<1x32xf32> to vector<8x32xf32>
    %172 = arith.addf %169, %171 : vector<8x32xf32>
    %cst_108 = arith.constant dense<0.000000e+00> : vector<8xf32>
    %173 = vector.multi_reduction <add>, %172, %cst_108 [1] : vector<8x32xf32> to vector<8xf32>
    %174 = vector.shape_cast %173 : vector<8xf32> to vector<8x1xf32>
    %cst_109 = arith.constant 3.200000e+01 : f32
    %175 = vector.broadcast %cst_109 : f32 to vector<8x1xf32>
    %176 = arith.divf %174, %175 : vector<8x1xf32>
    %177 = vector.broadcast %176 : vector<8x1xf32> to vector<8x32xf32>
    %178 = arith.subf %172, %177 : vector<8x32xf32>
    %179 = arith.mulf %178, %178 : vector<8x32xf32>
    %cst_110 = arith.constant dense<0.000000e+00> : vector<8xf32>
    %180 = vector.multi_reduction <add>, %179, %cst_110 [1] : vector<8x32xf32> to vector<8xf32>
    %181 = vector.shape_cast %180 : vector<8xf32> to vector<8x1xf32>
    %cst_111 = arith.constant 3.200000e+01 : f32
    %182 = vector.broadcast %cst_111 : f32 to vector<8x1xf32>
    %183 = arith.divf %181, %182 : vector<8x1xf32>
    %cst_112 = arith.constant 9.99999974E-6 : f32
    %184 = vector.broadcast %cst_112 : f32 to vector<8x1xf32>
    %185 = arith.addf %183, %184 : vector<8x1xf32>
    %186 = math.rsqrt %185 : vector<8x1xf32>
    %187 = vector.broadcast %186 : vector<8x1xf32> to vector<8x32xf32>
    %188 = arith.mulf %178, %187 : vector<8x32xf32>
    %cst_113 = arith.constant 0.000000e+00 : f32
    %189 = vector.broadcast %cst_113 : f32 to vector<8x32xf32>
    %190 = arith.maximumf %188, %189 : vector<8x32xf32>
    %191 = arith.truncf %190 : vector<8x32xf32> to vector<8x32xbf16>
    %c0_114 = arith.constant 0 : index
    %c0_115 = arith.constant 0 : index
    %192 = vector.load %arg32[%c0_114, %c0_115] : memref<32x128xbf16, #tpu.memory_space<vmem>>, vector<32x128xbf16>
    %cst_116 = arith.constant dense<0.000000e+00> : vector<8x128xf32>
    %193 = tpu.matmul %191, %192, %cst_116 {dimension_numbers = #tpu.dot_dimension_numbers<[1], [0], [0], [1], [0, 0, 1, 1], [], []>} : vector<8x32xbf16>, vector<32x128xbf16>, vector<8x128xf32> -> vector<8x128xf32>
    %c0_117 = arith.constant 0 : index
    %c0_118 = arith.constant 0 : index
    %194 = vector.load %arg33[%c0_117, %c0_118] : memref<1x128xf32, #tpu.memory_space<vmem>>, vector<1x128xf32>
    %195 = vector.broadcast %194 : vector<1x128xf32> to vector<8x128xf32>
    %196 = arith.addf %193, %195 : vector<8x128xf32>
    %c0_119 = arith.constant 0 : index
    %c0_120 = arith.constant 0 : index
    %197 = vector.load %arg36[%c0_119, %c0_120] : memref<8x128xf32, #tpu.memory_space<vmem>>, vector<8x128xf32>
    tpu.vector_store %arg36[%c0_119, %c0_120], %196 {strides = array<i32>} : memref<8x128xf32, #tpu.memory_space<vmem>>, vector<8x128xf32>,
    return
  }
  func.func @transform_0(%arg0: i32) -> (i32, i32) {
    %c0_i32 = arith.constant 0 : i32
    %c0_i32_0 = arith.constant 0 : i32
    return %arg0, %c0_i32 : i32, i32
  }
  func.func @transform_1(%arg0: i32) -> (i32, i32) {
    %c0_i32 = arith.constant 0 : i32
    %c0_i32_0 = arith.constant 0 : i32
    return %arg0, %c0_i32 : i32, i32
  }
  func.func @transform_2(%arg0: i32) -> (i32, i32) {
    %c0_i32 = arith.constant 0 : i32
    %c0_i32_0 = arith.constant 0 : i32
    %c0_i32_1 = arith.constant 0 : i32
    return %c0_i32, %c0_i32_0 : i32, i32
  }
  func.func @transform_3(%arg0: i32) -> (i32, i32) {
    %c0_i32 = arith.constant 0 : i32
    %c0_i32_0 = arith.constant 0 : i32
    %c0_i32_1 = arith.constant 0 : i32
    return %c0_i32, %c0_i32_0 : i32, i32
  }
  func.func @transform_4(%arg0: i32) -> (i32, i32) {
    %c0_i32 = arith.constant 0 : i32
    %c0_i32_0 = arith.constant 0 : i32
    %c0_i32_1 = arith.constant 0 : i32
    return %c0_i32, %c0_i32_0 : i32, i32
  }
  func.func @transform_5(%arg0: i32) -> (i32, i32) {
    %c0_i32 = arith.constant 0 : i32
    %c0_i32_0 = arith.constant 0 : i32
    %c0_i32_1 = arith.constant 0 : i32
    return %c0_i32, %c0_i32_0 : i32, i32
  }
  func.func @transform_6(%arg0: i32) -> (i32, i32) {
    %c0_i32 = arith.constant 0 : i32
    %c0_i32_0 = arith.constant 0 : i32
    %c0_i32_1 = arith.constant 0 : i32
    return %c0_i32, %c0_i32_0 : i32, i32
  }
  func.func @transform_7(%arg0: i32) -> (i32, i32) {
    %c0_i32 = arith.constant 0 : i32
    %c0_i32_0 = arith.constant 0 : i32
    %c0_i32_1 = arith.constant 0 : i32
    return %c0_i32, %c0_i32_0 : i32, i32
  }
  func.func @transform_8(%arg0: i32) -> (i32, i32) {
    %c0_i32 = arith.constant 0 : i32
    %c0_i32_0 = arith.constant 0 : i32
    %c0_i32_1 = arith.constant 0 : i32
    return %c0_i32, %c0_i32_0 : i32, i32
  }
  func.func @transform_9(%arg0: i32) -> (i32, i32) {
    %c0_i32 = arith.constant 0 : i32
    %c0_i32_0 = arith.constant 0 : i32
    return %arg0, %c0_i32 : i32, i32
  }
  func.func @transform_10(%arg0: i32) -> (i32, i32) {
    %c0_i32 = arith.constant 0 : i32
    %c0_i32_0 = arith.constant 0 : i32
    return %arg0, %c0_i32 : i32, i32
  }
  func.func @transform_11(%arg0: i32) -> (i32, i32) {
    %c0_i32 = arith.constant 0 : i32
    %c0_i32_0 = arith.constant 0 : i32
    return %arg0, %c0_i32 : i32, i32
  }
  func.func @transform_12(%arg0: i32) -> (i32, i32) {
    %c0_i32 = arith.constant 0 : i32
    %c0_i32_0 = arith.constant 0 : i32
    %c0_i32_1 = arith.constant 0 : i32
    return %c0_i32, %c0_i32_0 : i32, i32
  }
  func.func @transform_13(%arg0: i32) -> (i32, i32) {
    %c0_i32 = arith.constant 0 : i32
    %c0_i32_0 = arith.constant 0 : i32
    %c0_i32_1 = arith.constant 0 : i32
    return %c0_i32, %c0_i32_0 : i32, i32
  }
  func.func @transform_14(%arg0: i32) -> (i32, i32) {
    %c0_i32 = arith.constant 0 : i32
    %c0_i32_0 = arith.constant 0 : i32
    %c0_i32_1 = arith.constant 0 : i32
    return %c0_i32, %c0_i32_0 : i32, i32
  }
  func.func @transform_15(%arg0: i32) -> (i32, i32) {
    %c0_i32 = arith.constant 0 : i32
    %c0_i32_0 = arith.constant 0 : i32
    %c0_i32_1 = arith.constant 0 : i32
    return %c0_i32, %c0_i32_0 : i32, i32
  }
  func.func @transform_16(%arg0: i32) -> (i32, i32) {
    %c0_i32 = arith.constant 0 : i32
    %c0_i32_0 = arith.constant 0 : i32
    %c0_i32_1 = arith.constant 0 : i32
    return %c0_i32, %c0_i32_0 : i32, i32
  }
  func.func @transform_17(%arg0: i32) -> (i32, i32) {
    %c0_i32 = arith.constant 0 : i32
    %c0_i32_0 = arith.constant 0 : i32
    %c0_i32_1 = arith.constant 0 : i32
    return %c0_i32, %c0_i32_0 : i32, i32
  }
  func.func @transform_18(%arg0: i32) -> (i32, i32) {
    %c0_i32 = arith.constant 0 : i32
    %c0_i32_0 = arith.constant 0 : i32
    %c0_i32_1 = arith.constant 0 : i32
    return %c0_i32, %c0_i32_0 : i32, i32
  }
  func.func @transform_19(%arg0: i32) -> (i32, i32) {
    %c0_i32 = arith.constant 0 : i32
    %c0_i32_0 = arith.constant 0 : i32
    %c0_i32_1 = arith.constant 0 : i32
    return %c0_i32, %c0_i32_0 : i32, i32
  }
  func.func @transform_20(%arg0: i32) -> (i32, i32) {
    %c0_i32 = arith.constant 0 : i32
    %c0_i32_0 = arith.constant 0 : i32
    return %arg0, %c0_i32 : i32, i32
  }
  func.func @transform_21(%arg0: i32) -> (i32, i32) {
    %c0_i32 = arith.constant 0 : i32
    %c0_i32_0 = arith.constant 0 : i32
    return %arg0, %c0_i32 : i32, i32
  }
  func.func @transform_22(%arg0: i32) -> (i32, i32) {
    %c0_i32 = arith.constant 0 : i32
    %c0_i32_0 = arith.constant 0 : i32
    return %arg0, %c0_i32 : i32, i32
  }
  func.func @transform_23(%arg0: i32) -> (i32, i32) {
    %c0_i32 = arith.constant 0 : i32
    %c0_i32_0 = arith.constant 0 : i32
    return %arg0, %c0_i32 : i32, i32
  }
  func.func @transform_24(%arg0: i32) -> (i32, i32) {
    %c0_i32 = arith.constant 0 : i32
    %c0_i32_0 = arith.constant 0 : i32
    %c0_i32_1 = arith.constant 0 : i32
    return %c0_i32, %c0_i32_0 : i32, i32
  }
  func.func @transform_25(%arg0: i32) -> (i32, i32) {
    %c0_i32 = arith.constant 0 : i32
    %c0_i32_0 = arith.constant 0 : i32
    %c0_i32_1 = arith.constant 0 : i32
    return %c0_i32, %c0_i32_0 : i32, i32
  }
  func.func @transform_26(%arg0: i32) -> (i32, i32) {
    %c0_i32 = arith.constant 0 : i32
    %c0_i32_0 = arith.constant 0 : i32
    %c0_i32_1 = arith.constant 0 : i32
    return %c0_i32, %c0_i32_0 : i32, i32
  }
  func.func @transform_27(%arg0: i32) -> (i32, i32) {
    %c0_i32 = arith.constant 0 : i32
    %c0_i32_0 = arith.constant 0 : i32
    %c0_i32_1 = arith.constant 0 : i32
    return %c0_i32, %c0_i32_0 : i32, i32
  }
  func.func @transform_28(%arg0: i32) -> (i32, i32) {
    %c0_i32 = arith.constant 0 : i32
    %c0_i32_0 = arith.constant 0 : i32
    %c0_i32_1 = arith.constant 0 : i32
    return %c0_i32, %c0_i32_0 : i32, i32
  }
  func.func @transform_29(%arg0: i32) -> (i32, i32) {
    %c0_i32 = arith.constant 0 : i32
    %c0_i32_0 = arith.constant 0 : i32
    %c0_i32_1 = arith.constant 0 : i32
    return %c0_i32, %c0_i32_0 : i32, i32
  }
  func.func @transform_30(%arg0: i32) -> (i32, i32) {
    %c0_i32 = arith.constant 0 : i32
    %c0_i32_0 = arith.constant 0 : i32
    %c0_i32_1 = arith.constant 0 : i32
    return %c0_i32, %c0_i32_0 : i32, i32
  }
  func.func @transform_31(%arg0: i32) -> (i32, i32) {
    %c0_i32 = arith.constant 0 : i32
    %c0_i32_0 = arith.constant 0 : i32
    %c0_i32_1 = arith.constant 0 : i32
    return %c0_i32, %c0_i32_0 : i32, i32
  }
  func.func @transform_32(%arg0: i32) -> (i32, i32) {
    %c0_i32 = arith.constant 0 : i32
    %c0_i32_0 = arith.constant 0 : i32
    %c0_i32_1 = arith.constant 0 : i32
    return %c0_i32, %c0_i32_0 : i32, i32
  }
  func.func @transform_33(%arg0: i32) -> (i32, i32) {
    %c0_i32 = arith.constant 0 : i32
    %c0_i32_0 = arith.constant 0 : i32
    return %arg0, %c0_i32 : i32, i32
  }
  func.func @transform_34(%arg0: i32) -> (i32, i32) {
    %c0_i32 = arith.constant 0 : i32
    %c0_i32_0 = arith.constant 0 : i32
    return %arg0, %c0_i32 : i32, i32
  }
  func.func @transform_35(%arg0: i32) -> (i32, i32) {
    %c0_i32 = arith.constant 0 : i32
    %c0_i32_0 = arith.constant 0 : i32
    return %arg0, %c0_i32 : i32, i32
  }
}

</mosaic_0001>

<bundles_post_ra>
// kernel: egem_forward.16
= control target key start
LH: loop header
LB: loop body
LE: loop exit
PB: predicated region body
PF: predicated region fallthrough
CT: control target
= control target key end

     0   :  { %vm57_vm0 = vcmask 261120   ;;  %v302_v30 = vmov 32.0   ;;  %s417_s3 = inlined_call_operand.vmem [shape: bf16[32,32], index: 3, kind: input, shape index: {}]   ;;  %s418_s4 = inlined_call_operand.vmem [shape: bf16[32,32], index: 4, kind: input, shape index: {}]   ;;  %s419_s5 = inlined_call_operand.vmem [shape: bf16[32,32], index: 5, kind: input, shape index: {}]   ;;  %s420_s0 = inlined_call_operand.vmem [shape: f32[16,32], index: 0, kind: input, shape index: {}]   ;;  %s421_s1 = inlined_call_operand.vmem [shape: f32[16,32], index: 1, kind: input, shape index: {}]   ;;  %s422_s2 = inlined_call_operand.vmem [shape: f32[16,32], index: 2, kind: input, shape index: {}]   ;;  %s423_s6 = inlined_call_operand.vmem [shape: f32[1,32], index: 6, kind: input, shape index: {}]   ;;  %s424_s8 = inlined_call_operand.vmem [shape: f32[1,32], index: 8, kind: input, shape index: {}]   ;;  %s425_s7 = inlined_call_operand.vmem [shape: bf16[32,32], index: 7, kind: input, shape index: {}]   ;;  %s426_s9 = inlined_call_operand.vmem [shape: f32[16,32], index: 9, kind: output, shape index: {}]  }
   0x1   :  { %v286_v0 = vld [vmem:[%s417_s3 + $0x8] sm:$0xff]  ;;  %v285_v3 = vld [vmem:[%s417_s3] sm:$0xff]  ;;  %296 = vrcp.f32 %v302_v30 }
   0x2   :  { %v288_v1 = vld [vmem:[%s418_s4 + $0x8] sm:$0xff]  ;;  %v287_v4 = vld [vmem:[%s418_s4] sm:$0xff]  ;;  %67 = vmatpush.bf16.msra.mxu0 %v286_v0 }
   0x3   :  { %v290_v2 = vld [vmem:[%s419_s5 + $0x8] sm:$0xff]  ;;  %v289_v5 = vld [vmem:[%s419_s5] sm:$0xff]  ;;  %106 = vmatpush.bf16.msra.mxu1 %v288_v1 }
   0x4   :  { %v33_v6 = vld [vmem:[%s420_s0] sm:$0xff]  ;;  %v34_v7 = vld [vmem:[%s420_s0 + $0x8] sm:$0xff]  ;;  %142 = vmatpush.bf16.msra.mxu2 %v290_v2 }
   0x5   :  { %v35_v8 = vld [vmem:[%s421_s1] sm:$0xff]  ;;  %v36_v9 = vld [vmem:[%s421_s1 + $0x8] sm:$0xff]  ;;  %v40_v12 = vpack.c.bf16 %v34_v7, %v33_v6 }
   0x6   :  { %v37_v10 = vld [vmem:[%s422_s2] sm:$0xff]  ;;  %v38_v11 = vld [vmem:[%s422_s2 + $0x8] sm:$0xff]  ;;  %v80_v13 = vpack.c.bf16 %v36_v9, %v35_v8  ;;  %68 = vmatpush.bf16.msra.mxu0 %v285_v3 }
   0x7   :  { %107 = vmatpush.bf16.msra.mxu1 %v287_v4  ;;  %v116_v14 = vpack.c.bf16 %v38_v11, %v37_v10  ;;  %v294_v15 = vld [vmem:[%s423_s6] ss:$0 sm:$0xff]  ;;  %v297_v31 = vpop.eup %296  ;;  %v292_v47 = vld [vmem:[%s425_s7 + $0x8] sm:$0xff] }
   0x8   :  { %143 = vmatpush.bf16.msra.mxu2 %v289_v5  ;;  %v159_v32 = vmul.f32 32.0, %v297_v31  ;;  %vm163_vm1 = vweird.f32 %v297_v31  ;;  %235 = vmatpush.bf16.msra.mxu3 %v292_v47  ;;  %v291_v48 = vld [vmem:[%s425_s7] sm:$0xff] }
   0x9   :  { %257 = vmatmul.msk.bf16.vlgmr.msra.gmra.mxu0 %vm57_vm0, %v40_v12  ;;  %v295_v10 = vld [vmem:[%s424_s8] ss:$0 sm:$0xff] }
   0xa   :  { %266 = vmatmul.msk.bf16.vlgmr.msra.gmra.mxu1 %vm57_vm0, %v80_v13  ;;  %v160_v33 = vsub.f32 1.0, %v159_v32 }
   0xb   :  { %275 = vmatmul.msk.bf16.vlgmr.msra.gmra.mxu2 %vm57_vm0, %v116_v14 }
   0xc   :  { %v161_v34 = vmul.f32 %v297_v31, %v160_v33  ;;  %236 = vmatpush.bf16.msra.mxu3 %v291_v48 }
   0xe   :  { %v162_v35 = vadd.f32 %v297_v31, %v161_v34 }
  0x10   :  { %v164_v36 = vsel %vm163_vm1, %v297_v31, %v162_v35 }
  0x86   :  { %v70_v16 = vpop.f32.mrf.mxu0 }
  0x87   :  { %v78_v17 = vadd.f32 %v294_v15, %v70_v16  ;;  %v109_v18 = vpop.f32.mrf.mxu1 }
  0x89   :  { %v114_v19 = vadd.f32 %v109_v18, %v78_v17 }
  0x8e   :  { %v145_v20 = vpop.f32.mrf.mxu2  ;;  %v72_v22 = vpop.f32.mrf.mxu0 }
  0x8f   :  { %v150_v21 = vadd.f32 %v145_v20, %v114_v19  ;;  %v79_v23 = vadd.f32 %v294_v15, %v72_v22  ;;  %v111_v25 = vpop.f32.mrf.mxu1 }
  0x91   :  { %v152_v24 = vsel %vm57_vm0, %v150_v21, 0.0  ;;  %v115_v26 = vadd.f32 %v111_v25, %v79_v23 }
  0x92   :  { %153 = vadd.xlane.f32.xlu0 %v152_v24 }
  0x96   :  { %v147_v27 = vpop.f32.mrf.mxu2 }
  0x97   :  { %v151_v28 = vadd.f32 %v147_v27, %v115_v26 }
  0x99   :  { %v155_v29 = vsel %vm57_vm0, %v151_v28, 0.0 }
  0x9a   :  { %156 = vadd.xlane.f32.xlu0 %v155_v29 }
 0x105   :  { %v154_v37 = vpop.xlane.xlu0 %153 }
 0x106   :  { %v165_v38 = vmul.f32 %v164_v36, %v154_v37 }
 0x108   :  { %v167_v39 = vsub.f32 %v150_v21, %v165_v38 }
 0x10a   :  { %v169_v40 = vmul.f32 %v167_v39, %v167_v39 }
 0x10c   :  { %v171_v41 = vsel %vm57_vm0, %v169_v40, 0.0 }
 0x10d   :  { %172 = vadd.xlane.f32.xlu1 %v171_v41  ;;  %v157_v42 = vpop.xlane.xlu0 %156 }
 0x10e   :  { %v166_v43 = vmul.f32 %v164_v36, %v157_v42 }
 0x110   :  { %v168_v44 = vsub.f32 %v151_v28, %v166_v43 }
 0x112   :  { %v170_v45 = vmul.f32 %v168_v44, %v168_v44 }
 0x114   :  { %v174_v46 = vsel %vm57_vm0, %v170_v45, 0.0 }
 0x115   :  { %175 = vadd.xlane.f32.xlu1 %v174_v46 }
 0x180   :  { %v173_v49 = vpop.xlane.xlu1 %172 }
 0x181   :  { %v177_v50 = vmul.f32 %v173_v49, %v164_v36 }
 0x183   :  { %v179_v51 = vadd.f32 1e-05, %v177_v50 }
 0x185   :  { %298 = vrsqrt.f32 %v179_v51  ;;  %vm187_vm3 = vweird.f32 %v179_v51 }
 0x188   :  { %v176_v52 = vpop.xlane.xlu1 %175 }
 0x189   :  { %v178_v53 = vmul.f32 %v176_v52, %v164_v36 }
 0x18b   :  { %v299_v54 = vpop.eup %298  ;;  %v180_v55 = vadd.f32 1e-05, %v178_v53 }
 0x18c   :  { %v182_v56 = vmul.f32 %v299_v54, %v179_v51  ;;  %vm188_vm2 = vweird.f32 %v299_v54 }
 0x18d   :  { %300 = vrsqrt.f32 %v180_v55  ;;  %vm189_vm4 = vmor %vm187_vm3, %vm188_vm2  ;;  %vm197_vm6 = vweird.f32 %v180_v55 }
 0x18e   :  { %v183_v57 = vmul.f32 %v299_v54, %v182_v56 }
 0x190   :  { %v184_v58 = vmul.f32 0.5, %v183_v57 }
 0x192   :  { %v185_v59 = vsub.f32 1.5, %v184_v58 }
 0x193   :  { %v301_v60 = vpop.eup %300 }
 0x194   :  { %v192_v61 = vmul.f32 %v301_v60, %v180_v55  ;;  %v186_v62 = vmul.f32 %v299_v54, %v185_v59  ;;  %vm198_vm5 = vweird.f32 %v301_v60 }
 0x195   :  { %vm199_vm7 = vmor %vm197_vm6, %vm198_vm5 }
 0x196   :  { %v193_v63 = vmul.f32 %v301_v60, %v192_v61  ;;  %v190_v2 = vsel %vm189_vm4, %v299_v54, %v186_v62 }
 0x197   :  { %v201_v4 = vmul.f32 %v190_v2, %v167_v39 }
 0x198   :  { %v194_v0 = vmul.f32 0.5, %v193_v63 }
 0x199   :  { %v203_v7 = vmax.f32 %v201_v4, 0.0 }
 0x19a   :  { %v195_v1 = vsub.f32 1.5, %v194_v0 }
 0x19c   :  { %v196_v3 = vmul.f32 %v301_v60, %v195_v1 }
 0x19e   :  { %v200_v5 = vsel %vm199_vm7, %v301_v60, %v196_v3 }
 0x19f   :  { %v202_v6 = vmul.f32 %v200_v5, %v168_v44 }
 0x1a1   :  { %v204_v8 = vmax.f32 %v202_v6, 0.0 }
 0x1a3   :  { %v205_v9 = vpack.c.bf16 %v204_v8, %v203_v7 }
 0x1a5   :  { %284 = vmatmul.msk.bf16.vlgmr.msra.gmra.mxu3 %vm57_vm0, %v205_v9 }
 0x228   :  { %v238_v11 = vpop.f32.mrf.mxu3 }
 0x229   :  { %v239_v12 = vadd.f32 %v295_v10, %v238_v11 }
 0x22b   :  { %243 = vst.msk [vmem:[%s426_s9] sm:$0xff] %vm57_vm0, %v239_v12 }
 0x230   :  { %v240_v13 = vpop.f32.mrf.mxu3 }
 0x231   :  { %v241_v14 = vadd.f32 %v295_v10, %v240_v13 }
 0x233   :  { %244 = vst.msk [vmem:[%s426_s9 + $0x8] sm:$0xff] %vm57_vm0, %v241_v14 }

// kernel: egem_forward.17
= control target key start
LH: loop header
LB: loop body
LE: loop exit
PB: predicated region body
PF: predicated region fallthrough
CT: control target
= control target key end

     0   :  { %vm60_vm0 = vcmask 261120   ;;  %v309_v30 = vmov 32.0   ;;  %s435_s3 = inlined_call_operand.vmem [shape: bf16[32,32], index: 3, kind: input, shape index: {}]   ;;  %s436_s4 = inlined_call_operand.vmem [shape: bf16[32,32], index: 4, kind: input, shape index: {}]   ;;  %s437_s5 = inlined_call_operand.vmem [shape: bf16[32,32], index: 5, kind: input, shape index: {}]   ;;  %s438_s0 = inlined_call_operand.vmem [shape: f32[16,32], index: 0, kind: input, shape index: {}, may-alias: {0,9}]   ;;  %s439_s1 = inlined_call_operand.vmem [shape: f32[16,32], index: 1, kind: input, shape index: {}]   ;;  %s440_s2 = inlined_call_operand.vmem [shape: f32[16,32], index: 2, kind: input, shape index: {}]   ;;  %s441_s6 = inlined_call_operand.vmem [shape: f32[1,32], index: 6, kind: input, shape index: {}]   ;;  %s442_s8 = inlined_call_operand.vmem [shape: f32[1,32], index: 8, kind: input, shape index: {}]   ;;  %s443_s7 = inlined_call_operand.vmem [shape: bf16[32,32], index: 7, kind: input, shape index: {}]   ;;  %s444_s9 = inlined_call_operand.vmem [shape: f32[16,32], index: 9, kind: input, shape index: {}, may-alias: {0,9}]   ;;  %s445_s10 = inlined_call_operand.vmem [shape: f32[16,32], index: 10, kind: output, shape index: {}]  }
   0x1   :  { %v293_v0 = vld [vmem:[%s435_s3 + $0x8] sm:$0xff]  ;;  %v292_v3 = vld [vmem:[%s435_s3] sm:$0xff]  ;;  %303 = vrcp.f32 %v309_v30 }
   0x2   :  { %v295_v1 = vld [vmem:[%s436_s4 + $0x8] sm:$0xff]  ;;  %v294_v4 = vld [vmem:[%s436_s4] sm:$0xff]  ;;  %70 = vmatpush.bf16.msra.mxu0 %v293_v0 }
   0x3   :  { %v297_v2 = vld [vmem:[%s437_s5 + $0x8] sm:$0xff]  ;;  %v296_v5 = vld [vmem:[%s437_s5] sm:$0xff]  ;;  %109 = vmatpush.bf16.msra.mxu1 %v295_v1 }
   0x4   :  { %v36_v6 = vld [vmem:[%s438_s0] sm:$0xff]  ;;  %v37_v7 = vld [vmem:[%s438_s0 + $0x8] sm:$0xff]  ;;  %145 = vmatpush.bf16.msra.mxu2 %v297_v2 }
   0x5   :  { %v38_v8 = vld [vmem:[%s439_s1] sm:$0xff]  ;;  %v39_v9 = vld [vmem:[%s439_s1 + $0x8] sm:$0xff]  ;;  %v43_v12 = vpack.c.bf16 %v37_v7, %v36_v6 }
   0x6   :  { %v40_v10 = vld [vmem:[%s440_s2] sm:$0xff]  ;;  %v41_v11 = vld [vmem:[%s440_s2 + $0x8] sm:$0xff]  ;;  %v83_v13 = vpack.c.bf16 %v39_v9, %v38_v8  ;;  %71 = vmatpush.bf16.msra.mxu0 %v292_v3 }
   0x7   :  { %110 = vmatpush.bf16.msra.mxu1 %v294_v4  ;;  %v119_v14 = vpack.c.bf16 %v41_v11, %v40_v10  ;;  %v301_v15 = vld [vmem:[%s441_s6] ss:$0 sm:$0xff]  ;;  %v304_v31 = vpop.eup %303  ;;  %v299_v47 = vld [vmem:[%s443_s7 + $0x8] sm:$0xff] }
   0x8   :  { %146 = vmatpush.bf16.msra.mxu2 %v296_v5  ;;  %v162_v32 = vmul.f32 32.0, %v304_v31  ;;  %vm166_vm1 = vweird.f32 %v304_v31  ;;  %238 = vmatpush.bf16.msra.mxu3 %v299_v47  ;;  %v298_v48 = vld [vmem:[%s443_s7] sm:$0xff] }
   0x9   :  { %264 = vmatmul.msk.bf16.vlgmr.msra.gmra.mxu0 %vm60_vm0, %v43_v12  ;;  %v302_v10 = vld [vmem:[%s442_s8] ss:$0 sm:$0xff] }
   0xa   :  { %273 = vmatmul.msk.bf16.vlgmr.msra.gmra.mxu1 %vm60_vm0, %v83_v13  ;;  %v163_v33 = vsub.f32 1.0, %v162_v32  ;;  %v246_v12 = vld [vmem:[%s444_s9] sm:$0xff] }
   0xb   :  { %282 = vmatmul.msk.bf16.vlgmr.msra.gmra.mxu2 %vm60_vm0, %v119_v14 }
   0xc   :  { %v164_v34 = vmul.f32 %v304_v31, %v163_v33  ;;  %239 = vmatpush.bf16.msra.mxu3 %v298_v48 }
   0xe   :  { %v165_v35 = vadd.f32 %v304_v31, %v164_v34 }
  0x10   :  { %v167_v36 = vsel %vm166_vm1, %v304_v31, %v165_v35 }
  0x86   :  { %v73_v16 = vpop.f32.mrf.mxu0 }
  0x87   :  { %v81_v17 = vadd.f32 %v301_v15, %v73_v16  ;;  %v112_v18 = vpop.f32.mrf.mxu1  ;;  %v247_v16 = vld [vmem:[%s444_s9 + $0x8] sm:$0xff] }
  0x89   :  { %v117_v19 = vadd.f32 %v112_v18, %v81_v17 }
  0x8e   :  { %v148_v20 = vpop.f32.mrf.mxu2  ;;  %v75_v22 = vpop.f32.mrf.mxu0 }
  0x8f   :  { %v153_v21 = vadd.f32 %v148_v20, %v117_v19  ;;  %v82_v23 = vadd.f32 %v301_v15, %v75_v22  ;;  %v114_v25 = vpop.f32.mrf.mxu1 }
  0x91   :  { %v155_v24 = vsel %vm60_vm0, %v153_v21, 0.0  ;;  %v118_v26 = vadd.f32 %v114_v25, %v82_v23 }
  0x92   :  { %156 = vadd.xlane.f32.xlu0 %v155_v24 }
  0x96   :  { %v150_v27 = vpop.f32.mrf.mxu2 }
  0x97   :  { %v154_v28 = vadd.f32 %v150_v27, %v118_v26 }
  0x99   :  { %v158_v29 = vsel %vm60_vm0, %v154_v28, 0.0 }
  0x9a   :  { %159 = vadd.xlane.f32.xlu0 %v158_v29 }
 0x105   :  { %v157_v37 = vpop.xlane.xlu0 %156 }
 0x106   :  { %v168_v38 = vmul.f32 %v167_v36, %v157_v37 }
 0x108   :  { %v170_v39 = vsub.f32 %v153_v21, %v168_v38 }
 0x10a   :  { %v172_v40 = vmul.f32 %v170_v39, %v170_v39 }
 0x10c   :  { %v174_v41 = vsel %vm60_vm0, %v172_v40, 0.0 }
 0x10d   :  { %175 = vadd.xlane.f32.xlu1 %v174_v41  ;;  %v160_v42 = vpop.xlane.xlu0 %159 }
 0x10e   :  { %v169_v43 = vmul.f32 %v167_v36, %v160_v42 }
 0x110   :  { %v171_v44 = vsub.f32 %v154_v28, %v169_v43 }
 0x112   :  { %v173_v45 = vmul.f32 %v171_v44, %v171_v44 }
 0x114   :  { %v177_v46 = vsel %vm60_vm0, %v173_v45, 0.0 }
 0x115   :  { %178 = vadd.xlane.f32.xlu1 %v177_v46 }
 0x180   :  { %v176_v49 = vpop.xlane.xlu1 %175 }
 0x181   :  { %v180_v50 = vmul.f32 %v176_v49, %v167_v36 }
 0x183   :  { %v182_v51 = vadd.f32 1e-05, %v180_v50 }
 0x185   :  { %305 = vrsqrt.f32 %v182_v51  ;;  %vm190_vm3 = vweird.f32 %v182_v51 }
 0x188   :  { %v179_v52 = vpop.xlane.xlu1 %178 }
 0x189   :  { %v181_v53 = vmul.f32 %v179_v52, %v167_v36 }
 0x18b   :  { %v306_v54 = vpop.eup %305  ;;  %v183_v55 = vadd.f32 1e-05, %v181_v53 }
 0x18c   :  { %v185_v56 = vmul.f32 %v306_v54, %v182_v51  ;;  %vm191_vm2 = vweird.f32 %v306_v54 }
 0x18d   :  { %307 = vrsqrt.f32 %v183_v55  ;;  %vm192_vm4 = vmor %vm190_vm3, %vm191_vm2  ;;  %vm200_vm6 = vweird.f32 %v183_v55 }
 0x18e   :  { %v186_v57 = vmul.f32 %v306_v54, %v185_v56 }
 0x190   :  { %v187_v58 = vmul.f32 0.5, %v186_v57 }
 0x192   :  { %v188_v59 = vsub.f32 1.5, %v187_v58 }
 0x193   :  { %v308_v60 = vpop.eup %307 }
 0x194   :  { %v195_v61 = vmul.f32 %v308_v60, %v183_v55  ;;  %v189_v62 = vmul.f32 %v306_v54, %v188_v59  ;;  %vm201_vm5 = vweird.f32 %v308_v60 }
 0x195   :  { %vm202_vm7 = vmor %vm200_vm6, %vm201_vm5 }
 0x196   :  { %v196_v63 = vmul.f32 %v308_v60, %v195_v61  ;;  %v193_v2 = vsel %vm192_vm4, %v306_v54, %v189_v62 }
 0x197   :  { %v204_v4 = vmul.f32 %v193_v2, %v170_v39 }
 0x198   :  { %v197_v0 = vmul.f32 0.5, %v196_v63 }
 0x199   :  { %v206_v7 = vmax.f32 %v204_v4, 0.0 }
 0x19a   :  { %v198_v1 = vsub.f32 1.5, %v197_v0 }
 0x19c   :  { %v199_v3 = vmul.f32 %v308_v60, %v198_v1 }
 0x19e   :  { %v203_v5 = vsel %vm202_vm7, %v308_v60, %v199_v3 }
 0x19f   :  { %v205_v6 = vmul.f32 %v203_v5, %v171_v44 }
 0x1a1   :  { %v207_v8 = vmax.f32 %v205_v6, 0.0 }
 0x1a3   :  { %v208_v9 = vpack.c.bf16 %v207_v8, %v206_v7 }
 0x1a5   :  { %291 = vmatmul.msk.bf16.vlgmr.msra.gmra.mxu3 %vm60_vm0, %v208_v9 }
 0x228   :  { %v241_v11 = vpop.f32.mrf.mxu3 }
 0x229   :  { %v242_v13 = vadd.f32 %v302_v10, %v241_v11 }
 0x22b   :  { %v248_v14 = vadd.f32 %v246_v12, %v242_v13 }
 0x22d   :  { %250 = vst.msk [vmem:[%s445_s10] sm:$0xff] %vm60_vm0, %v248_v14 }
 0x230   :  { %v243_v15 = vpop.f32.mrf.mxu3 }
 0x231   :  { %v244_v17 = vadd.f32 %v302_v10, %v243_v15 }
 0x233   :  { %v249_v18 = vadd.f32 %v247_v16, %v244_v17 }
 0x235   :  { %251 = vst.msk [vmem:[%s445_s10 + $0x8] sm:$0xff] %vm60_vm0, %v249_v18 }

// kernel: egem_forward.15
= control target key start
LH: loop header
LB: loop body
LE: loop exit
PB: predicated region body
PF: predicated region fallthrough
CT: control target
= control target key end

     0   :  { %s1344_s3 = smov 8   ;;  %s1345_s7 = smov 1   ;;  %vm439_vm0 = vcmask 1043456   ;;  %vm432_vm1 = vcmask 64512   ;;  %vm156_vm2 = vcmask 130048   ;;  %vm187_vm3 = vcmask 261120   ;;  %s1715_s0 = inlined_call_operand.smem [shape: u32[36], index: -1, kind: input, shape index: {}] }
   0x1   :  { %s1105_s6 = sld [smem:[%s1715_s0 + %s1344_s3]]   ;;  %s1346_s11 = smov 7   ;;  %v1354_v57 = vmov 32.0  }
   0x2   :  { %s1098_s10 = sld [smem:[%s1715_s0 + %s1345_s7]]   ;;  %s1347_s18 = smov 13   ;;  %1306 = vrcp.f32 %v1354_v57 }
   0x3   :  { %s1104_s14 = sld [smem:[%s1715_s0 + %s1346_s11]]   ;;  %s1348_s22 = smov 2  }
   0x4   :  { %s1_s17 = sld [smem:[%s1715_s0]]   ;;  %s1349_s26 = smov 9  }
   0x5   :  { %s1110_s21 = sld [smem:[%s1715_s0 + %s1347_s18]]   ;;  %s1350_s30 = smov 12  }
   0x6   :  { %s1404_s25 = sld [smem:[%s1715_s0 + %s1348_s22]]   ;;  %s1351_s4 = smov 14  }
   0x7   :  { %v431_v0 = vld [vmem:[%s1105_s6] sm:$0xf]  ;;  %s1412_s29 = sld [smem:[%s1715_s0 + %s1349_s26]]   ;;  %s1352_s8 = smov 10  }
   0x8   :  { %v441_v1 = vsel %vm439_vm0, %v431_v0, 0  ;;  %v1233_v2 = vld [vmem:[%s1098_s10] sm:$0xff]  ;;  %s1109_s3 = sld [smem:[%s1715_s0 + %s1350_s30]]   ;;  %s1353_s12 = smov 11   ;;  %v1307_v58 = vpop.eup %1306 }
   0x9   :  { %450 = vmatpush.bf16.msra.mxu3 %v441_v1  ;;  %v425_v3 = vld [vmem:[%s1104_s14] sm:$0xff]  ;;  %v426_v4 = vld [vmem:[%s1104_s14 + $0x8] sm:$0xff]  ;;  %170 = vmatpush.bf16.msra.mxu0 %v1233_v2  ;;  %v427_v11 = vld [vmem:[%s1104_s14 + $0x10] sm:$0xff]  ;;  %s1421_s7 = sld [smem:[%s1715_s0 + %s1351_s4]]   ;;  %v198_v59 = vmul.f32 32.0, %v1307_v58  ;;  %vm202_vm4 = vweird.f32 %v1307_v58  ;;  %s1355_s16 = smov 4  }
   0xa   :  { %v429_v5 = vpack.c.bf16 %v426_v4, %v425_v3  ;;  %v142_v6 = vld [vmem:[%s1_s17] sm:$0xff]  ;;  %v143_v7 = vld [vmem:[%s1_s17 + $0x8] sm:$0xff]  ;;  %v144_v12 = vld [vmem:[%s1_s17 + $0x10] sm:$0xff]  ;;  %v430_v13 = vpack.c.bf16 %v427_v11, %v427_v11  ;;  %s1107_s11 = sld [smem:[%s1715_s0 + %s1352_s8]]   ;;  %s1356_s20 = smov 3  }
   0xb   :  { %v146_v8 = vpack.c.bf16 %v143_v7, %v142_v6  ;;  %v528_v9 = vld [vmem:[%s1110_s21] sm:$0xf]  ;;  %v147_v14 = vpack.c.bf16 %v144_v12, %v144_v12  ;;  %s1435_s15 = sld [smem:[%s1715_s0 + %s1353_s12]]   ;;  %v199_v60 = vsub.f32 1.0, %v198_v59  ;;  %s1357_s24 = smov 15  }
   0xc   :  { %1159 = vmatmul.msk.bf16.vlgmr.msra.gmra.mxu3 %vm432_vm1, %v429_v5  ;;  %v536_v10 = vsel %vm439_vm0, %v528_v9, 0  ;;  %v1292_v22 = vld [vmem:[%s1404_s25] ss:$0 sm:$0xff]  ;;  %s1491_s19 = sld [smem:[%s1715_s0 + %s1355_s16]]   ;;  %s1358_s28 = smov 16  }
   0xd   :  { %1137 = vmatmul.msk.bf16.vlgmr.msra.gmra.mxu0 %vm156_vm2, %v146_v8  ;;  %545 = vmatpush.bf16.msrb.mxu3 %v536_v10  ;;  %v1293_v27 = vld [vmem:[%s1412_s29] ss:$0 sm:$0xff]  ;;  %v200_v61 = vmul.f32 %v1307_v58, %v199_v60  ;;  %s1100_s23 = sld [smem:[%s1715_s0 + %s1356_s20]]   ;;  %s1359_s2 = smov 25  }
   0xe   :  { %v522_v15 = vld [vmem:[%s1109_s3] sm:$0xff]  ;;  %v523_v16 = vld [vmem:[%s1109_s3 + $0x8] sm:$0xff]  ;;  %v524_v18 = vld [vmem:[%s1109_s3 + $0x10] sm:$0xff]  ;;  %s1112_s27 = sld [smem:[%s1715_s0 + %s1357_s24]]   ;;  %s1360_s6 = smov 20  }
   0xf   :  { %v526_v17 = vpack.c.bf16 %v523_v16, %v522_v15  ;;  %v527_v19 = vpack.c.bf16 %v524_v18, %v524_v18  ;;  %v1294_v46 = vld [vmem:[%s1421_s7] ss:$0 sm:$0xff]  ;;  %v201_v62 = vadd.f32 %v1307_v58, %v200_v61  ;;  %s1513_s1 = sld [smem:[%s1715_s0 + %s1358_s28]]   ;;  %s1362_s10 = smov 19  }
  0x10   :  { %v1239_v20 = vld [vmem:[%s1107_s11 + $0x8] sm:$0xff]  ;;  %v1238_v21 = vld [vmem:[%s1107_s11] sm:$0xff]  ;;  %s1543_s5 = sld [smem:[%s1715_s0 + %s1359_s2]]   ;;  %s1363_s14 = smov 24  }
  0x11   :  { %504 = vmatpush.bf16.msrb.mxu0 %v1239_v20  ;;  %v1444_v63 = vsel %vm202_vm4, %v1307_v58, %v201_v62  ;;  %s1117_s9 = sld [smem:[%s1715_s0 + %s1360_s6]]   ;;  %s1368_s6 = smov 6  }
  0x12   :  { %s1554_s13 = sld [smem:[%s1715_s0 + %s1362_s10]]   ;;  %s1369_s10 = smov 17  }
  0x13   :  { %s1569_s18 = sld [smem:[%s1715_s0 + %s1363_s14]]   ;;  %s1370_s14 = smov 22  }
  0x14   :  { %s1374_s2 = smov 23   ;;  %s1379_s21 = smov 34  }
  0x15   :  { %505 = vmatpush.bf16.msrb.mxu0 %v1238_v21  ;;  %s1131_s24 = sld [smem:[%s1715_s0 + %s1379_s21]]   ;;  %s1380_s25 = smov 35  }
  0x16   :  { %s1132_s28 = sld [smem:[%s1715_s0 + %s1380_s25]]  }
  0x1c   :  { %1160 = vmatmul.msk.bf16.gmra.mxu3 %vm432_vm1, %v430_v13 }
  0x1d   :  { %1138 = vmatmul.msk.bf16.gmra.mxu0 %vm156_vm2, %v147_v14 }
  0x2c   :  { %1171 = vmatmul.msk.bf16.vlgmr.msrb.gmra.mxu3 %vm432_vm1, %v526_v17 }
  0x3c   :  { %1172 = vmatmul.msk.bf16.gmra.mxu3 %vm432_vm1, %v527_v19 }
  0x8a   :  { %v172_v23 = vpop.f32.mrf.mxu0 }
  0x8b   :  { %v184_v24 = vadd.f32 %v1292_v22, %v172_v23 }
  0x8d   :  { %v188_v25 = vsel %vm187_vm3, %v184_v24, 0.0 }
  0x8e   :  { %189 = vadd.xlane.f32.xlu0 %v188_v25 }
  0x8f   :  { %v452_v26 = vpop.f32.mrf.mxu3 }
  0x90   :  { %v464_v30 = vadd.f32 %v1293_v27, %v452_v26 }
  0x92   :  { %v174_v28 = vpop.f32.mrf.mxu0  ;;  %v467_v33 = vmax.f32 %v464_v30, 0.0 }
  0x93   :  { %v185_v29 = vadd.f32 %v1292_v22, %v174_v28 }
  0x95   :  { %v191_v31 = vsel %vm187_vm3, %v185_v29, 0.0 }
  0x96   :  { %192 = vadd.xlane.f32.xlu0 %v191_v31 }
  0x97   :  { %v454_v32 = vpop.f32.mrf.mxu3 }
  0x98   :  { %v465_v34 = vadd.f32 %v1293_v27, %v454_v32 }
  0x9a   :  { %v468_v35 = vmax.f32 %v465_v34, 0.0  ;;  %v177_v36 = vpop.f32.mrf.mxu0  ;;  %v1235_v34 = vld [vmem:[%s1100_s23 + $0x8] sm:$0xff] }
  0x9b   :  { %v186_v37 = vadd.f32 %v1292_v22, %v177_v36  ;;  %298 = vmatpush.bf16.msra.mxu1 %v1235_v34  ;;  %v1234_v36 = vld [vmem:[%s1100_s23] sm:$0xff]  ;;  %s1365_s23 = smov 28  }
  0x9c   :  { %v470_v38 = vpack.c.bf16 %v468_v35, %v467_v33  ;;  %s1125_s26 = sld [smem:[%s1715_s0 + %s1365_s23]]   ;;  %s1372_s23 = smov 30  }
  0x9d   :  { %v194_v39 = vsel %vm187_vm3, %v186_v37, 0.0 }
  0x9e   :  { %195 = vadd.xlane.f32.xlu1 %v194_v39  ;;  %1169 = vmatmul.msk.bf16.vlgmr.msrb.gmra.mxu0 %vm187_vm3, %v470_v38 }
  0x9f   :  { %v457_v40 = vpop.f32.mrf.mxu3  ;;  %299 = vmatpush.bf16.msra.mxu1 %v1234_v36 }
  0xa0   :  { %v466_v41 = vadd.f32 %v1293_v27, %v457_v40 }
  0xa2   :  { %v179_v42 = vpop.f32.mrf.mxu0  ;;  %v469_v43 = vmax.f32 %v466_v41, 0.0 }
  0xa4   :  { %v471_v45 = vpack.c.bf16 %v469_v43, %v469_v43 }
  0xa7   :  { %v459_v44 = vpop.f32.mrf.mxu3 }
  0xae   :  { %1170 = vmatmul.msk.bf16.gmra.mxu0 %vm187_vm3, %v471_v45 }
  0xaf   :  { %v547_v47 = vpop.f32.mrf.mxu3 }
  0xb0   :  { %v559_v48 = vadd.f32 %v1294_v46, %v547_v47 }
  0xb2   :  { %v562_v49 = vsel %vm187_vm3, %v559_v48, 0.0 }
  0xb3   :  { %563 = vadd.xlane.f32.xlu1 %v562_v49 }
  0xb7   :  { %v549_v50 = vpop.f32.mrf.mxu3 }
  0xb8   :  { %v560_v51 = vadd.f32 %v1294_v46, %v549_v50 }
  0xba   :  { %v565_v52 = vsel %vm187_vm3, %v560_v51, 0.0 }
  0xbb   :  { %566 = vadd.xlane.f32.xlu2 %v565_v52 }
  0xbf   :  { %v552_v53 = vpop.f32.mrf.mxu3 }
  0xc0   :  { %v561_v54 = vadd.f32 %v1294_v46, %v552_v53 }
  0xc2   :  { %v568_v55 = vsel %vm187_vm3, %v561_v54, 0.0 }
  0xc3   :  { %569 = vadd.xlane.f32.xlu1 %v568_v55 }
  0xc7   :  { %v554_v56 = vpop.f32.mrf.mxu3 }
 0x101   :  { %v190_v0 = vpop.xlane.xlu0 %189 }
 0x102   :  { %v204_v1 = vmul.f32 %v1444_v63, %v190_v0 }
 0x104   :  { %v1447_v2 = vsub.f32 %v184_v24, %v204_v1 }
 0x106   :  { %v210_v3 = vmul.f32 %v1447_v2, %v1447_v2 }
 0x108   :  { %v213_v4 = vsel %vm187_vm3, %v210_v3, 0.0 }
 0x109   :  { %214 = vadd.xlane.f32.xlu2 %v213_v4  ;;  %v193_v5 = vpop.xlane.xlu0 %192 }
 0x10a   :  { %v205_v6 = vmul.f32 %v1444_v63, %v193_v5 }
 0x10c   :  { %v1453_v7 = vsub.f32 %v185_v29, %v205_v6  ;;  %v1241_v6 = vld [vmem:[%s1112_s27 + $0x8] sm:$0xff] }
 0x10d   :  { %665 = vmatpush.bf16.msrb.mxu1 %v1241_v6 }
 0x10e   :  { %v211_v8 = vmul.f32 %v1453_v7, %v1453_v7 }
 0x110   :  { %v216_v9 = vsel %vm187_vm3, %v211_v8, 0.0 }
 0x111   :  { %217 = vadd.xlane.f32.xlu0 %v216_v9  ;;  %v196_v10 = vpop.xlane.xlu1 %195 }
 0x112   :  { %v206_v11 = vmul.f32 %v1444_v63, %v196_v10 }
 0x114   :  { %v1459_v12 = vsub.f32 %v186_v37, %v206_v11 }
 0x116   :  { %v212_v13 = vmul.f32 %v1459_v12, %v1459_v12 }
 0x118   :  { %v219_v14 = vsel %vm187_vm3, %v212_v13, 0.0 }
 0x119   :  { %220 = vadd.xlane.f32.xlu2 %v219_v14 }
 0x11b   :  { %v1464_v15 = vpop.f32.mrf.mxu0 }
 0x123   :  { %v1466_v16 = vpop.f32.mrf.mxu0 }
 0x126   :  { %v564_v17 = vpop.xlane.xlu1 %563 }
 0x127   :  { %v571_v18 = vmul.f32 %v564_v17, %v1444_v63 }
 0x129   :  { %v1469_v19 = vsub.f32 %v559_v48, %v571_v18 }
 0x12b   :  { %v577_v20 = vmul.f32 %v1469_v19, %v1469_v19  ;;  %v1473_v21 = vpop.f32.mrf.mxu0 }
 0x12d   :  { %v580_v22 = vsel %vm187_vm3, %v577_v20, 0.0 }
 0x12e   :  { %v567_v23 = vpop.xlane.xlu2 %566  ;;  %581 = vadd.xlane.f32.xlu0 %v580_v22 }
 0x12f   :  { %v572_v24 = vmul.f32 %v567_v23, %v1444_v63 }
 0x131   :  { %v1477_v25 = vsub.f32 %v560_v51, %v572_v24 }
 0x133   :  { %v578_v26 = vmul.f32 %v1477_v25, %v1477_v25  ;;  %v514_v27 = vpop.f32.mrf.mxu0 }
 0x135   :  { %v583_v28 = vsel %vm187_vm3, %v578_v26, 0.0 }
 0x136   :  { %584 = vadd.xlane.f32.xlu1 %v583_v28  ;;  %v570_v29 = vpop.xlane.xlu1 %569 }
 0x137   :  { %v573_v30 = vmul.f32 %v570_v29, %v1444_v63 }
 0x139   :  { %v1483_v31 = vsub.f32 %v561_v54, %v573_v30 }
 0x13b   :  { %v579_v32 = vmul.f32 %v1483_v31, %v1483_v31 }
 0x13d   :  { %v586_v33 = vsel %vm187_vm3, %v579_v32, 0.0 }
 0x13e   :  { %587 = vadd.xlane.f32.xlu2 %v586_v33 }
 0x17c   :  { %v215_v35 = vpop.xlane.xlu2 %214 }
 0x17d   :  { %v222_v37 = vmul.f32 %v215_v35, %v1444_v63 }
 0x17f   :  { %v225_v38 = vadd.f32 1e-05, %v222_v37 }
 0x181   :  { %1308 = vrsqrt.f32 %v225_v38  ;;  %vm234_vm6 = vweird.f32 %v225_v38 }
 0x184   :  { %v218_v39 = vpop.xlane.xlu0 %217 }
 0x185   :  { %v223_v40 = vmul.f32 %v218_v39, %v1444_v63 }
 0x187   :  { %v1309_v41 = vpop.eup %1308  ;;  %v226_v42 = vadd.f32 1e-05, %v223_v40 }
 0x188   :  { %v229_v43 = vmul.f32 %v1309_v41, %v225_v38  ;;  %vm235_vm5 = vweird.f32 %v1309_v41 }
 0x189   :  { %1310 = vrsqrt.f32 %v226_v42  ;;  %vm236_vm7 = vmor %vm234_vm6, %vm235_vm5  ;;  %vm244_vm9 = vweird.f32 %v226_v42 }
 0x18a   :  { %v230_v44 = vmul.f32 %v1309_v41, %v229_v43 }
 0x18c   :  { %v231_v45 = vmul.f32 0.5, %v230_v44  ;;  %v221_v46 = vpop.xlane.xlu2 %220 }
 0x18d   :  { %v224_v47 = vmul.f32 %v221_v46, %v1444_v63 }
 0x18e   :  { %v232_v48 = vsub.f32 1.5, %v231_v45 }
 0x18f   :  { %v1311_v49 = vpop.eup %1310  ;;  %v227_v50 = vadd.f32 1e-05, %v224_v47 }
 0x190   :  { %v239_v51 = vmul.f32 %v1311_v49, %v226_v42  ;;  %v233_v52 = vmul.f32 %v1309_v41, %v232_v48  ;;  %vm245_vm8 = vweird.f32 %v1311_v49 }
 0x191   :  { %1312 = vrsqrt.f32 %v227_v50  ;;  %vm246_vm10 = vmor %vm244_vm9, %vm245_vm8  ;;  %vm254_vm12 = vweird.f32 %v227_v50 }
 0x192   :  { %v240_v53 = vmul.f32 %v1311_v49, %v239_v51  ;;  %v237_v56 = vsel %vm236_vm7, %v1309_v41, %v233_v52 }
 0x193   :  { %v258_v60 = vmul.f32 %v237_v56, %v1447_v2  ;;  %v1240_v2 = vld [vmem:[%s1112_s27] sm:$0xff]  ;;  %s1366_s27 = smov 29  }
 0x194   :  { %v241_v54 = vmul.f32 0.5, %v240_v53  ;;  %666 = vmatpush.bf16.msrb.mxu1 %v1240_v2  ;;  %s1604_s30 = sld [smem:[%s1715_s0 + %s1366_s27]]   ;;  %s1373_s27 = smov 18  }
 0x195   :  { %v261_v3 = vmax.f32 %v258_v60, 0.0 }
 0x196   :  { %v242_v55 = vsub.f32 1.5, %v241_v54 }
 0x197   :  { %v1313_v57 = vpop.eup %1312 }
 0x198   :  { %v243_v58 = vmul.f32 %v1311_v49, %v242_v55  ;;  %v249_v59 = vmul.f32 %v1313_v57, %v227_v50  ;;  %vm255_vm11 = vweird.f32 %v1313_v57 }
 0x199   :  { %vm256_vm13 = vmor %vm254_vm12, %vm255_vm11 }
 0x19a   :  { %v250_v61 = vmul.f32 %v1313_v57, %v249_v59  ;;  %v247_v62 = vsel %vm246_vm10, %v1311_v49, %v243_v58 }
 0x19b   :  { %v259_v0 = vmul.f32 %v247_v62, %v1453_v7 }
 0x19c   :  { %v251_v1 = vmul.f32 0.5, %v250_v61 }
 0x19d   :  { %v262_v4 = vmax.f32 %v259_v0, 0.0 }
 0x19e   :  { %v252_v5 = vsub.f32 1.5, %v251_v1 }
 0x19f   :  { %v264_v8 = vpack.c.bf16 %v262_v4, %v261_v3  ;;  %v1297_v3 = vld [vmem:[%s1513_s1] ss:$0 sm:$0xff]  ;;  %s1367_s1 = smov 5  }
 0x1a0   :  { %v253_v9 = vmul.f32 %v1313_v57, %v252_v5  ;;  %s1102_s4 = sld [smem:[%s1715_s0 + %s1367_s1]]  }
 0x1a1   :  { %1147 = vmatmul.msk.bf16.vlgmr.msra.gmra.mxu1 %vm187_vm3, %v264_v8  ;;  %v582_v10 = vpop.xlane.xlu0 %581  ;;  %s1649_s1 = sld [smem:[%s1715_s0 + %s1373_s27]]  }
 0x1a2   :  { %v589_v11 = vmul.f32 %v582_v10, %v1444_v63  ;;  %v257_v14 = vsel %vm256_vm13, %v1313_v57, %v253_v9 }
 0x1a3   :  { %v260_v7 = vmul.f32 %v257_v14, %v1459_v12 }
 0x1a4   :  { %v592_v13 = vadd.f32 1e-05, %v589_v11 }
 0x1a5   :  { %v263_v20 = vmax.f32 %v260_v7, 0.0 }
 0x1a6   :  { %1314 = vrsqrt.f32 %v592_v13  ;;  %vm601_vm15 = vweird.f32 %v592_v13 }
 0x1a7   :  { %v265_v27 = vpack.c.bf16 %v263_v20, %v263_v20 }
 0x1a9   :  { %v585_v17 = vpop.xlane.xlu1 %584 }
 0x1aa   :  { %v590_v18 = vmul.f32 %v585_v17, %v1444_v63 }
 0x1ac   :  { %v1315_v22 = vpop.eup %1314  ;;  %v593_v23 = vadd.f32 1e-05, %v590_v18 }
 0x1ad   :  { %v596_v24 = vmul.f32 %v1315_v22, %v592_v13  ;;  %vm602_vm14 = vweird.f32 %v1315_v22 }
 0x1ae   :  { %1316 = vrsqrt.f32 %v593_v23  ;;  %vm603_vm2 = vmor %vm601_vm15, %vm602_vm14  ;;  %vm611_vm5 = vweird.f32 %v593_v23 }
 0x1af   :  { %v597_v26 = vmul.f32 %v1315_v22, %v596_v24 }
 0x1b1   :  { %v598_v28 = vmul.f32 0.5, %v597_v26  ;;  %1148 = vmatmul.msk.bf16.gmra.mxu1 %vm187_vm3, %v265_v27  ;;  %v588_v29 = vpop.xlane.xlu2 %587 }
 0x1b2   :  { %v591_v30 = vmul.f32 %v588_v29, %v1444_v63  ;;  %v1361_v29 = vmov 0  }
 0x1b3   :  { %v599_v32 = vsub.f32 1.5, %v598_v28  ;;  %1291 = vset.pattern.permute.xlu2 %v1361_v29  ;;  %1290 = vset.pattern.permute.xlu1 %v1361_v29 }
 0x1b4   :  { %v1317_v33 = vpop.eup %1316  ;;  %v594_v34 = vadd.f32 1e-05, %v591_v30  ;;  %1289 = vset.pattern.permute.xlu0 %v1361_v29 }
 0x1b5   :  { %v606_v12 = vmul.f32 %v1317_v33, %v593_v23  ;;  %v600_v35 = vmul.f32 %v1315_v22, %v599_v32  ;;  %vm612_vm4 = vweird.f32 %v1317_v33 }
 0x1b6   :  { %1318 = vrsqrt.f32 %v594_v34  ;;  %vm613_vm6 = vmor %vm611_vm5, %vm612_vm4  ;;  %vm621_vm8 = vweird.f32 %v594_v34 }
 0x1b7   :  { %v607_v36 = vmul.f32 %v1317_v33, %v606_v12  ;;  %v604_v38 = vsel %vm603_vm2, %v1315_v22, %v600_v35  ;;  %v798_v12 = vld [vmem:[%s1117_s9] sm:$0xf]  ;;  %s1616_s9 = sld [smem:[%s1715_s0 + %s1368_s6]]  }
 0x1b8   :  { %v625_v43 = vmul.f32 %v604_v38, %v1469_v19  ;;  %v806_v35 = vsel %vm439_vm0, %v798_v12, 0  ;;  %v793_v38 = vld [vmem:[%s1554_s13 + $0x8] sm:$0xff]  ;;  %s1656_s6 = sld [smem:[%s1715_s0 + %s1374_s2]]  }
 0x1b9   :  { %v608_v37 = vmul.f32 0.5, %v607_v36  ;;  %815 = vmatpush.bf16.msra.mxu0 %v806_v35 }
 0x1ba   :  { %v628_v48 = vmax.f32 %v625_v43, 0.0 }
 0x1bb   :  { %v609_v39 = vsub.f32 1.5, %v608_v37  ;;  %v792_v37 = vld [vmem:[%s1554_s13] sm:$0xff] }
 0x1bc   :  { %v1319_v40 = vpop.eup %1318 }
 0x1bd   :  { %v610_v41 = vmul.f32 %v1317_v33, %v609_v39  ;;  %v616_v42 = vmul.f32 %v1319_v40, %v594_v34  ;;  %vm622_vm7 = vweird.f32 %v1319_v40  ;;  %v796_v39 = vpack.c.bf16 %v793_v38, %v792_v37 }
 0x1be   :  { %vm623_vm9 = vmor %vm621_vm8, %vm622_vm7 }
 0x1bf   :  { %v614_v44 = vsel %vm613_vm6, %v1317_v33, %v610_v41  ;;  %v617_v45 = vmul.f32 %v1319_v40, %v616_v42  ;;  %1193 = vmatmul.msk.bf16.vlgmr.msra.gmra.mxu0 %vm432_vm1, %v796_v39 }
 0x1c0   :  { %v626_v46 = vmul.f32 %v614_v44, %v1477_v25  ;;  %v1296_v25 = vld [vmem:[%s1491_s19] ss:$0 sm:$0xff]  ;;  %s1364_s19 = smov 21  }
 0x1c1   :  { %v618_v47 = vmul.f32 0.5, %v617_v45  ;;  %s1587_s22 = sld [smem:[%s1715_s0 + %s1364_s19]]   ;;  %s1371_s19 = smov 26  }
 0x1c2   :  { %v629_v49 = vmax.f32 %v626_v46, 0.0  ;;  %v887_v46 = vld [vmem:[%s1569_s18] sm:$0xff] }
 0x1c3   :  { %v619_v50 = vsub.f32 1.5, %v618_v47 }
 0x1c4   :  { %v631_v51 = vpack.c.bf16 %v629_v49, %v628_v48 }
 0x1c5   :  { %v620_v52 = vmul.f32 %v1319_v40, %v619_v50 }
 0x1c6   :  { %1181 = vmatmul.msk.bf16.vlgmr.msrb.gmra.mxu1 %vm187_vm3, %v631_v51  ;;  %v794_v51 = vld [vmem:[%s1554_s13 + $0x10] sm:$0xff]  ;;  %s1114_s13 = sld [smem:[%s1715_s0 + %s1369_s10]]  }
 0x1c7   :  { %v624_v53 = vsel %vm623_vm9, %v1319_v40, %v620_v52  ;;  %v797_v52 = vpack.c.bf16 %v794_v51, %v794_v51 }
 0x1c8   :  { %v627_v19 = vmul.f32 %v624_v53, %v1483_v31 }
 0x1ca   :  { %v630_v54 = vmax.f32 %v627_v19, 0.0  ;;  %v977_v19 = vld [vmem:[%s1125_s26 + $0x8] sm:$0xff] }
 0x1cc   :  { %v632_v55 = vpack.c.bf16 %v630_v54, %v630_v54 }
 0x1cf   :  { %1194 = vmatmul.msk.bf16.gmra.mxu0 %vm432_vm1, %v797_v52 }
 0x1d6   :  { %1182 = vmatmul.msk.bf16.gmra.mxu1 %vm187_vm3, %v632_v55 }
 0x21e   :  { %v301_v56 = vpop.f32.mrf.mxu1 }
 0x21f   :  { %v302_v57 = vadd.f32 %v1296_v25, %v301_v56  ;;  %v978_v56 = vld [vmem:[%s1125_s26 + $0x10] sm:$0xff] }
 0x221   :  { %v310_v58 = vsel %vm187_vm3, %v302_v57, 0.0 }
 0x222   :  { %311 = vadd.xlane.f32.xlu0 %v310_v58 }
 0x226   :  { %v303_v59 = vpop.f32.mrf.mxu1 }
 0x227   :  { %v304_v60 = vadd.f32 %v1296_v25, %v303_v59  ;;  %v888_v59 = vld [vmem:[%s1569_s18 + $0x8] sm:$0xff] }
 0x229   :  { %v313_v61 = vsel %vm187_vm3, %v304_v60, 0.0 }
 0x22a   :  { %314 = vadd.xlane.f32.xlu1 %v313_v61  ;;  %v1237_v61 = vld [vmem:[%s1102_s4 + $0x8] sm:$0xff] }
 0x22b   :  { %413 = vmatpush.bf16.msra.mxu2 %v1237_v61 }
 0x22e   :  { %v306_v62 = vpop.f32.mrf.mxu1 }
 0x22f   :  { %v307_v0 = vadd.f32 %v1296_v25, %v306_v62  ;;  %v976_v25 = vld [vmem:[%s1125_s26] sm:$0xff]  ;;  %s1644_s26 = sld [smem:[%s1715_s0 + %s1372_s23]]  }
 0x231   :  { %v316_v31 = vsel %vm187_vm3, %v307_v0, 0.0 }
 0x232   :  { %317 = vadd.xlane.f32.xlu2 %v316_v31 }
 0x236   :  { %v308_v1 = vpop.f32.mrf.mxu1 }
 0x243   :  { %v668_v4 = vpop.f32.mrf.mxu1 }
 0x244   :  { %v669_v5 = vadd.f32 %v1297_v3, %v668_v4 }
 0x246   :  { %v677_v6 = vsel %vm187_vm3, %v669_v5, 0.0 }
 0x247   :  { %678 = vadd.xlane.f32.xlu0 %v677_v6 }
 0x24b   :  { %v670_v8 = vpop.f32.mrf.mxu1 }
 0x24c   :  { %v671_v9 = vadd.f32 %v1297_v3, %v670_v8 }
 0x24e   :  { %v680_v10 = vsel %vm187_vm3, %v671_v9, 0.0 }
 0x24f   :  { %681 = vadd.xlane.f32.xlu1 %v680_v10 }
 0x253   :  { %v673_v11 = vpop.f32.mrf.mxu1 }
 0x254   :  { %v1527_v2 = vadd.f32 %v1297_v3, %v673_v11 }
 0x256   :  { %v683_v13 = vsel %vm187_vm3, %v1527_v2, 0.0 }
 0x257   :  { %684 = vadd.xlane.f32.xlu1 %v683_v13 }
 0x25b   :  { %v675_v14 = vpop.f32.mrf.mxu1 }
 0x295   :  { %v312_v7 = vpop.xlane.xlu0 %311 }
 0x296   :  { %v319_v17 = vmul.f32 %v312_v7, %v1444_v63 }
 0x298   :  { %v1532_v18 = vsub.f32 %v302_v57, %v319_v17 }
 0x29a   :  { %v325_v20 = vmul.f32 %v1532_v18, %v1532_v18 }
 0x29c   :  { %v328_v22 = vsel %vm187_vm3, %v325_v20, 0.0 }
 0x29d   :  { %329 = vadd.xlane.f32.xlu2 %v328_v22  ;;  %v315_v23 = vpop.xlane.xlu1 %314 }
 0x29e   :  { %v320_v24 = vmul.f32 %v315_v23, %v1444_v63 }
 0x2a0   :  { %v1538_v26 = vsub.f32 %v304_v60, %v320_v24  ;;  %v889_v60 = vld [vmem:[%s1569_s18 + $0x10] sm:$0xff]  ;;  %s1119_s18 = sld [smem:[%s1715_s0 + %s1370_s14]]   ;;  %s1377_s14 = smov 32  }
 0x2a2   :  { %v326_v27 = vmul.f32 %v1538_v26, %v1538_v26 }
 0x2a4   :  { %v331_v28 = vsel %vm187_vm3, %v326_v27, 0.0 }
 0x2a5   :  { %v318_v30 = vpop.xlane.xlu2 %317  ;;  %332 = vadd.xlane.f32.xlu0 %v331_v28 }
 0x2a6   :  { %v321_v32 = vmul.f32 %v318_v30, %v1444_v63 }
 0x2a8   :  { %v1557_v33 = vsub.f32 %v307_v0, %v321_v32  ;;  %v1236_v0 = vld [vmem:[%s1102_s4] sm:$0xff]  ;;  %v817_v32 = vpop.f32.mrf.mxu0 }
 0x2a9   :  { %414 = vmatpush.bf16.msra.mxu2 %v1236_v0 }
 0x2aa   :  { %v327_v34 = vmul.f32 %v1557_v33, %v1557_v33 }
 0x2ac   :  { %v334_v36 = vsel %vm187_vm3, %v327_v34, 0.0 }
 0x2ad   :  { %335 = vadd.xlane.f32.xlu2 %v334_v36 }
 0x2ba   :  { %v679_v40 = vpop.xlane.xlu0 %678 }
 0x2bb   :  { %v686_v41 = vmul.f32 %v679_v40, %v1444_v63 }
 0x2bd   :  { %v1572_v42 = vsub.f32 %v669_v5, %v686_v41  ;;  %v1243_v41 = vld [vmem:[%s1114_s13 + $0x8] sm:$0xff] }
 0x2be   :  { %780 = vmatpush.bf16.msrb.mxu2 %v1243_v41 }
 0x2bf   :  { %v692_v43 = vmul.f32 %v1572_v42, %v1572_v42 }
 0x2c1   :  { %v695_v44 = vsel %vm187_vm3, %v692_v43, 0.0  ;;  %v1245_v43 = vld [vmem:[%s1119_s18 + $0x8] sm:$0xff] }
 0x2c2   :  { %696 = vadd.xlane.f32.xlu0 %v695_v44  ;;  %v682_v45 = vpop.xlane.xlu1 %681  ;;  %869 = vmatpush.bf16.msra.mxu3 %v1245_v43 }
 0x2c3   :  { %v687_v47 = vmul.f32 %v682_v45, %v1444_v63  ;;  %v1628_v45 = vld [vmem:[%s1587_s22] ss:$0 sm:$0xff]  ;;  %s1123_s22 = sld [smem:[%s1715_s0 + %s1371_s19]]  }
 0x2c5   :  { %v1579_v48 = vsub.f32 %v671_v9, %v687_v47  ;;  %893 = vperm.xlu2 %1291, %v887_v46   ;;  %v819_v47 = vpop.f32.mrf.mxu0 }
 0x2c6   :  { %v830_v51 = vadd.f32 %v1628_v45, %v819_v47 }
 0x2c7   :  { %v693_v49 = vmul.f32 %v1579_v48, %v1579_v48 }
 0x2c9   :  { %v698_v50 = vsel %vm187_vm3, %v693_v49, 0.0  ;;  %v1242_v49 = vld [vmem:[%s1114_s13] sm:$0xff] }
 0x2ca   :  { %699 = vadd.xlane.f32.xlu1 %v698_v50  ;;  %v685_v53 = vpop.xlane.xlu1 %684  ;;  %781 = vmatpush.bf16.msrb.mxu2 %v1242_v49 }
 0x2cb   :  { %v688_v54 = vmul.f32 %v685_v53, %v1444_v63 }
 0x2cd   :  { %v1596_v55 = vsub.f32 %v1527_v2, %v688_v54 }
 0x2cf   :  { %v694_v57 = vmul.f32 %v1596_v55, %v1596_v55 }
 0x2d1   :  { %v701_v58 = vsel %vm187_vm3, %v694_v57, 0.0 }
 0x2d6   :  { %982 = vperm.xlu0 %1289, %v976_v25  }
 0x2e3   :  { %987 = vperm.xlu1 %1290, %v977_v19   ;;  %v833_v19 = vmax.f32 %v830_v51, 0.0 }
 0x2eb   :  { %992 = vperm.xlu1 %1290, %v978_v56  }
 0x2ee   :  { %702 = vadd.xlane.f32.xlu2 %v701_v58 }
 0x306   :  { %898 = vperm.xlu2 %1291, %v888_v59  }
 0x30e   :  { %903 = vperm.xlu2 %1291, %v889_v60  }
 0x310   :  { %v330_v62 = vpop.xlane.xlu2 %329 }
 0x311   :  { %v337_v31 = vmul.f32 %v330_v62, %v1444_v63 }
 0x313   :  { %v340_v1 = vadd.f32 1e-05, %v337_v31 }
 0x315   :  { %1320 = vrsqrt.f32 %v340_v1  ;;  %vm349_vm1 = vweird.f32 %v340_v1 }
 0x318   :  { %v333_v3 = vpop.xlane.xlu0 %332 }
 0x319   :  { %v338_v4 = vmul.f32 %v333_v3, %v1444_v63 }
 0x31b   :  { %v1321_v5 = vpop.eup %1320  ;;  %v341_v6 = vadd.f32 1e-05, %v338_v4 }
 0x31c   :  { %v344_v8 = vmul.f32 %v1321_v5, %v340_v1  ;;  %vm350_vm0 = vweird.f32 %v1321_v5 }
 0x31d   :  { %1322 = vrsqrt.f32 %v341_v6  ;;  %vm351_vm10 = vmor %vm349_vm1, %vm350_vm0  ;;  %vm359_vm12 = vweird.f32 %v341_v6 }
 0x31e   :  { %v345_v9 = vmul.f32 %v1321_v5, %v344_v8 }
 0x320   :  { %v346_v10 = vmul.f32 0.5, %v345_v9  ;;  %v336_v11 = vpop.xlane.xlu2 %335 }
 0x321   :  { %v339_v2 = vmul.f32 %v336_v11, %v1444_v63 }
 0x322   :  { %v347_v13 = vsub.f32 1.5, %v346_v10 }
 0x323   :  { %v1323_v14 = vpop.eup %1322  ;;  %v342_v7 = vadd.f32 1e-05, %v339_v2 }
 0x324   :  { %v354_v17 = vmul.f32 %v1323_v14, %v341_v6  ;;  %v348_v20 = vmul.f32 %v1321_v5, %v347_v13  ;;  %vm360_vm11 = vweird.f32 %v1323_v14 }
 0x325   :  { %1324 = vrsqrt.f32 %v342_v7  ;;  %vm361_vm13 = vmor %vm359_vm12, %vm360_vm11  ;;  %vm369_vm15 = vweird.f32 %v342_v7  ;;  %vm1048_vm11 = vcmask 523264  }
 0x326   :  { %v355_v22 = vmul.f32 %v1323_v14, %v354_v17  ;;  %v352_v27 = vsel %vm351_vm10, %v1321_v5, %v348_v20 }
 0x327   :  { %v373_v34 = vmul.f32 %v352_v27, %v1532_v18  ;;  %v1244_v18 = vld [vmem:[%s1119_s18] sm:$0xff]  ;;  %s1129_s18 = sld [smem:[%s1715_s0 + %s1377_s14]]  }
 0x328   :  { %v356_v23 = vmul.f32 0.5, %v355_v22  ;;  %870 = vmatpush.bf16.msra.mxu3 %v1244_v18 }
 0x329   :  { %v376_v38 = vmax.f32 %v373_v34, 0.0  ;;  %v1298_v34 = vld [vmem:[%s1543_s5] ss:$0 sm:$0xff]  ;;  %s1375_s5 = smov 27  }
 0x32a   :  { %v357_v24 = vsub.f32 1.5, %v356_v23  ;;  %v1246_v23 = vld [vmem:[%s1123_s22] sm:$0xff]  ;;  %s1670_s10 = sld [smem:[%s1715_s0 + %s1375_s5]]  }
 0x32b   :  { %v1325_v28 = vpop.eup %1324 }
 0x32c   :  { %v358_v29 = vmul.f32 %v1323_v14, %v357_v24  ;;  %v364_v30 = vmul.f32 %v1325_v28, %v342_v7  ;;  %vm370_vm14 = vweird.f32 %v1325_v28  ;;  %v822_v24 = vpop.f32.mrf.mxu0 }
 0x32d   :  { %vm371_vm2 = vmor %vm369_vm15, %vm370_vm14  ;;  %v831_v27 = vadd.f32 %v1628_v45, %v822_v24 }
 0x32e   :  { %v365_v12 = vmul.f32 %v1325_v28, %v364_v30  ;;  %v362_v35 = vsel %vm361_vm13, %v1323_v14, %v358_v29  ;;  %v1247_v14 = vld [vmem:[%s1123_s22 + $0x8] sm:$0xff]  ;;  %v1250_v30 = vld [vmem:[%s1644_s26 + $0x10] sm:$0xff] }
 0x32f   :  { %v374_v36 = vmul.f32 %v362_v35, %v1538_v26  ;;  %v829_v26 = vadd.f32 %v1628_v45, %v817_v32  ;;  %955 = vmatpush.bf16.msra.mxu1 %v1247_v14  ;;  %v834_v29 = vmax.f32 %v831_v27, 0.0 }
 0x330   :  { %v366_v37 = vmul.f32 0.5, %v365_v12  ;;  %v1249_v12 = vld [vmem:[%s1644_s26 + $0x8] sm:$0xff] }
 0x331   :  { %v377_v39 = vmax.f32 %v374_v36, 0.0  ;;  %v832_v53 = vmax.f32 %v829_v26, 0.0  ;;  %v836_v32 = vpack.c.bf16 %v834_v29, %v834_v29  ;;  %v1301_v29 = vld [vmem:[%s1616_s9] ss:$0 sm:$0xff] }
 0x332   :  { %v367_v40 = vsub.f32 1.5, %v366_v37 }
 0x333   :  { %v379_v44 = vpack.c.bf16 %v377_v39, %v376_v38  ;;  %v835_v56 = vpack.c.bf16 %v833_v19, %v832_v53  ;;  %956 = vmatpush.bf16.msra.mxu1 %v1246_v23  ;;  %v1248_v39 = vld [vmem:[%s1644_s26] sm:$0xff] }
 0x334   :  { %v368_v46 = vmul.f32 %v1325_v28, %v367_v40  ;;  %v824_v35 = vpop.f32.mrf.mxu0 }
 0x335   :  { %1157 = vmatmul.msk.bf16.vlgmr.msra.gmra.mxu2 %vm187_vm3, %v379_v44  ;;  %v697_v50 = vpop.xlane.xlu0 %696  ;;  %1203 = vmatmul.msk.bf16.vlgmr.msra.gmra.mxu3 %vm187_vm3, %v835_v56 }
 0x336   :  { %v704_v52 = vmul.f32 %v697_v50, %v1444_v63  ;;  %v372_v25 = vsel %vm371_vm2, %v1325_v28, %v368_v46  ;;  %v894_v28 = vpop.permute.xlu2 %893  ;;  %v1300_v50 = vld [vmem:[%s1604_s30] ss:$0 sm:$0xff]  ;;  %s1376_s30 = smov 31  }
 0x337   :  { %v375_v57 = vmul.f32 %v372_v25, %v1557_v33  ;;  %v909_v36 = vsub.f32 %v894_v28, %v1298_v34  ;;  %s1679_s13 = sld [smem:[%s1715_s0 + %s1376_s30]]  }
 0x338   :  { %v707_v54 = vadd.f32 1e-05, %v704_v52 }
 0x339   :  { %v378_v60 = vmax.f32 %v375_v57, 0.0  ;;  %v912_v41 = vmul.f32 -10.0, %v909_v36 }
 0x33a   :  { %1326 = vrsqrt.f32 %v707_v54  ;;  %vm716_vm5 = vweird.f32 %v707_v54 }
 0x33b   :  { %v380_v1 = vpack.c.bf16 %v378_v60, %v378_v60  ;;  %v915_v43 = vmul.f32 %v912_v41, %v909_v36 }
 0x33d   :  { %v700_v58 = vpop.xlane.xlu1 %699  ;;  %v918_v49 = vmul.f32 1.442695, %v915_v43 }
 0x33e   :  { %v705_v59 = vmul.f32 %v700_v58, %v1444_v63 }
 0x340   :  { %v1327_v61 = vpop.eup %1326  ;;  %v708_v62 = vadd.f32 1e-05, %v705_v59 }
 0x341   :  { %v711_v0 = vmul.f32 %v1327_v61, %v707_v54  ;;  %vm717_vm4 = vweird.f32 %v1327_v61 }
 0x342   :  { %1328 = vrsqrt.f32 %v708_v62  ;;  %vm718_vm6 = vmor %vm716_vm5, %vm717_vm4  ;;  %vm726_vm8 = vweird.f32 %v708_v62 }
 0x343   :  { %v712_v31 = vmul.f32 %v1327_v61, %v711_v0 }
 0x345   :  { %v713_v3 = vmul.f32 0.5, %v712_v31  ;;  %1158 = vmatmul.msk.bf16.gmra.mxu2 %vm187_vm3, %v380_v1  ;;  %1204 = vmatmul.msk.bf16.gmra.mxu3 %vm187_vm3, %v836_v32 }
 0x347   :  { %v714_v4 = vsub.f32 1.5, %v713_v3 }
 0x348   :  { %v1329_v5 = vpop.eup %1328  ;;  %v983_v52 = vpop.permute.xlu0 %982 }
 0x349   :  { %v721_v6 = vmul.f32 %v1329_v5, %v708_v62  ;;  %v715_v33 = vmul.f32 %v1327_v61, %v714_v4  ;;  %vm727_vm7 = vweird.f32 %v1329_v5  ;;  %v998_v58 = vsub.f32 %v983_v52, %v1300_v50 }
 0x34a   :  { %vm728_vm9 = vmor %vm726_vm8, %vm727_vm7 }
 0x34b   :  { %v722_v8 = vmul.f32 %v1329_v5, %v721_v6  ;;  %v719_v10 = vsel %vm718_vm6, %v1327_v61, %v715_v33  ;;  %v1001_v0 = vmul.f32 -10.0, %v998_v58 }
 0x34c   :  { %v740_v13 = vmul.f32 %v719_v10, %v1572_v42 }
 0x34d   :  { %v723_v9 = vmul.f32 0.5, %v722_v8  ;;  %v1004_v8 = vmul.f32 %v1001_v0, %v998_v58 }
 0x34e   :  { %v743_v20 = vmax.f32 %v740_v13, 0.0 }
 0x34f   :  { %v724_v11 = vsub.f32 1.5, %v723_v9 }
 0x351   :  { %v725_v2 = vmul.f32 %v1329_v5, %v724_v11 }
 0x353   :  { %v729_v7 = vsel %vm728_vm9, %v1329_v5, %v725_v2  ;;  %v1007_v2 = vmul.f32 1.442695, %v1004_v8 }
 0x354   :  { %v741_v17 = vmul.f32 %v729_v7, %v1579_v48  ;;  %v1251_v48 = vld [vmem:[%s1644_s26 + $0x18] sm:$0xff] }
 0x355   :  { %1059 = vmatpush.bf16.msra.mxu2 %v1251_v48  ;;  %v988_v54 = vpop.permute.xlu1 %987  ;;  %v1295_v48 = vld [vmem:[%s1435_s15] ss:$0 sm:$0xff]  ;;  %s1378_s15 = smov 33  }
 0x356   :  { %v744_v22 = vmax.f32 %v741_v17, 0.0  ;;  %v999_v56 = vsub.f32 %v988_v54, %v1300_v50  ;;  %v508_v32 = vadd.f32 %v1295_v48, %v1464_v15  ;;  %v510_v36 = vadd.f32 %v1295_v48, %v1466_v16  ;;  %s1130_s20 = sld [smem:[%s1715_s0 + %s1378_s15]]  }
 0x358   :  { %v746_v42 = vpack.c.bf16 %v744_v22, %v743_v20  ;;  %v1002_v61 = vmul.f32 -10.0, %v999_v56 }
 0x359   :  { %1060 = vmatpush.bf16.msra.mxu2 %v1250_v30 }
 0x35a   :  { %1191 = vmatmul.msk.bf16.vlgmr.msrb.gmra.mxu2 %vm187_vm3, %v746_v42  ;;  %v1005_v6 = vmul.f32 %v1002_v61, %v999_v56 }
 0x35c   :  { %v1009_v11 = vmul.f32 1.442695, %v1005_v6 }
 0x35d   :  { %1061 = vmatpush.bf16.msra.mxu2 %v1249_v12  ;;  %v993_v13 = vpop.permute.xlu1 %992 }
 0x35e   :  { %v1000_v14 = vsub.f32 %v993_v13, %v1300_v50 }
 0x360   :  { %v1003_v17 = vmul.f32 -10.0, %v1000_v14 }
 0x361   :  { %v703_v37 = vpop.xlane.xlu2 %702  ;;  %1062 = vmatpush.bf16.msra.mxu2 %v1248_v39 }
 0x362   :  { %v706_v38 = vmul.f32 %v703_v37, %v1444_v63  ;;  %v1006_v23 = vmul.f32 %v1003_v17, %v1000_v14 }
 0x364   :  { %v709_v40 = vadd.f32 1e-05, %v706_v38  ;;  %v1011_v42 = vmul.f32 1.442695, %v1006_v23 }
 0x366   :  { %1330 = vrsqrt.f32 %v709_v40  ;;  %vm736_vm1 = vweird.f32 %v709_v40 }
 0x367   :  { %1332 = vpow2.f32 %v918_v49 }
 0x369   :  { %v899_v44 = vpop.permute.xlu2 %898 }
 0x36a   :  { %v910_v45 = vsub.f32 %v899_v44, %v1298_v34 }
 0x36c   :  { %v1331_v46 = vpop.eup %1330  ;;  %v913_v47 = vmul.f32 -10.0, %v910_v45 }
 0x36d   :  { %v731_v63 = vmul.f32 %v1331_v46, %v709_v40  ;;  %vm737_vm0 = vweird.f32 %v1331_v46  ;;  %v1333_v62 = vpop.eup %1332  ;;  %v513_v40 = vadd.f32 %v1295_v48, %v1473_v21 }
 0x36e   :  { %v916_v18 = vmul.f32 %v913_v47, %v910_v45  ;;  %vm738_vm10 = vmor %vm736_vm1, %vm737_vm0  ;;  %v1303_v45 = vld [vmem:[%s1656_s6] ss:$0 sm:$0xff] }
 0x36f   :  { %v732_v26 = vmul.f32 %v1331_v46, %v731_v63  ;;  %v1302_v47 = vld [vmem:[%s1649_s1] ss:$0 sm:$0xff] }
 0x370   :  { %v920_v51 = vmul.f32 1.442695, %v916_v18 }
 0x371   :  { %v733_v53 = vmul.f32 0.5, %v732_v26  ;;  %v904_v19 = vpop.permute.xlu2 %903 }
 0x372   :  { %1334 = vpow2.f32 %v920_v51  ;;  %v911_v25 = vsub.f32 %v904_v19, %v1298_v34  ;;  %v1304_v19 = vld [vmem:[%s1670_s10] ss:$0 sm:$0xff] }
 0x373   :  { %v734_v57 = vsub.f32 1.5, %v733_v53 }
 0x374   :  { %v914_v59 = vmul.f32 -10.0, %v911_v25 }
 0x375   :  { %v735_v60 = vmul.f32 %v1331_v46, %v734_v57 }
 0x376   :  { %v917_v3 = vmul.f32 %v914_v59, %v911_v25 }
 0x377   :  { %v739_v31 = vsel %vm738_vm10, %v1331_v46, %v735_v60 }
 0x378   :  { %v1335_v1 = vpop.eup %1334  ;;  %v742_v4 = vmul.f32 %v739_v31, %v1596_v55  ;;  %v922_v9 = vmul.f32 1.442695, %v917_v3 }
 0x379   :  { %v925_v5 = vpack.c.bf16 %v1335_v1, %v1333_v62  ;;  %v1305_v1 = vld [vmem:[%s1679_s13] ss:$0 sm:$0xff] }
 0x37a   :  { %v745_v33 = vmax.f32 %v742_v4, 0.0  ;;  %1336 = vpow2.f32 %v922_v9 }
 0x37b   :  { %1213 = vmatmul.msk.bf16.vlgmr.msra.gmra.mxu1 %vm187_vm3, %v925_v5  ;;  %1338 = vpow2.f32 %v1009_v11 }
 0x37c   :  { %v747_v10 = vpack.c.bf16 %v745_v33, %v745_v33  ;;  %1340 = vpow2.f32 %v1007_v2 }
 0x37d   :  { %1342 = vpow2.f32 %v1011_v42 }
 0x37e   :  { %1192 = vmatmul.msk.bf16.gmra.mxu2 %vm187_vm3, %v747_v10 }
 0x380   :  { %v1337_v7 = vpop.eup %1336 }
 0x381   :  { %v1339_v55 = vpop.eup %1338  ;;  %v926_v22 = vpack.c.bf16 %v1337_v7, %v1337_v7 }
 0x382   :  { %v1341_v20 = vpop.eup %1340 }
 0x383   :  { %v1014_v24 = vpack.c.bf16 %v1339_v55, %v1341_v20  ;;  %v1343_v27 = vpop.eup %1342 }
 0x384   :  { %v1015_v28 = vpack.c.bf16 %v1343_v27, %v1343_v27 }
 0x38b   :  { %1214 = vmatmul.msk.bf16.gmra.mxu1 %vm187_vm3, %v926_v22 }
 0x38e   :  { %1231 = vmatmul.msk.bf16.vlgmr.msra.gmra.mxu2 %vm1048_vm11, %v1014_v24 }
 0x39e   :  { %1232 = vmatmul.msk.bf16.gmra.mxu2 %vm1048_vm11, %v1015_v28 }
 0x3b8   :  { %v416_v30 = vpop.f32.mrf.mxu2  ;;  %v872_v15 = vpop.f32.mrf.mxu3 }
 0x3b9   :  { %v417_v34 = vadd.f32 %v1301_v29, %v416_v30  ;;  %v873_v16 = vadd.f32 %v1303_v45, %v872_v15 }
 0x3bb   :  { %v516_v12 = vadd.f32 %v508_v32, %v417_v34 }
 0x3bd   :  { %519 = vst.msk [vmem:[%s1129_s18] sm:$0xff] %vm187_vm3, %v516_v12 }
 0x3c0   :  { %v418_v35 = vpop.f32.mrf.mxu2  ;;  %v874_v46 = vpop.f32.mrf.mxu3 }
 0x3c1   :  { %v419_v37 = vadd.f32 %v1301_v29, %v418_v35  ;;  %v875_v50 = vadd.f32 %v1303_v45, %v874_v46 }
 0x3c3   :  { %v517_v38 = vadd.f32 %v510_v36, %v419_v37 }
 0x3c5   :  { %520 = vst.msk [vmem:[%s1129_s18 + $0x8] sm:$0xff] %vm187_vm3, %v517_v38 }
 0x3c8   :  { %v421_v39 = vpop.f32.mrf.mxu2  ;;  %v877_v21 = vpop.f32.mrf.mxu3 }
 0x3c9   :  { %v422_v41 = vadd.f32 %v1301_v29, %v421_v39  ;;  %v878_v57 = vadd.f32 %v1303_v45, %v877_v21 }
 0x3cb   :  { %v518_v43 = vadd.f32 %v513_v40, %v422_v41 }
 0x3cd   :  { %521 = vst.msk [vmem:[%s1129_s18 + $0x10] sm:$0xff] %vm187_vm3, %v518_v43 }
 0x3d0   :  { %v423_v44 = vpop.f32.mrf.mxu2  ;;  %v879_v53 = vpop.f32.mrf.mxu3 }
 0x3dd   :  { %v783_v49 = vpop.f32.mrf.mxu2 }
 0x3de   :  { %v784_v63 = vadd.f32 %v1302_v47, %v783_v49 }
 0x3e0   :  { %v881_v18 = vadd.f32 %v873_v16, %v784_v63 }
 0x3e2   :  { %884 = vst.msk [vmem:[%s1130_s20] sm:$0xff] %vm187_vm3, %v881_v18 }
 0x3e5   :  { %v785_v26 = vpop.f32.mrf.mxu2 }
 0x3e6   :  { %v786_v51 = vadd.f32 %v1302_v47, %v785_v26 }
 0x3e8   :  { %v882_v52 = vadd.f32 %v875_v50, %v786_v51 }
 0x3ea   :  { %885 = vst.msk [vmem:[%s1130_s20 + $0x8] sm:$0xff] %vm187_vm3, %v882_v52 }
 0x3f8   :  { %v958_v54 = vpop.f32.mrf.mxu1 }
 0x3f9   :  { %v970_v25 = vadd.f32 %v1304_v19, %v958_v54 }
 0x3fb   :  { %973 = vst.msk [vmem:[%s1131_s24] sm:$0xff] %vm187_vm3, %v970_v25 }
 0x400   :  { %v960_v56 = vpop.f32.mrf.mxu1 }
 0x401   :  { %v971_v58 = vadd.f32 %v1304_v19, %v960_v56  ;;  %v788_v59 = vpop.f32.mrf.mxu2 }
 0x402   :  { %v789_v60 = vadd.f32 %v1302_v47, %v788_v59 }
 0x403   :  { %974 = vst.msk [vmem:[%s1131_s24 + $0x8] sm:$0xff] %vm187_vm3, %v971_v58 }
 0x404   :  { %v883_v61 = vadd.f32 %v878_v57, %v789_v60 }
 0x406   :  { %886 = vst.msk [vmem:[%s1130_s20 + $0x10] sm:$0xff] %vm187_vm3, %v883_v61 }
 0x408   :  { %v963_v62 = vpop.f32.mrf.mxu1 }
 0x409   :  { %v972_v0 = vadd.f32 %v1304_v19, %v963_v62  ;;  %v790_v31 = vpop.f32.mrf.mxu2 }
 0x40b   :  { %975 = vst.msk [vmem:[%s1131_s24 + $0x10] sm:$0xff] %vm187_vm3, %v972_v0 }
 0x410   :  { %v965_v3 = vpop.f32.mrf.mxu1 }
 0x411   :  { %v1064_v4 = vpop.f32.mrf.mxu2 }
 0x412   :  { %v1076_v5 = vadd.f32 %v1305_v1, %v1064_v4 }
 0x414   :  { %1079 = vst.msk [vmem:[%s1132_s28] sm:$0xff] %vm187_vm3, %v1076_v5 }
 0x419   :  { %v1066_v6 = vpop.f32.mrf.mxu2 }
 0x41a   :  { %v1077_v33 = vadd.f32 %v1305_v1, %v1066_v6 }
 0x41c   :  { %1080 = vst.msk [vmem:[%s1132_s28 + $0x8] sm:$0xff] %vm187_vm3, %v1077_v33 }
 0x421   :  { %v1069_v8 = vpop.f32.mrf.mxu2 }
 0x422   :  { %v1078_v9 = vadd.f32 %v1305_v1, %v1069_v8 }
 0x424   :  { %1081 = vst.msk [vmem:[%s1132_s28 + $0x10] sm:$0xff] %vm187_vm3, %v1078_v9 }
 0x429   :  { %v1071_v10 = vpop.f32.mrf.mxu2 }

// kernel: egem_forward.19
= control target key start
LH: loop header
LB: loop body
LE: loop exit
PB: predicated region body
PF: predicated region fallthrough
CT: control target
= control target key end

     0   :  { %vm64_vm0 = vcmask 261120   ;;  %v379_v46 = vmov 32.0   ;;  %s527_s3 = inlined_call_operand.vmem [shape: bf16[32,32], index: 3, kind: input, shape index: {}]   ;;  %s528_s4 = inlined_call_operand.vmem [shape: bf16[32,32], index: 4, kind: input, shape index: {}]   ;;  %s529_s5 = inlined_call_operand.vmem [shape: bf16[32,32], index: 5, kind: input, shape index: {}]   ;;  %s530_s0 = inlined_call_operand.vmem [shape: f32[24,32], index: 0, kind: input, shape index: {}, may-alias: {0,9}]   ;;  %s531_s1 = inlined_call_operand.vmem [shape: f32[24,32], index: 1, kind: input, shape index: {}]   ;;  %s532_s2 = inlined_call_operand.vmem [shape: f32[24,32], index: 2, kind: input, shape index: {}]   ;;  %s533_s6 = inlined_call_operand.vmem [shape: f32[1,32], index: 6, kind: input, shape index: {}]   ;;  %s534_s8 = inlined_call_operand.vmem [shape: f32[1,32], index: 8, kind: input, shape index: {}]   ;;  %s535_s7 = inlined_call_operand.vmem [shape: bf16[32,32], index: 7, kind: input, shape index: {}]   ;;  %s536_s9 = inlined_call_operand.vmem [shape: f32[24,32], index: 9, kind: input, shape index: {}, may-alias: {0,9}]   ;;  %s537_s10 = inlined_call_operand.vmem [shape: f32[24,32], index: 10, kind: output, shape index: {}]  }
   0x1   :  { %v361_v0 = vld [vmem:[%s527_s3 + $0x8] sm:$0xff]  ;;  %v360_v3 = vld [vmem:[%s527_s3] sm:$0xff]  ;;  %v38_v15 = vld [vmem:[%s530_s0 + $0x10] sm:$0xff]  ;;  %371 = vrcp.f32 %v379_v46 }
   0x2   :  { %v363_v1 = vld [vmem:[%s528_s4 + $0x8] sm:$0xff]  ;;  %v362_v4 = vld [vmem:[%s528_s4] sm:$0xff]  ;;  %77 = vmatpush.bf16.msra.mxu0 %v361_v0  ;;  %v41_v16 = vld [vmem:[%s531_s1 + $0x10] sm:$0xff]  ;;  %v47_v18 = vpack.c.bf16 %v38_v15, %v38_v15 }
   0x3   :  { %v365_v2 = vld [vmem:[%s529_s5 + $0x8] sm:$0xff]  ;;  %v364_v5 = vld [vmem:[%s529_s5] sm:$0xff]  ;;  %125 = vmatpush.bf16.msra.mxu1 %v363_v1  ;;  %v44_v17 = vld [vmem:[%s532_s2 + $0x10] sm:$0xff]  ;;  %v96_v19 = vpack.c.bf16 %v41_v16, %v41_v16 }
   0x4   :  { %v36_v6 = vld [vmem:[%s530_s0] sm:$0xff]  ;;  %v37_v7 = vld [vmem:[%s530_s0 + $0x8] sm:$0xff]  ;;  %170 = vmatpush.bf16.msra.mxu2 %v365_v2  ;;  %v141_v20 = vpack.c.bf16 %v44_v17, %v44_v17 }
   0x5   :  { %v39_v8 = vld [vmem:[%s531_s1] sm:$0xff]  ;;  %v40_v9 = vld [vmem:[%s531_s1 + $0x8] sm:$0xff]  ;;  %v46_v12 = vpack.c.bf16 %v37_v7, %v36_v6 }
   0x6   :  { %v42_v10 = vld [vmem:[%s532_s2] sm:$0xff]  ;;  %v43_v11 = vld [vmem:[%s532_s2 + $0x8] sm:$0xff]  ;;  %v95_v13 = vpack.c.bf16 %v40_v9, %v39_v8  ;;  %78 = vmatpush.bf16.msra.mxu0 %v360_v3 }
   0x7   :  { %126 = vmatpush.bf16.msra.mxu1 %v362_v4  ;;  %v140_v14 = vpack.c.bf16 %v43_v11, %v42_v10  ;;  %v369_v21 = vld [vmem:[%s533_s6] ss:$0 sm:$0xff]  ;;  %v372_v47 = vpop.eup %371  ;;  %v367_v4 = vld [vmem:[%s535_s7 + $0x8] sm:$0xff] }
   0x8   :  { %171 = vmatpush.bf16.msra.mxu2 %v364_v5  ;;  %v195_v48 = vmul.f32 32.0, %v372_v47  ;;  %vm199_vm1 = vweird.f32 %v372_v47  ;;  %295 = vmatpush.bf16.msra.mxu3 %v367_v4  ;;  %v366_v6 = vld [vmem:[%s535_s7] sm:$0xff] }
   0x9   :  { %328 = vmatmul.msk.bf16.vlgmr.msra.gmra.mxu0 %vm64_vm0, %v46_v12  ;;  %v307_v46 = vld [vmem:[%s536_s9] sm:$0xff] }
   0xa   :  { %338 = vmatmul.msk.bf16.vlgmr.msra.gmra.mxu1 %vm64_vm0, %v95_v13  ;;  %v196_v49 = vsub.f32 1.0, %v195_v48 }
   0xb   :  { %348 = vmatmul.msk.bf16.vlgmr.msra.gmra.mxu2 %vm64_vm0, %v140_v14 }
   0xc   :  { %v197_v50 = vmul.f32 %v372_v47, %v196_v49  ;;  %296 = vmatpush.bf16.msra.mxu3 %v366_v6 }
   0xe   :  { %v198_v51 = vadd.f32 %v372_v47, %v197_v50  ;;  %v308_v50 = vld [vmem:[%s536_s9 + $0x8] sm:$0xff] }
  0x10   :  { %v200_v52 = vsel %vm199_vm1, %v372_v47, %v198_v51 }
  0x19   :  { %329 = vmatmul.msk.bf16.gmra.mxu0 %vm64_vm0, %v47_v18 }
  0x1a   :  { %339 = vmatmul.msk.bf16.gmra.mxu1 %vm64_vm0, %v96_v19 }
  0x1b   :  { %349 = vmatmul.msk.bf16.gmra.mxu2 %vm64_vm0, %v141_v20 }
  0x86   :  { %v80_v22 = vpop.f32.mrf.mxu0 }
  0x87   :  { %v128_v23 = vpop.f32.mrf.mxu1  ;;  %v92_v24 = vadd.f32 %v369_v21, %v80_v22 }
  0x89   :  { %v137_v25 = vadd.f32 %v128_v23, %v92_v24 }
  0x8e   :  { %v173_v26 = vpop.f32.mrf.mxu2  ;;  %v82_v28 = vpop.f32.mrf.mxu0 }
  0x8f   :  { %v182_v27 = vadd.f32 %v173_v26, %v137_v25  ;;  %v130_v29 = vpop.f32.mrf.mxu1  ;;  %v93_v30 = vadd.f32 %v369_v21, %v82_v28 }
  0x91   :  { %v185_v31 = vsel %vm64_vm0, %v182_v27, 0.0  ;;  %v138_v32 = vadd.f32 %v130_v29, %v93_v30 }
  0x92   :  { %186 = vadd.xlane.f32.xlu0 %v185_v31 }
  0x96   :  { %v175_v33 = vpop.f32.mrf.mxu2  ;;  %v85_v35 = vpop.f32.mrf.mxu0 }
  0x97   :  { %v183_v34 = vadd.f32 %v175_v33, %v138_v32  ;;  %v133_v36 = vpop.f32.mrf.mxu1  ;;  %v94_v37 = vadd.f32 %v369_v21, %v85_v35 }
  0x99   :  { %v188_v38 = vsel %vm64_vm0, %v183_v34, 0.0  ;;  %v139_v39 = vadd.f32 %v133_v36, %v94_v37 }
  0x9a   :  { %189 = vadd.xlane.f32.xlu0 %v188_v38 }
  0x9e   :  { %v178_v40 = vpop.f32.mrf.mxu2  ;;  %v87_v42 = vpop.f32.mrf.mxu0 }
  0x9f   :  { %v184_v41 = vadd.f32 %v178_v40, %v139_v39  ;;  %v135_v43 = vpop.f32.mrf.mxu1 }
  0xa1   :  { %v191_v44 = vsel %vm64_vm0, %v184_v41, 0.0 }
  0xa2   :  { %192 = vadd.xlane.f32.xlu1 %v191_v44  ;;  %v370_v44 = vld [vmem:[%s534_s8] ss:$0 sm:$0xff] }
  0xa6   :  { %v180_v45 = vpop.f32.mrf.mxu2 }
 0x105   :  { %v187_v53 = vpop.xlane.xlu0 %186 }
 0x106   :  { %v201_v54 = vmul.f32 %v200_v52, %v187_v53 }
 0x108   :  { %v204_v55 = vsub.f32 %v182_v27, %v201_v54  ;;  %v309_v54 = vld [vmem:[%s536_s9 + $0x10] sm:$0xff] }
 0x10a   :  { %v207_v56 = vmul.f32 %v204_v55, %v204_v55 }
 0x10c   :  { %v210_v57 = vsel %vm64_vm0, %v207_v56, 0.0 }
 0x10d   :  { %v190_v58 = vpop.xlane.xlu0 %189  ;;  %211 = vadd.xlane.f32.xlu1 %v210_v57 }
 0x10e   :  { %v202_v59 = vmul.f32 %v200_v52, %v190_v58 }
 0x110   :  { %v205_v60 = vsub.f32 %v183_v34, %v202_v59 }
 0x112   :  { %v208_v61 = vmul.f32 %v205_v60, %v205_v60 }
 0x114   :  { %v213_v62 = vsel %vm64_vm0, %v208_v61, 0.0 }
 0x115   :  { %214 = vadd.xlane.f32.xlu2 %v213_v62  ;;  %v193_v63 = vpop.xlane.xlu1 %192 }
 0x116   :  { %v203_v0 = vmul.f32 %v200_v52, %v193_v63 }
 0x118   :  { %v206_v1 = vsub.f32 %v184_v41, %v203_v0 }
 0x11a   :  { %v209_v2 = vmul.f32 %v206_v1, %v206_v1 }
 0x11c   :  { %v216_v3 = vsel %vm64_vm0, %v209_v2, 0.0 }
 0x11d   :  { %217 = vadd.xlane.f32.xlu2 %v216_v3 }
 0x180   :  { %v212_v5 = vpop.xlane.xlu1 %211 }
 0x181   :  { %v219_v7 = vmul.f32 %v212_v5, %v200_v52 }
 0x183   :  { %v222_v8 = vadd.f32 1e-05, %v219_v7 }
 0x185   :  { %373 = vrsqrt.f32 %v222_v8  ;;  %vm231_vm3 = vweird.f32 %v222_v8 }
 0x188   :  { %v215_v9 = vpop.xlane.xlu2 %214 }
 0x189   :  { %v220_v10 = vmul.f32 %v215_v9, %v200_v52 }
 0x18b   :  { %v374_v11 = vpop.eup %373  ;;  %v223_v12 = vadd.f32 1e-05, %v220_v10 }
 0x18c   :  { %v226_v13 = vmul.f32 %v374_v11, %v222_v8  ;;  %vm232_vm2 = vweird.f32 %v374_v11 }
 0x18d   :  { %375 = vrsqrt.f32 %v223_v12  ;;  %vm233_vm4 = vmor %vm231_vm3, %vm232_vm2  ;;  %vm241_vm6 = vweird.f32 %v223_v12 }
 0x18e   :  { %v227_v14 = vmul.f32 %v374_v11, %v226_v13 }
 0x190   :  { %v228_v15 = vmul.f32 0.5, %v227_v14  ;;  %v218_v16 = vpop.xlane.xlu2 %217 }
 0x191   :  { %v221_v17 = vmul.f32 %v218_v16, %v200_v52 }
 0x192   :  { %v229_v18 = vsub.f32 1.5, %v228_v15 }
 0x193   :  { %v376_v19 = vpop.eup %375  ;;  %v224_v20 = vadd.f32 1e-05, %v221_v17 }
 0x194   :  { %v236_v21 = vmul.f32 %v376_v19, %v223_v12  ;;  %v230_v22 = vmul.f32 %v374_v11, %v229_v18  ;;  %vm242_vm5 = vweird.f32 %v376_v19 }
 0x195   :  { %377 = vrsqrt.f32 %v224_v20  ;;  %vm243_vm7 = vmor %vm241_vm6, %vm242_vm5  ;;  %vm251_vm9 = vweird.f32 %v224_v20 }
 0x196   :  { %v237_v23 = vmul.f32 %v376_v19, %v236_v21  ;;  %v234_v26 = vsel %vm233_vm4, %v374_v11, %v230_v22 }
 0x197   :  { %v255_v30 = vmul.f32 %v234_v26, %v204_v55 }
 0x198   :  { %v238_v24 = vmul.f32 0.5, %v237_v23 }
 0x199   :  { %v258_v35 = vmax.f32 %v255_v30, 0.0 }
 0x19a   :  { %v239_v25 = vsub.f32 1.5, %v238_v24 }
 0x19b   :  { %v378_v27 = vpop.eup %377 }
 0x19c   :  { %v240_v28 = vmul.f32 %v376_v19, %v239_v25  ;;  %v246_v29 = vmul.f32 %v378_v27, %v224_v20  ;;  %vm252_vm8 = vweird.f32 %v378_v27 }
 0x19d   :  { %vm253_vm10 = vmor %vm251_vm9, %vm252_vm8 }
 0x19e   :  { %v247_v31 = vmul.f32 %v378_v27, %v246_v29  ;;  %v244_v32 = vsel %vm243_vm7, %v376_v19, %v240_v28 }
 0x19f   :  { %v256_v33 = vmul.f32 %v244_v32, %v205_v60 }
 0x1a0   :  { %v248_v34 = vmul.f32 0.5, %v247_v31 }
 0x1a1   :  { %v259_v36 = vmax.f32 %v256_v33, 0.0 }
 0x1a2   :  { %v249_v37 = vsub.f32 1.5, %v248_v34 }
 0x1a3   :  { %v261_v38 = vpack.c.bf16 %v259_v36, %v258_v35 }
 0x1a4   :  { %v250_v39 = vmul.f32 %v378_v27, %v249_v37 }
 0x1a5   :  { %358 = vmatmul.msk.bf16.vlgmr.msra.gmra.mxu3 %vm64_vm0, %v261_v38 }
 0x1a6   :  { %v254_v40 = vsel %vm253_vm10, %v378_v27, %v250_v39 }
 0x1a7   :  { %v257_v41 = vmul.f32 %v254_v40, %v206_v1 }
 0x1a9   :  { %v260_v42 = vmax.f32 %v257_v41, 0.0 }
 0x1ab   :  { %v262_v43 = vpack.c.bf16 %v260_v42, %v260_v42 }
 0x1b5   :  { %359 = vmatmul.msk.bf16.gmra.mxu3 %vm64_vm0, %v262_v43 }
 0x228   :  { %v298_v45 = vpop.f32.mrf.mxu3 }
 0x229   :  { %v299_v47 = vadd.f32 %v370_v44, %v298_v45 }
 0x22b   :  { %v310_v48 = vadd.f32 %v307_v46, %v299_v47 }
 0x22d   :  { %313 = vst.msk [vmem:[%s537_s10] sm:$0xff] %vm64_vm0, %v310_v48 }
 0x230   :  { %v300_v49 = vpop.f32.mrf.mxu3 }
 0x231   :  { %v301_v51 = vadd.f32 %v370_v44, %v300_v49 }
 0x233   :  { %v311_v52 = vadd.f32 %v308_v50, %v301_v51 }
 0x235   :  { %314 = vst.msk [vmem:[%s537_s10 + $0x8] sm:$0xff] %vm64_vm0, %v311_v52 }
 0x238   :  { %v303_v53 = vpop.f32.mrf.mxu3 }
 0x239   :  { %v304_v55 = vadd.f32 %v370_v44, %v303_v53 }
 0x23b   :  { %v312_v56 = vadd.f32 %v309_v54, %v304_v55 }
 0x23d   :  { %315 = vst.msk [vmem:[%s537_s10 + $0x10] sm:$0xff] %vm64_vm0, %v312_v56 }
 0x240   :  { %v305_v57 = vpop.f32.mrf.mxu3 }

// kernel: egem_forward.20
= control target key start
LH: loop header
LB: loop body
LE: loop exit
PB: predicated region body
PF: predicated region fallthrough
CT: control target
= control target key end

     0   :  { %vm61_vm0 = vcmask 261120   ;;  %v370_v46 = vmov 32.0   ;;  %s504_s3 = inlined_call_operand.vmem [shape: bf16[32,32], index: 3, kind: input, shape index: {}]   ;;  %s505_s4 = inlined_call_operand.vmem [shape: bf16[32,32], index: 4, kind: input, shape index: {}]   ;;  %s506_s5 = inlined_call_operand.vmem [shape: bf16[32,32], index: 5, kind: input, shape index: {}]   ;;  %s507_s0 = inlined_call_operand.vmem [shape: f32[24,32], index: 0, kind: input, shape index: {}]   ;;  %s508_s1 = inlined_call_operand.vmem [shape: f32[24,32], index: 1, kind: input, shape index: {}]   ;;  %s509_s2 = inlined_call_operand.vmem [shape: f32[24,32], index: 2, kind: input, shape index: {}]   ;;  %s510_s6 = inlined_call_operand.vmem [shape: f32[1,32], index: 6, kind: input, shape index: {}]   ;;  %s511_s8 = inlined_call_operand.vmem [shape: f32[1,32], index: 8, kind: input, shape index: {}]   ;;  %s512_s7 = inlined_call_operand.vmem [shape: bf16[32,32], index: 7, kind: input, shape index: {}]   ;;  %s513_s9 = inlined_call_operand.vmem [shape: f32[24,32], index: 9, kind: output, shape index: {}]  }
   0x1   :  { %v352_v0 = vld [vmem:[%s504_s3 + $0x8] sm:$0xff]  ;;  %v351_v3 = vld [vmem:[%s504_s3] sm:$0xff]  ;;  %v35_v15 = vld [vmem:[%s507_s0 + $0x10] sm:$0xff]  ;;  %362 = vrcp.f32 %v370_v46 }
   0x2   :  { %v354_v1 = vld [vmem:[%s505_s4 + $0x8] sm:$0xff]  ;;  %v353_v4 = vld [vmem:[%s505_s4] sm:$0xff]  ;;  %74 = vmatpush.bf16.msra.mxu0 %v352_v0  ;;  %v38_v16 = vld [vmem:[%s508_s1 + $0x10] sm:$0xff]  ;;  %v44_v18 = vpack.c.bf16 %v35_v15, %v35_v15 }
   0x3   :  { %v356_v2 = vld [vmem:[%s506_s5 + $0x8] sm:$0xff]  ;;  %v355_v5 = vld [vmem:[%s506_s5] sm:$0xff]  ;;  %122 = vmatpush.bf16.msra.mxu1 %v354_v1  ;;  %v41_v17 = vld [vmem:[%s509_s2 + $0x10] sm:$0xff]  ;;  %v93_v19 = vpack.c.bf16 %v38_v16, %v38_v16 }
   0x4   :  { %v33_v6 = vld [vmem:[%s507_s0] sm:$0xff]  ;;  %v34_v7 = vld [vmem:[%s507_s0 + $0x8] sm:$0xff]  ;;  %167 = vmatpush.bf16.msra.mxu2 %v356_v2  ;;  %v138_v20 = vpack.c.bf16 %v41_v17, %v41_v17 }
   0x5   :  { %v36_v8 = vld [vmem:[%s508_s1] sm:$0xff]  ;;  %v37_v9 = vld [vmem:[%s508_s1 + $0x8] sm:$0xff]  ;;  %v43_v12 = vpack.c.bf16 %v34_v7, %v33_v6 }
   0x6   :  { %v39_v10 = vld [vmem:[%s509_s2] sm:$0xff]  ;;  %v40_v11 = vld [vmem:[%s509_s2 + $0x8] sm:$0xff]  ;;  %v92_v13 = vpack.c.bf16 %v37_v9, %v36_v8  ;;  %75 = vmatpush.bf16.msra.mxu0 %v351_v3 }
   0x7   :  { %123 = vmatpush.bf16.msra.mxu1 %v353_v4  ;;  %v137_v14 = vpack.c.bf16 %v40_v11, %v39_v10  ;;  %v360_v21 = vld [vmem:[%s510_s6] ss:$0 sm:$0xff]  ;;  %v363_v47 = vpop.eup %362  ;;  %v358_v4 = vld [vmem:[%s512_s7 + $0x8] sm:$0xff] }
   0x8   :  { %168 = vmatpush.bf16.msra.mxu2 %v355_v5  ;;  %v192_v48 = vmul.f32 32.0, %v363_v47  ;;  %vm196_vm1 = vweird.f32 %v363_v47  ;;  %292 = vmatpush.bf16.msra.mxu3 %v358_v4  ;;  %v357_v6 = vld [vmem:[%s512_s7] sm:$0xff] }
   0x9   :  { %319 = vmatmul.msk.bf16.vlgmr.msra.gmra.mxu0 %vm61_vm0, %v43_v12 }
   0xa   :  { %329 = vmatmul.msk.bf16.vlgmr.msra.gmra.mxu1 %vm61_vm0, %v92_v13  ;;  %v193_v49 = vsub.f32 1.0, %v192_v48 }
   0xb   :  { %339 = vmatmul.msk.bf16.vlgmr.msra.gmra.mxu2 %vm61_vm0, %v137_v14 }
   0xc   :  { %v194_v50 = vmul.f32 %v363_v47, %v193_v49  ;;  %293 = vmatpush.bf16.msra.mxu3 %v357_v6 }
   0xe   :  { %v195_v51 = vadd.f32 %v363_v47, %v194_v50 }
  0x10   :  { %v197_v52 = vsel %vm196_vm1, %v363_v47, %v195_v51 }
  0x19   :  { %320 = vmatmul.msk.bf16.gmra.mxu0 %vm61_vm0, %v44_v18 }
  0x1a   :  { %330 = vmatmul.msk.bf16.gmra.mxu1 %vm61_vm0, %v93_v19 }
  0x1b   :  { %340 = vmatmul.msk.bf16.gmra.mxu2 %vm61_vm0, %v138_v20 }
  0x86   :  { %v77_v22 = vpop.f32.mrf.mxu0 }
  0x87   :  { %v125_v23 = vpop.f32.mrf.mxu1  ;;  %v89_v24 = vadd.f32 %v360_v21, %v77_v22 }
  0x89   :  { %v134_v25 = vadd.f32 %v125_v23, %v89_v24 }
  0x8e   :  { %v170_v26 = vpop.f32.mrf.mxu2  ;;  %v79_v28 = vpop.f32.mrf.mxu0 }
  0x8f   :  { %v179_v27 = vadd.f32 %v170_v26, %v134_v25  ;;  %v127_v29 = vpop.f32.mrf.mxu1  ;;  %v90_v30 = vadd.f32 %v360_v21, %v79_v28 }
  0x91   :  { %v182_v31 = vsel %vm61_vm0, %v179_v27, 0.0  ;;  %v135_v32 = vadd.f32 %v127_v29, %v90_v30 }
  0x92   :  { %183 = vadd.xlane.f32.xlu0 %v182_v31 }
  0x96   :  { %v172_v33 = vpop.f32.mrf.mxu2  ;;  %v82_v35 = vpop.f32.mrf.mxu0 }
  0x97   :  { %v180_v34 = vadd.f32 %v172_v33, %v135_v32  ;;  %v130_v36 = vpop.f32.mrf.mxu1  ;;  %v91_v37 = vadd.f32 %v360_v21, %v82_v35 }
  0x99   :  { %v185_v38 = vsel %vm61_vm0, %v180_v34, 0.0  ;;  %v136_v39 = vadd.f32 %v130_v36, %v91_v37 }
  0x9a   :  { %186 = vadd.xlane.f32.xlu0 %v185_v38 }
  0x9e   :  { %v175_v40 = vpop.f32.mrf.mxu2  ;;  %v84_v42 = vpop.f32.mrf.mxu0 }
  0x9f   :  { %v181_v41 = vadd.f32 %v175_v40, %v136_v39  ;;  %v132_v43 = vpop.f32.mrf.mxu1 }
  0xa1   :  { %v188_v44 = vsel %vm61_vm0, %v181_v41, 0.0 }
  0xa2   :  { %189 = vadd.xlane.f32.xlu1 %v188_v44  ;;  %v361_v44 = vld [vmem:[%s511_s8] ss:$0 sm:$0xff] }
  0xa6   :  { %v177_v45 = vpop.f32.mrf.mxu2 }
 0x105   :  { %v184_v53 = vpop.xlane.xlu0 %183 }
 0x106   :  { %v198_v54 = vmul.f32 %v197_v52, %v184_v53 }
 0x108   :  { %v201_v55 = vsub.f32 %v179_v27, %v198_v54 }
 0x10a   :  { %v204_v56 = vmul.f32 %v201_v55, %v201_v55 }
 0x10c   :  { %v207_v57 = vsel %vm61_vm0, %v204_v56, 0.0 }
 0x10d   :  { %v187_v58 = vpop.xlane.xlu0 %186  ;;  %208 = vadd.xlane.f32.xlu1 %v207_v57 }
 0x10e   :  { %v199_v59 = vmul.f32 %v197_v52, %v187_v58 }
 0x110   :  { %v202_v60 = vsub.f32 %v180_v34, %v199_v59 }
 0x112   :  { %v205_v61 = vmul.f32 %v202_v60, %v202_v60 }
 0x114   :  { %v210_v62 = vsel %vm61_vm0, %v205_v61, 0.0 }
 0x115   :  { %211 = vadd.xlane.f32.xlu2 %v210_v62  ;;  %v190_v63 = vpop.xlane.xlu1 %189 }
 0x116   :  { %v200_v0 = vmul.f32 %v197_v52, %v190_v63 }
 0x118   :  { %v203_v1 = vsub.f32 %v181_v41, %v200_v0 }
 0x11a   :  { %v206_v2 = vmul.f32 %v203_v1, %v203_v1 }
 0x11c   :  { %v213_v3 = vsel %vm61_vm0, %v206_v2, 0.0 }
 0x11d   :  { %214 = vadd.xlane.f32.xlu2 %v213_v3 }
 0x180   :  { %v209_v5 = vpop.xlane.xlu1 %208 }
 0x181   :  { %v216_v7 = vmul.f32 %v209_v5, %v197_v52 }
 0x183   :  { %v219_v8 = vadd.f32 1e-05, %v216_v7 }
 0x185   :  { %364 = vrsqrt.f32 %v219_v8  ;;  %vm228_vm3 = vweird.f32 %v219_v8 }
 0x188   :  { %v212_v9 = vpop.xlane.xlu2 %211 }
 0x189   :  { %v217_v10 = vmul.f32 %v212_v9, %v197_v52 }
 0x18b   :  { %v365_v11 = vpop.eup %364  ;;  %v220_v12 = vadd.f32 1e-05, %v217_v10 }
 0x18c   :  { %v223_v13 = vmul.f32 %v365_v11, %v219_v8  ;;  %vm229_vm2 = vweird.f32 %v365_v11 }
 0x18d   :  { %366 = vrsqrt.f32 %v220_v12  ;;  %vm230_vm4 = vmor %vm228_vm3, %vm229_vm2  ;;  %vm238_vm6 = vweird.f32 %v220_v12 }
 0x18e   :  { %v224_v14 = vmul.f32 %v365_v11, %v223_v13 }
 0x190   :  { %v225_v15 = vmul.f32 0.5, %v224_v14  ;;  %v215_v16 = vpop.xlane.xlu2 %214 }
 0x191   :  { %v218_v17 = vmul.f32 %v215_v16, %v197_v52 }
 0x192   :  { %v226_v18 = vsub.f32 1.5, %v225_v15 }
 0x193   :  { %v367_v19 = vpop.eup %366  ;;  %v221_v20 = vadd.f32 1e-05, %v218_v17 }
 0x194   :  { %v233_v21 = vmul.f32 %v367_v19, %v220_v12  ;;  %v227_v22 = vmul.f32 %v365_v11, %v226_v18  ;;  %vm239_vm5 = vweird.f32 %v367_v19 }
 0x195   :  { %368 = vrsqrt.f32 %v221_v20  ;;  %vm240_vm7 = vmor %vm238_vm6, %vm239_vm5  ;;  %vm248_vm9 = vweird.f32 %v221_v20 }
 0x196   :  { %v234_v23 = vmul.f32 %v367_v19, %v233_v21  ;;  %v231_v26 = vsel %vm230_vm4, %v365_v11, %v227_v22 }
 0x197   :  { %v252_v30 = vmul.f32 %v231_v26, %v201_v55 }
 0x198   :  { %v235_v24 = vmul.f32 0.5, %v234_v23 }
 0x199   :  { %v255_v35 = vmax.f32 %v252_v30, 0.0 }
 0x19a   :  { %v236_v25 = vsub.f32 1.5, %v235_v24 }
 0x19b   :  { %v369_v27 = vpop.eup %368 }
 0x19c   :  { %v237_v28 = vmul.f32 %v367_v19, %v236_v25  ;;  %v243_v29 = vmul.f32 %v369_v27, %v221_v20  ;;  %vm249_vm8 = vweird.f32 %v369_v27 }
 0x19d   :  { %vm250_vm10 = vmor %vm248_vm9, %vm249_vm8 }
 0x19e   :  { %v244_v31 = vmul.f32 %v369_v27, %v243_v29  ;;  %v241_v32 = vsel %vm240_vm7, %v367_v19, %v237_v28 }
 0x19f   :  { %v253_v33 = vmul.f32 %v241_v32, %v202_v60 }
 0x1a0   :  { %v245_v34 = vmul.f32 0.5, %v244_v31 }
 0x1a1   :  { %v256_v36 = vmax.f32 %v253_v33, 0.0 }
 0x1a2   :  { %v246_v37 = vsub.f32 1.5, %v245_v34 }
 0x1a3   :  { %v258_v38 = vpack.c.bf16 %v256_v36, %v255_v35 }
 0x1a4   :  { %v247_v39 = vmul.f32 %v369_v27, %v246_v37 }
 0x1a5   :  { %349 = vmatmul.msk.bf16.vlgmr.msra.gmra.mxu3 %vm61_vm0, %v258_v38 }
 0x1a6   :  { %v251_v40 = vsel %vm250_vm10, %v369_v27, %v247_v39 }
 0x1a7   :  { %v254_v41 = vmul.f32 %v251_v40, %v203_v1 }
 0x1a9   :  { %v257_v42 = vmax.f32 %v254_v41, 0.0 }
 0x1ab   :  { %v259_v43 = vpack.c.bf16 %v257_v42, %v257_v42 }
 0x1b5   :  { %350 = vmatmul.msk.bf16.gmra.mxu3 %vm61_vm0, %v259_v43 }
 0x228   :  { %v295_v45 = vpop.f32.mrf.mxu3 }
 0x229   :  { %v296_v46 = vadd.f32 %v361_v44, %v295_v45 }
 0x22b   :  { %304 = vst.msk [vmem:[%s513_s9] sm:$0xff] %vm61_vm0, %v296_v46 }
 0x230   :  { %v297_v47 = vpop.f32.mrf.mxu3 }
 0x231   :  { %v298_v48 = vadd.f32 %v361_v44, %v297_v47 }
 0x233   :  { %305 = vst.msk [vmem:[%s513_s9 + $0x8] sm:$0xff] %vm61_vm0, %v298_v48 }
 0x238   :  { %v300_v49 = vpop.f32.mrf.mxu3 }
 0x239   :  { %v301_v50 = vadd.f32 %v361_v44, %v300_v49 }
 0x23b   :  { %306 = vst.msk [vmem:[%s513_s9 + $0x10] sm:$0xff] %vm61_vm0, %v301_v50 }
 0x240   :  { %v302_v51 = vpop.f32.mrf.mxu3 }

// kernel: egem_forward.22
= control target key start
LH: loop header
LB: loop body
LE: loop exit
PB: predicated region body
PF: predicated region fallthrough
CT: control target
= control target key end

     0   :  { %vm57_vm0 = vcmask 261120   ;;  %v271_v23 = vmov 32.0   ;;  %s379_s3 = inlined_call_operand.vmem [shape: bf16[32,32], index: 3, kind: input, shape index: {}]   ;;  %s380_s4 = inlined_call_operand.vmem [shape: bf16[32,32], index: 4, kind: input, shape index: {}]   ;;  %s381_s5 = inlined_call_operand.vmem [shape: bf16[32,32], index: 5, kind: input, shape index: {}]   ;;  %s382_s0 = inlined_call_operand.vmem [shape: f32[8,32], index: 0, kind: input, shape index: {}, may-alias: {0,9}]   ;;  %s383_s1 = inlined_call_operand.vmem [shape: f32[8,32], index: 1, kind: input, shape index: {}]   ;;  %s384_s2 = inlined_call_operand.vmem [shape: f32[8,32], index: 2, kind: input, shape index: {}]   ;;  %s385_s6 = inlined_call_operand.vmem [shape: f32[1,32], index: 6, kind: input, shape index: {}]   ;;  %s386_s8 = inlined_call_operand.vmem [shape: f32[1,32], index: 8, kind: input, shape index: {}]   ;;  %s387_s7 = inlined_call_operand.vmem [shape: bf16[32,32], index: 7, kind: input, shape index: {}]   ;;  %s388_s9 = inlined_call_operand.vmem [shape: f32[8,32], index: 9, kind: input, shape index: {}, may-alias: {0,9}]   ;;  %s389_s10 = inlined_call_operand.vmem [shape: f32[8,32], index: 10, kind: output, shape index: {}]  }
   0x1   :  { %v257_v0 = vld [vmem:[%s379_s3 + $0x8] sm:$0xff]  ;;  %v256_v3 = vld [vmem:[%s379_s3] sm:$0xff]  ;;  %267 = vrcp.f32 %v271_v23 }
   0x2   :  { %v259_v1 = vld [vmem:[%s380_s4 + $0x8] sm:$0xff]  ;;  %67 = vmatpush.bf16.msra.mxu0 %v257_v0  ;;  %v258_v4 = vld [vmem:[%s380_s4] sm:$0xff] }
   0x3   :  { %v261_v2 = vld [vmem:[%s381_s5 + $0x8] sm:$0xff]  ;;  %104 = vmatpush.bf16.msra.mxu1 %v259_v1  ;;  %v36_v5 = vld [vmem:[%s382_s0] sm:$0xff] }
   0x4   :  { %v37_v6 = vld [vmem:[%s383_s1] sm:$0xff]  ;;  %138 = vmatpush.bf16.msra.mxu2 %v261_v2  ;;  %v40_v9 = vpack.c.bf16 %v36_v5, %v36_v5  ;;  %v263_v35 = vld [vmem:[%s387_s7 + $0x8] sm:$0xff] }
   0x5   :  { %v260_v7 = vld [vmem:[%s381_s5] sm:$0xff]  ;;  %v78_v10 = vpack.c.bf16 %v37_v6, %v37_v6  ;;  %206 = vmatpush.bf16.msra.mxu3 %v263_v35 }
   0x6   :  { %v38_v8 = vld [vmem:[%s384_s2] sm:$0xff]  ;;  %68 = vmatpush.bf16.msra.mxu0 %v256_v3 }
   0x7   :  { %105 = vmatpush.bf16.msra.mxu1 %v258_v4  ;;  %v112_v11 = vpack.c.bf16 %v38_v8, %v38_v8  ;;  %v265_v12 = vld [vmem:[%s385_s6] ss:$0 sm:$0xff]  ;;  %v268_v24 = vpop.eup %267 }
   0x8   :  { %139 = vmatpush.bf16.msra.mxu2 %v260_v7  ;;  %v150_v25 = vmul.f32 32.0, %v268_v24  ;;  %vm154_vm1 = vweird.f32 %v268_v24  ;;  %v262_v36 = vld [vmem:[%s387_s7] sm:$0xff] }
   0x9   :  { %228 = vmatmul.msk.bf16.vlgmr.msra.gmra.mxu0 %vm57_vm0, %v40_v9  ;;  %207 = vmatpush.bf16.msra.mxu3 %v262_v36  ;;  %v266_v50 = vld [vmem:[%s386_s8] ss:$0 sm:$0xff] }
   0xa   :  { %237 = vmatmul.msk.bf16.vlgmr.msra.gmra.mxu1 %vm57_vm0, %v78_v10  ;;  %v151_v26 = vsub.f32 1.0, %v150_v25  ;;  %v213_v52 = vld [vmem:[%s388_s9] sm:$0xff] }
   0xb   :  { %246 = vmatmul.msk.bf16.vlgmr.msra.gmra.mxu2 %vm57_vm0, %v112_v11 }
   0xc   :  { %v152_v27 = vmul.f32 %v268_v24, %v151_v26 }
   0xe   :  { %v153_v28 = vadd.f32 %v268_v24, %v152_v27 }
  0x10   :  { %v155_v29 = vsel %vm154_vm1, %v268_v24, %v153_v28 }
  0x86   :  { %v70_v13 = vpop.f32.mrf.mxu0 }
  0x87   :  { %v107_v14 = vpop.f32.mrf.mxu1  ;;  %v77_v15 = vadd.f32 %v265_v12, %v70_v13 }
  0x89   :  { %v111_v16 = vadd.f32 %v107_v14, %v77_v15 }
  0x8e   :  { %v141_v17 = vpop.f32.mrf.mxu2  ;;  %v72_v19 = vpop.f32.mrf.mxu0 }
  0x8f   :  { %v145_v18 = vadd.f32 %v141_v17, %v111_v16  ;;  %v109_v20 = vpop.f32.mrf.mxu1 }
  0x91   :  { %v146_v21 = vsel %vm57_vm0, %v145_v18, 0.0 }
  0x92   :  { %147 = vadd.xlane.f32.xlu0 %v146_v21 }
  0x96   :  { %v143_v22 = vpop.f32.mrf.mxu2 }
 0x105   :  { %v148_v30 = vpop.xlane.xlu0 %147 }
 0x106   :  { %v156_v31 = vmul.f32 %v155_v29, %v148_v30 }
 0x108   :  { %v157_v32 = vsub.f32 %v145_v18, %v156_v31 }
 0x10a   :  { %v158_v33 = vmul.f32 %v157_v32, %v157_v32 }
 0x10c   :  { %v159_v34 = vsel %vm57_vm0, %v158_v33, 0.0 }
 0x10d   :  { %160 = vadd.xlane.f32.xlu0 %v159_v34 }
 0x180   :  { %v161_v37 = vpop.xlane.xlu0 %160 }
 0x181   :  { %v162_v38 = vmul.f32 %v161_v37, %v155_v29 }
 0x183   :  { %v163_v39 = vadd.f32 1e-05, %v162_v38 }
 0x185   :  { %269 = vrsqrt.f32 %v163_v39  ;;  %vm170_vm3 = vweird.f32 %v163_v39 }
 0x18b   :  { %v270_v40 = vpop.eup %269 }
 0x18c   :  { %v165_v41 = vmul.f32 %v270_v40, %v163_v39  ;;  %vm171_vm2 = vweird.f32 %v270_v40 }
 0x18d   :  { %vm172_vm4 = vmor %vm170_vm3, %vm171_vm2 }
 0x18e   :  { %v166_v42 = vmul.f32 %v270_v40, %v165_v41 }
 0x190   :  { %v167_v43 = vmul.f32 0.5, %v166_v42 }
 0x192   :  { %v168_v44 = vsub.f32 1.5, %v167_v43 }
 0x194   :  { %v169_v45 = vmul.f32 %v270_v40, %v168_v44 }
 0x196   :  { %v173_v46 = vsel %vm172_vm4, %v270_v40, %v169_v45 }
 0x197   :  { %v174_v47 = vmul.f32 %v173_v46, %v157_v32 }
 0x199   :  { %v175_v48 = vmax.f32 %v174_v47, 0.0 }
 0x19b   :  { %v176_v49 = vpack.c.bf16 %v175_v48, %v175_v48 }
 0x19d   :  { %255 = vmatmul.msk.bf16.vlgmr.msra.gmra.mxu3 %vm57_vm0, %v176_v49 }
 0x220   :  { %v209_v51 = vpop.f32.mrf.mxu3 }
 0x221   :  { %v210_v53 = vadd.f32 %v266_v50, %v209_v51 }
 0x223   :  { %v214_v54 = vadd.f32 %v213_v52, %v210_v53 }
 0x225   :  { %215 = vst.msk [vmem:[%s389_s10] sm:$0xff] %vm57_vm0, %v214_v54 }
 0x228   :  { %v211_v55 = vpop.f32.mrf.mxu3 }

// kernel: egem_forward.29
= control target key start
LH: loop header
LB: loop body
LE: loop exit
PB: predicated region body
PF: predicated region fallthrough
CT: control target
= control target key end

     0   :  { %s1113_s3 = smov 2   ;;  %s1114_s7 = smov 3   ;;  %vm164_vm0 = vcmask 261120   ;;  %v1117_v16 = vmov 32.0   ;;  %s1317_s0 = inlined_call_operand.smem [shape: u32[36], index: -1, kind: input, shape index: {}] }
   0x1   :  { %s855_s6 = sld [smem:[%s1317_s0 + %s1113_s3]]   ;;  %s1115_s14 = smov 1   ;;  %1099 = vrcp.f32 %v1117_v16 }
   0x2   :  { %s856_s10 = sld [smem:[%s1317_s0 + %s1114_s7]]   ;;  %s1116_s18 = smov 4  }
   0x3   :  { %s1_s13 = sld [smem:[%s1317_s0]]   ;;  %s1118_s22 = smov 6  }
   0x4   :  { %s854_s17 = sld [smem:[%s1317_s0 + %s1115_s14]]   ;;  %s1119_s26 = smov 5  }
   0x5   :  { %s857_s21 = sld [smem:[%s1317_s0 + %s1116_s18]]   ;;  %s1120_s30 = smov 12  }
   0x6   :  { %s1179_s25 = sld [smem:[%s1317_s0 + %s1118_s22]]   ;;  %s1121_s4 = smov 13  }
   0x7   :  { %v1025_v0 = vld [vmem:[%s855_s6 + $0x8] sm:$0xff]  ;;  %v1024_v2 = vld [vmem:[%s855_s6] sm:$0xff]  ;;  %v1100_v17 = vpop.eup %1099  ;;  %s858_s29 = sld [smem:[%s1317_s0 + %s1119_s26]]   ;;  %s1122_s8 = smov 14  }
   0x8   :  { %v1027_v1 = vld [vmem:[%s856_s10 + $0x8] sm:$0xff]  ;;  %174 = vmatpush.bf16.msra.mxu0 %v1025_v0  ;;  %v1026_v4 = vld [vmem:[%s856_s10] sm:$0xff]  ;;  %v223_v18 = vmul.f32 32.0, %v1100_v17  ;;  %vm227_vm1 = vweird.f32 %v1100_v17  ;;  %s865_s3 = sld [smem:[%s1317_s0 + %s1120_s30]]   ;;  %s1123_s12 = smov 9  }
   0x9   :  { %v144_v3 = vld [vmem:[%s1_s13] sm:$0xff]  ;;  %211 = vmatpush.bf16.msra.mxu1 %v1027_v1  ;;  %s866_s7 = sld [smem:[%s1317_s0 + %s1121_s4]]   ;;  %s1124_s16 = smov 10  }
   0xa   :  { %v145_v5 = vld [vmem:[%s854_s17] sm:$0xff]  ;;  %v147_v6 = vpack.c.bf16 %v144_v3, %v144_v3  ;;  %v224_v19 = vsub.f32 1.0, %v223_v18  ;;  %s867_s11 = sld [smem:[%s1317_s0 + %s1122_s8]]   ;;  %s1125_s20 = smov 11  }
   0xb   :  { %v185_v7 = vpack.c.bf16 %v145_v5, %v145_v5  ;;  %v1090_v8 = vld [vmem:[%s857_s21] ss:$0 sm:$0xff]  ;;  %s862_s15 = sld [smem:[%s1317_s0 + %s1123_s12]]   ;;  %s1126_s24 = smov 15  }
   0xc   :  { %175 = vmatpush.bf16.msra.mxu0 %v1024_v2  ;;  %v225_v20 = vmul.f32 %v1100_v17, %v224_v19  ;;  %s863_s19 = sld [smem:[%s1317_s0 + %s1124_s16]]   ;;  %v1091_v59 = vld [vmem:[%s1179_s25] ss:$0 sm:$0xff]  ;;  %s1127_s25 = smov 8  }
   0xd   :  { %212 = vmatpush.bf16.msra.mxu1 %v1026_v4  ;;  %v1029_v28 = vld [vmem:[%s858_s29 + $0x8] sm:$0xff]  ;;  %v1028_v29 = vld [vmem:[%s858_s29] sm:$0xff]  ;;  %s864_s23 = sld [smem:[%s1317_s0 + %s1125_s20]]   ;;  %s1128_s2 = smov 7  }
   0xe   :  { %v226_v21 = vadd.f32 %v1100_v17, %v225_v20  ;;  %279 = vmatpush.bf16.msra.mxu2 %v1029_v28  ;;  %v1033_v31 = vld [vmem:[%s865_s3 + $0x8] sm:$0xff]  ;;  %v1032_v33 = vld [vmem:[%s865_s3] sm:$0xff]  ;;  %s868_s28 = sld [smem:[%s1317_s0 + %s1126_s24]]   ;;  %s1129_s6 = smov 16  }
   0xf   :  { %897 = vmatmul.msk.bf16.vlgmr.msra.gmra.mxu0 %vm164_vm0, %v147_v6  ;;  %v1035_v32 = vld [vmem:[%s866_s7 + $0x8] sm:$0xff]  ;;  %v1034_v37 = vld [vmem:[%s866_s7] sm:$0xff]  ;;  %s1220_s1 = sld [smem:[%s1317_s0 + %s1127_s25]]   ;;  %s1130_s10 = smov 17  }
  0x10   :  { %906 = vmatmul.msk.bf16.vlgmr.msra.gmra.mxu1 %vm164_vm0, %v185_v7  ;;  %v1172_v22 = vsel %vm227_vm1, %v1100_v17, %v226_v21  ;;  %v1037_v30 = vld [vmem:[%s867_s11 + $0x8] sm:$0xff]  ;;  %377 = vmatpush.bf16.msrb.mxu0 %v1033_v31  ;;  %v1036_v34 = vld [vmem:[%s867_s11] sm:$0xff]  ;;  %s860_s5 = sld [smem:[%s1317_s0 + %s1128_s2]]   ;;  %s1131_s14 = smov 33  }
  0x11   :  { %v347_v35 = vld [vmem:[%s862_s15] sm:$0xff]  ;;  %414 = vmatpush.bf16.msrb.mxu1 %v1035_v32  ;;  %s869_s9 = sld [smem:[%s1317_s0 + %s1129_s6]]   ;;  %s1132_s18 = smov 19  }
  0x12   :  { %280 = vmatpush.bf16.msra.mxu2 %v1028_v29  ;;  %v348_v38 = vld [vmem:[%s863_s19] sm:$0xff]  ;;  %v351_v40 = vpack.c.bf16 %v347_v35, %v347_v35  ;;  %s870_s13 = sld [smem:[%s1317_s0 + %s1130_s10]]   ;;  %s1133_s22 = smov 25  }
  0x13   :  { %v388_v42 = vpack.c.bf16 %v348_v38, %v348_v38  ;;  %v349_v53 = vld [vmem:[%s864_s23] sm:$0xff]  ;;  %s886_s17 = sld [smem:[%s1317_s0 + %s1131_s14]]   ;;  %s1134_s27 = smov 18  }
  0x14   :  { %378 = vmatpush.bf16.msrb.mxu0 %v1032_v33  ;;  %v422_v54 = vpack.c.bf16 %v349_v53, %v349_v53  ;;  %v1092_v63 = vld [vmem:[%s868_s28] ss:$0 sm:$0xff]  ;;  %s1249_s21 = sld [smem:[%s1317_s0 + %s1132_s18]]   ;;  %s1135_s30 = smov 26  }
  0x15   :  { %415 = vmatpush.bf16.msrb.mxu1 %v1034_v37  ;;  %s878_s26 = sld [smem:[%s1317_s0 + %s1133_s22]]   ;;  %s1136_s4 = smov 24  }
  0x16   :  { %448 = vmatpush.bf16.msrb.mxu2 %v1037_v30  ;;  %v1031_v17 = vld [vmem:[%s860_s5 + $0x8] sm:$0xff]  ;;  %v1030_v18 = vld [vmem:[%s860_s5] sm:$0xff]  ;;  %s871_s29 = sld [smem:[%s1317_s0 + %s1134_s27]]   ;;  %s1137_s8 = smov 21  }
  0x17   :  { %339 = vmatpush.bf16.msra.mxu3 %v1031_v17  ;;  %s879_s3 = sld [smem:[%s1317_s0 + %s1135_s30]]   ;;  %s1138_s12 = smov 22  }
  0x18   :  { %s877_s7 = sld [smem:[%s1317_s0 + %s1136_s4]]   ;;  %s1139_s16 = smov 20  }
  0x19   :  { %s874_s11 = sld [smem:[%s1317_s0 + %s1137_s8]]   ;;  %s1140_s20 = smov 27  }
  0x1a   :  { %449 = vmatpush.bf16.msrb.mxu2 %v1036_v34  ;;  %s875_s15 = sld [smem:[%s1317_s0 + %s1138_s12]]   ;;  %s1145_s10 = smov 29  }
  0x1b   :  { %340 = vmatpush.bf16.msra.mxu3 %v1030_v18  ;;  %s873_s19 = sld [smem:[%s1317_s0 + %s1139_s16]]   ;;  %s1146_s14 = smov 32  }
  0x1c   :  { %s880_s24 = sld [smem:[%s1317_s0 + %s1140_s20]]   ;;  %s1147_s18 = smov 31  }
  0x1d   :  { %s884_s22 = sld [smem:[%s1317_s0 + %s1147_s18]]   ;;  %s1148_s23 = smov 35  }
  0x1e   :  { %s888_s27 = sld [smem:[%s1317_s0 + %s1148_s23]]  }
  0x1f   :  { %933 = vmatmul.msk.bf16.vlgmr.msrb.gmra.mxu0 %vm164_vm0, %v351_v40 }
  0x20   :  { %942 = vmatmul.msk.bf16.vlgmr.msrb.gmra.mxu1 %vm164_vm0, %v388_v42 }
  0x8c   :  { %v177_v9 = vpop.f32.mrf.mxu0 }
  0x8d   :  { %v184_v10 = vadd.f32 %v1090_v8, %v177_v9  ;;  %v214_v11 = vpop.f32.mrf.mxu1 }
  0x8f   :  { %v218_v12 = vadd.f32 %v214_v11, %v184_v10 }
  0x91   :  { %v219_v13 = vsel %vm164_vm0, %v218_v12, 0.0 }
  0x92   :  { %220 = vadd.xlane.f32.xlu0 %v219_v13 }
  0x94   :  { %v179_v14 = vpop.f32.mrf.mxu0 }
  0x95   :  { %v216_v15 = vpop.f32.mrf.mxu1 }
  0x9c   :  { %v380_v55 = vpop.f32.mrf.mxu0 }
  0x9d   :  { %v417_v56 = vpop.f32.mrf.mxu1  ;;  %v387_v1 = vadd.f32 %v1092_v63, %v380_v55  ;;  %v1041_v63 = vld [vmem:[%s871_s29 + $0x8] sm:$0xff] }
  0x9e   :  { %569 = vmatpush.bf16.msra.mxu0 %v1041_v63 }
  0x9f   :  { %v421_v2 = vadd.f32 %v417_v56, %v387_v1  ;;  %v1043_v1 = vld [vmem:[%s877_s7 + $0x8] sm:$0xff] }
  0xa0   :  { %608 = vmatpush.bf16.msra.mxu1 %v1043_v1 }
  0xa4   :  { %v382_v57 = vpop.f32.mrf.mxu0 }
  0xa5   :  { %v419_v58 = vpop.f32.mrf.mxu1 }
 0x105   :  { %v221_v23 = vpop.xlane.xlu0 %220 }
 0x106   :  { %v229_v24 = vmul.f32 %v1172_v22, %v221_v23  ;;  %v1039_v23 = vld [vmem:[%s869_s9 + $0x8] sm:$0xff] }
 0x107   :  { %509 = vmatpush.bf16.msrb.mxu3 %v1039_v23 }
 0x108   :  { %v230_v25 = vsub.f32 %v218_v12, %v229_v24  ;;  %v1038_v24 = vld [vmem:[%s869_s9] sm:$0xff] }
 0x10a   :  { %v231_v26 = vmul.f32 %v230_v25, %v230_v25 }
 0x10b   :  { %510 = vmatpush.bf16.msrb.mxu3 %v1038_v24 }
 0x10c   :  { %v232_v27 = vsel %vm164_vm0, %v231_v26, 0.0 }
 0x10d   :  { %233 = vadd.xlane.f32.xlu0 %v232_v27 }
 0x180   :  { %v234_v36 = vpop.xlane.xlu0 %233 }
 0x181   :  { %v235_v39 = vmul.f32 %v234_v36, %v1172_v22 }
 0x183   :  { %v236_v41 = vadd.f32 1e-05, %v235_v39 }
 0x185   :  { %1101 = vrsqrt.f32 %v236_v41  ;;  %vm243_vm3 = vweird.f32 %v236_v41 }
 0x18b   :  { %v1102_v43 = vpop.eup %1101 }
 0x18c   :  { %v238_v44 = vmul.f32 %v1102_v43, %v236_v41  ;;  %vm244_vm2 = vweird.f32 %v1102_v43 }
 0x18d   :  { %vm245_vm4 = vmor %vm243_vm3, %vm244_vm2 }
 0x18e   :  { %v239_v45 = vmul.f32 %v1102_v43, %v238_v44 }
 0x190   :  { %v240_v46 = vmul.f32 0.5, %v239_v45 }
 0x192   :  { %v241_v47 = vsub.f32 1.5, %v240_v46 }
 0x194   :  { %v242_v48 = vmul.f32 %v1102_v43, %v241_v47 }
 0x196   :  { %v246_v49 = vsel %vm245_vm4, %v1102_v43, %v242_v48  ;;  %v1093_v48 = vld [vmem:[%s1220_s1] ss:$0 sm:$0xff] }
 0x197   :  { %v247_v50 = vmul.f32 %v246_v49, %v230_v25 }
 0x199   :  { %v248_v51 = vmax.f32 %v247_v50, 0.0 }
 0x19b   :  { %v249_v52 = vpack.c.bf16 %v248_v51, %v248_v51 }
 0x19d   :  { %915 = vmatmul.msk.bf16.vlgmr.msra.gmra.mxu2 %vm164_vm0, %v249_v52  ;;  %v1094_v52 = vld [vmem:[%s870_s13] ss:$0 sm:$0xff]  ;;  %s882_s13 = sld [smem:[%s1317_s0 + %s1145_s10]]  }
 0x1ad   :  { %951 = vmatmul.msk.bf16.vlgmr.msrb.gmra.mxu2 %vm164_vm0, %v422_v54 }
 0x220   :  { %v282_v60 = vpop.f32.mrf.mxu2 }
 0x221   :  { %v283_v61 = vadd.f32 %v1091_v59, %v282_v60 }
 0x223   :  { %v286_v62 = vsel %vm164_vm0, %v283_v61, 0.0 }
 0x224   :  { %287 = vadd.xlane.f32.xlu1 %v286_v62  ;;  %v1045_v62 = vld [vmem:[%s878_s26 + $0x8] sm:$0xff] }
 0x225   :  { %645 = vmatpush.bf16.msra.mxu2 %v1045_v62 }
 0x228   :  { %v284_v0 = vpop.f32.mrf.mxu2 }
 0x229   :  { %v1047_v0 = vld [vmem:[%s879_s3 + $0x8] sm:$0xff] }
 0x230   :  { %v451_v3 = vpop.f32.mrf.mxu2 }
 0x231   :  { %v455_v4 = vadd.f32 %v451_v3, %v421_v2  ;;  %v1044_v2 = vld [vmem:[%s878_s26] sm:$0xff]  ;;  %s1141_s26 = smov 23  }
 0x232   :  { %v1040_v3 = vld [vmem:[%s871_s29] sm:$0xff]  ;;  %646 = vmatpush.bf16.msra.mxu2 %v1044_v2  ;;  %s876_s25 = sld [smem:[%s1317_s0 + %s1141_s26]]   ;;  %s1142_s29 = smov 28  }
 0x233   :  { %v456_v5 = vsel %vm164_vm0, %v455_v4, 0.0  ;;  %570 = vmatpush.bf16.msra.mxu0 %v1040_v3  ;;  %s881_s2 = sld [smem:[%s1317_s0 + %s1142_s29]]  }
 0x234   :  { %457 = vadd.xlane.f32.xlu1 %v456_v5  ;;  %v578_v5 = vld [vmem:[%s874_s11] sm:$0xff] }
 0x238   :  { %v453_v6 = vpop.f32.mrf.mxu2 }
 0x239   :  { %v619_v6 = vpack.c.bf16 %v578_v5, %v578_v5 }
 0x23b   :  { %987 = vmatmul.msk.bf16.vlgmr.msra.gmra.mxu2 %vm164_vm0, %v619_v6 }
 0x297   :  { %v288_v7 = vpop.xlane.xlu1 %287 }
 0x298   :  { %v289_v8 = vmul.f32 %v288_v7, %v1172_v22  ;;  %v1042_v7 = vld [vmem:[%s877_s7] sm:$0xff] }
 0x299   :  { %609 = vmatpush.bf16.msra.mxu1 %v1042_v7 }
 0x29a   :  { %v290_v9 = vsub.f32 %v283_v61, %v289_v8  ;;  %v579_v8 = vld [vmem:[%s875_s15] sm:$0xff] }
 0x29c   :  { %v291_v10 = vmul.f32 %v290_v9, %v290_v9 }
 0x29e   :  { %v292_v11 = vsel %vm164_vm0, %v291_v10, 0.0  ;;  %v1049_v10 = vld [vmem:[%s880_s24 + $0x8] sm:$0xff] }
 0x29f   :  { %293 = vadd.xlane.f32.xlu2 %v292_v11  ;;  %v577_v11 = vld [vmem:[%s873_s19] sm:$0xff]  ;;  %713 = vmatpush.bf16.msrb.mxu0 %v1049_v10 }
 0x2a7   :  { %v458_v12 = vpop.xlane.xlu1 %457 }
 0x2a8   :  { %v459_v13 = vmul.f32 %v458_v12, %v1172_v22  ;;  %v582_v12 = vpack.c.bf16 %v577_v11, %v577_v11 }
 0x2aa   :  { %v460_v14 = vsub.f32 %v455_v4, %v459_v13  ;;  %v1046_v4 = vld [vmem:[%s879_s3] sm:$0xff]  ;;  %978 = vmatmul.msk.bf16.vlgmr.msra.gmra.mxu1 %vm164_vm0, %v582_v12  ;;  %s1143_s3 = smov 34  }
 0x2ab   :  { %v1048_v13 = vld [vmem:[%s880_s24] sm:$0xff]  ;;  %s887_s6 = sld [smem:[%s1317_s0 + %s1143_s3]]  }
 0x2ac   :  { %v461_v15 = vmul.f32 %v460_v14, %v460_v14  ;;  %714 = vmatpush.bf16.msrb.mxu0 %v1048_v13 }
 0x2ae   :  { %v462_v16 = vsel %vm164_vm0, %v461_v15, 0.0 }
 0x2af   :  { %463 = vadd.xlane.f32.xlu2 %v462_v16 }
 0x312   :  { %v294_v19 = vpop.xlane.xlu2 %293 }
 0x313   :  { %v295_v20 = vmul.f32 %v294_v19, %v1172_v22 }
 0x315   :  { %v296_v21 = vadd.f32 1e-05, %v295_v20 }
 0x317   :  { %1103 = vrsqrt.f32 %v296_v21  ;;  %vm303_vm6 = vweird.f32 %v296_v21 }
 0x31d   :  { %v1104_v25 = vpop.eup %1103 }
 0x31e   :  { %v298_v26 = vmul.f32 %v1104_v25, %v296_v21  ;;  %vm304_vm5 = vweird.f32 %v1104_v25 }
 0x31f   :  { %vm305_vm7 = vmor %vm303_vm6, %vm304_vm5 }
 0x320   :  { %v299_v27 = vmul.f32 %v1104_v25, %v298_v26 }
 0x322   :  { %v300_v28 = vmul.f32 0.5, %v299_v27  ;;  %v464_v29 = vpop.xlane.xlu2 %463 }
 0x323   :  { %v465_v30 = vmul.f32 %v464_v29, %v1172_v22 }
 0x324   :  { %v301_v31 = vsub.f32 1.5, %v300_v28  ;;  %v580_v28 = vld [vmem:[%s876_s25] sm:$0xff] }
 0x325   :  { %v466_v32 = vadd.f32 1e-05, %v465_v30  ;;  %v687_v29 = vpack.c.bf16 %v580_v28, %v580_v28 }
 0x326   :  { %v302_v33 = vmul.f32 %v1104_v25, %v301_v31  ;;  %v648_v31 = vpop.f32.mrf.mxu2 }
 0x327   :  { %1105 = vrsqrt.f32 %v466_v32  ;;  %vm473_vm9 = vweird.f32 %v466_v32  ;;  %v611_v30 = vpop.f32.mrf.mxu1 }
 0x328   :  { %v306_v34 = vsel %vm305_vm7, %v1104_v25, %v302_v33 }
 0x329   :  { %v307_v35 = vmul.f32 %v306_v34, %v290_v9  ;;  %v653_v9 = vpack.c.bf16 %v579_v8, %v579_v8 }
 0x32b   :  { %v308_v36 = vmax.f32 %v307_v35, 0.0 }
 0x32d   :  { %v1106_v37 = vpop.eup %1105  ;;  %v309_v38 = vpack.c.bf16 %v308_v36, %v308_v36  ;;  %v1095_v36 = vld [vmem:[%s1249_s21] ss:$0 sm:$0xff]  ;;  %s1144_s21 = smov 30  }
 0x32e   :  { %v468_v39 = vmul.f32 %v1106_v37, %v466_v32  ;;  %vm474_vm8 = vweird.f32 %v1106_v37  ;;  %v650_v34 = vpop.f32.mrf.mxu2  ;;  %s883_s9 = sld [smem:[%s1317_s0 + %s1144_s21]]  }
 0x32f   :  { %924 = vmatmul.msk.bf16.vlgmr.msra.gmra.mxu3 %vm164_vm0, %v309_v38  ;;  %vm475_vm10 = vmor %vm473_vm9, %vm474_vm8  ;;  %v613_v33 = vpop.f32.mrf.mxu1 }
 0x330   :  { %v469_v40 = vmul.f32 %v1106_v37, %v468_v39  ;;  %679 = vmatpush.bf16.msra.mxu3 %v1047_v0  ;;  %v1096_v39 = vld [vmem:[%s881_s2] ss:$0 sm:$0xff] }
 0x332   :  { %v470_v41 = vmul.f32 0.5, %v469_v40  ;;  %v618_v40 = vadd.f32 %v1096_v39, %v611_v30 }
 0x334   :  { %v471_v42 = vsub.f32 1.5, %v470_v41  ;;  %680 = vmatpush.bf16.msra.mxu3 %v1046_v4  ;;  %v1097_v4 = vld [vmem:[%s883_s9] ss:$0 sm:$0xff] }
 0x336   :  { %v472_v43 = vmul.f32 %v1106_v37, %v471_v42  ;;  %v652_v42 = vadd.f32 %v648_v31, %v618_v40 }
 0x338   :  { %v476_v44 = vsel %vm475_vm10, %v1106_v37, %v472_v43 }
 0x339   :  { %v477_v45 = vmul.f32 %v476_v44, %v460_v14 }
 0x33b   :  { %v478_v46 = vmax.f32 %v477_v45, 0.0 }
 0x33d   :  { %v479_v47 = vpack.c.bf16 %v478_v46, %v478_v46 }
 0x33f   :  { %960 = vmatmul.msk.bf16.vlgmr.msrb.gmra.mxu3 %vm164_vm0, %v479_v47 }
 0x34f   :  { %996 = vmatmul.msk.bf16.vlgmr.msra.gmra.mxu3 %vm164_vm0, %v653_v9 }
 0x3b2   :  { %v342_v49 = vpop.f32.mrf.mxu3 }
 0x3b3   :  { %v343_v50 = vadd.f32 %v1093_v48, %v342_v49 }
 0x3b5   :  { %346 = vst [vmem:[%s886_s17] sm:$0xff] %v343_v50  ;;  %s885_s17 = sld [smem:[%s1317_s0 + %s1146_s14]]  }
 0x3ba   :  { %v344_v51 = vpop.f32.mrf.mxu3 }
 0x3c2   :  { %v512_v53 = vpop.f32.mrf.mxu3 }
 0x3c3   :  { %v513_v54 = vadd.f32 %v1094_v52, %v512_v53  ;;  %v1051_v53 = vld [vmem:[%s882_s13 + $0x8] sm:$0xff] }
 0x3c4   :  { %774 = vmatpush.bf16.msrb.mxu1 %v1051_v53 }
 0x3c5   :  { %v516_v55 = vsel %vm164_vm0, %v513_v54, 0.0 }
 0x3c6   :  { %517 = vadd.xlane.f32.xlu0 %v516_v55 }
 0x3ca   :  { %v514_v56 = vpop.f32.mrf.mxu3 }
 0x3d2   :  { %v682_v32 = vpop.f32.mrf.mxu3 }
 0x3d3   :  { %v686_v43 = vadd.f32 %v682_v32, %v652_v42 }
 0x3da   :  { %v684_v35 = vpop.f32.mrf.mxu3 }
 0x439   :  { %v518_v57 = vpop.xlane.xlu0 %517 }
 0x43a   :  { %v519_v58 = vmul.f32 %v518_v57, %v1172_v22 }
 0x43c   :  { %v1241_v59 = vsub.f32 %v513_v54, %v519_v58  ;;  %v1050_v54 = vld [vmem:[%s882_s13] sm:$0xff] }
 0x43d   :  { %775 = vmatpush.bf16.msrb.mxu1 %v1050_v54 }
 0x43e   :  { %v521_v60 = vmul.f32 %v1241_v59, %v1241_v59 }
 0x440   :  { %v522_v61 = vsel %vm164_vm0, %v521_v60, 0.0 }
 0x441   :  { %523 = vadd.xlane.f32.xlu1 %v522_v61 }
 0x4b4   :  { %v524_v14 = vpop.xlane.xlu1 %523 }
 0x4b5   :  { %v525_v15 = vmul.f32 %v524_v14, %v1172_v22  ;;  %v1053_v14 = vld [vmem:[%s884_s22 + $0x8] sm:$0xff] }
 0x4b6   :  { %834 = vmatpush.bf16.msrb.mxu2 %v1053_v14 }
 0x4b7   :  { %v526_v16 = vadd.f32 1e-05, %v525_v15  ;;  %v1052_v15 = vld [vmem:[%s884_s22] sm:$0xff] }
 0x4b9   :  { %1107 = vrsqrt.f32 %v526_v16  ;;  %vm533_vm12 = vweird.f32 %v526_v16 }
 0x4ba   :  { %835 = vmatpush.bf16.msrb.mxu2 %v1052_v15 }
 0x4bf   :  { %v1108_v17 = vpop.eup %1107 }
 0x4c0   :  { %v528_v18 = vmul.f32 %v1108_v17, %v526_v16  ;;  %vm534_vm11 = vweird.f32 %v1108_v17 }
 0x4c1   :  { %vm535_vm13 = vmor %vm533_vm12, %vm534_vm11 }
 0x4c2   :  { %v529_v19 = vmul.f32 %v1108_v17, %v528_v18 }
 0x4c4   :  { %v530_v20 = vmul.f32 0.5, %v529_v19 }
 0x4c6   :  { %v531_v21 = vsub.f32 1.5, %v530_v20 }
 0x4c8   :  { %v532_v23 = vmul.f32 %v1108_v17, %v531_v21 }
 0x4ca   :  { %v536_v24 = vsel %vm535_vm13, %v1108_v17, %v532_v23 }
 0x4cb   :  { %v537_v25 = vmul.f32 %v536_v24, %v1241_v59 }
 0x4cd   :  { %v538_v26 = vmax.f32 %v537_v25, 0.0 }
 0x4cf   :  { %v539_v27 = vpack.c.bf16 %v538_v26, %v538_v26 }
 0x4d1   :  { %969 = vmatmul.msk.bf16.vlgmr.msra.gmra.mxu0 %vm164_vm0, %v539_v27 }
 0x4e1   :  { %1005 = vmatmul.msk.bf16.vlgmr.msrb.gmra.mxu0 %vm164_vm0, %v687_v29 }
 0x54e   :  { %v572_v37 = vpop.f32.mrf.mxu0 }
 0x54f   :  { %v573_v38 = vadd.f32 %v1095_v36, %v572_v37 }
 0x551   :  { %576 = vst [vmem:[%s887_s6] sm:$0xff] %v573_v38 }
 0x556   :  { %v574_v41 = vpop.f32.mrf.mxu0 }
 0x55e   :  { %v716_v44 = vpop.f32.mrf.mxu0 }
 0x55f   :  { %v720_v45 = vadd.f32 %v716_v44, %v686_v43 }
 0x561   :  { %v721_v46 = vsel %vm164_vm0, %v720_v45, 0.0 }
 0x562   :  { %722 = vadd.xlane.f32.xlu2 %v721_v46 }
 0x566   :  { %v718_v47 = vpop.f32.mrf.mxu0 }
 0x5d5   :  { %v723_v48 = vpop.xlane.xlu2 %722 }
 0x5d6   :  { %v724_v49 = vmul.f32 %v723_v48, %v1172_v22 }
 0x5d8   :  { %v725_v50 = vsub.f32 %v720_v45, %v724_v49 }
 0x5da   :  { %v726_v51 = vmul.f32 %v725_v50, %v725_v50 }
 0x5dc   :  { %v727_v52 = vsel %vm164_vm0, %v726_v51, 0.0 }
 0x5dd   :  { %728 = vadd.xlane.f32.xlu0 %v727_v52 }
 0x650   :  { %v729_v55 = vpop.xlane.xlu0 %728 }
 0x651   :  { %v730_v56 = vmul.f32 %v729_v55, %v1172_v22 }
 0x653   :  { %v731_v57 = vadd.f32 1e-05, %v730_v56 }
 0x655   :  { %1109 = vrsqrt.f32 %v731_v57  ;;  %vm738_vm15 = vweird.f32 %v731_v57 }
 0x65b   :  { %v1110_v58 = vpop.eup %1109 }
 0x65c   :  { %v733_v59 = vmul.f32 %v1110_v58, %v731_v57  ;;  %vm739_vm14 = vweird.f32 %v1110_v58 }
 0x65d   :  { %vm740_vm1 = vmor %vm738_vm15, %vm739_vm14 }
 0x65e   :  { %v734_v60 = vmul.f32 %v1110_v58, %v733_v59 }
 0x660   :  { %v735_v61 = vmul.f32 0.5, %v734_v60 }
 0x662   :  { %v736_v62 = vsub.f32 1.5, %v735_v61 }
 0x664   :  { %v737_v63 = vmul.f32 %v1110_v58, %v736_v62 }
 0x666   :  { %v741_v0 = vsel %vm740_vm1, %v1110_v58, %v737_v63 }
 0x667   :  { %v742_v1 = vmul.f32 %v741_v0, %v725_v50 }
 0x669   :  { %v743_v2 = vmax.f32 %v742_v1, 0.0 }
 0x66b   :  { %v744_v3 = vpack.c.bf16 %v743_v2, %v743_v2 }
 0x66d   :  { %1014 = vmatmul.msk.bf16.vlgmr.msrb.gmra.mxu1 %vm164_vm0, %v744_v3 }
 0x6ea   :  { %v777_v5 = vpop.f32.mrf.mxu1 }
 0x6eb   :  { %v778_v6 = vadd.f32 %v1097_v4, %v777_v5 }
 0x6ed   :  { %v781_v7 = vsel %vm164_vm0, %v778_v6, 0.0 }
 0x6ee   :  { %782 = vadd.xlane.f32.xlu1 %v781_v7 }
 0x6f2   :  { %v779_v8 = vpop.f32.mrf.mxu1 }
 0x761   :  { %v783_v9 = vpop.xlane.xlu1 %782 }
 0x762   :  { %v784_v10 = vmul.f32 %v783_v9, %v1172_v22 }
 0x764   :  { %v785_v11 = vsub.f32 %v778_v6, %v784_v10 }
 0x766   :  { %v786_v12 = vmul.f32 %v785_v11, %v785_v11 }
 0x768   :  { %v787_v13 = vsel %vm164_vm0, %v786_v12, 0.0 }
 0x769   :  { %788 = vadd.xlane.f32.xlu2 %v787_v13 }
 0x7dc   :  { %v789_v16 = vpop.xlane.xlu2 %788 }
 0x7dd   :  { %v790_v17 = vmul.f32 %v789_v16, %v1172_v22  ;;  %v1098_v22 = vld [vmem:[%s885_s17] ss:$0 sm:$0xff] }
 0x7df   :  { %v791_v18 = vadd.f32 1e-05, %v790_v17 }
 0x7e1   :  { %1111 = vrsqrt.f32 %v791_v18  ;;  %vm798_vm3 = vweird.f32 %v791_v18 }
 0x7e7   :  { %v1112_v19 = vpop.eup %1111 }
 0x7e8   :  { %v793_v20 = vmul.f32 %v1112_v19, %v791_v18  ;;  %vm799_vm2 = vweird.f32 %v1112_v19 }
 0x7e9   :  { %vm800_vm4 = vmor %vm798_vm3, %vm799_vm2 }
 0x7ea   :  { %v794_v21 = vmul.f32 %v1112_v19, %v793_v20 }
 0x7ec   :  { %v795_v23 = vmul.f32 0.5, %v794_v21 }
 0x7ee   :  { %v796_v24 = vsub.f32 1.5, %v795_v23 }
 0x7f0   :  { %v797_v25 = vmul.f32 %v1112_v19, %v796_v24 }
 0x7f2   :  { %v801_v26 = vsel %vm800_vm4, %v1112_v19, %v797_v25 }
 0x7f3   :  { %v802_v27 = vmul.f32 %v801_v26, %v785_v11 }
 0x7f5   :  { %v803_v28 = vmax.f32 %v802_v27, 0.0 }
 0x7f7   :  { %v804_v29 = vpack.c.bf16 %v803_v28, %v803_v28 }
 0x7f9   :  { %1023 = vmatmul.msk.bf16.vlgmr.msrb.gmra.mxu2 %vm164_vm0, %v804_v29 }
 0x87c   :  { %v837_v30 = vpop.f32.mrf.mxu2 }
 0x87d   :  { %v838_v31 = vadd.f32 %v1098_v22, %v837_v30 }
 0x87f   :  { %841 = vst [vmem:[%s888_s27] sm:$0xff] %v838_v31 }
 0x884   :  { %v839_v32 = vpop.f32.mrf.mxu2 }

</bundles_post_ra>
